<compile_context>
chip_gen: v7x
topology: tpu7x:2x2x1
jax: 0.10.0
libtpu: 0.0.40
codegen_flags: <defaults>
</compile_context>

<pallas_src>
import functools

import jax
import jax.numpy as jnp
from jax.experimental import pallas as pl
from jax.experimental.pallas import tpu as pltpu

_RMS_EPS = 1.1920929e-07      # torch.finfo(torch.float32).eps (F.rms_norm default)
_ATTN_SCALE = 0.12
_NEG_BIG = -1e30              # finite "masked"/init value (avoids inf-inf NaN)
_VMEM_LIMIT = 48 * 1024 * 1024


def _rms_norm(x):
    ms = jnp.mean(x * x, axis=-1, keepdims=True)
    return x * jax.lax.rsqrt(ms + _RMS_EPS)


# ------------------ kernel 1: fused qkv + norm + rotary + mix ----------------- #

def qkv_prep_kernel(x_ref, wqkv_ref, cos_ref, sin_ref, lam_ref, *rest,
                    num_heads, head_dim, has_ve):
    if has_ve:
        ve_ref, q_out, k_out, v_out = rest
    else:
        q_out, k_out, v_out = rest

    hdim = num_heads * head_dim
    half = head_dim // 2

    # x and Wqkv arrive already in bf16 (cast in the wrapper): bf16 MXU
    # operands, f32 accumulation.
    qkv = jnp.dot(x_ref[...], wqkv_ref[...],
                  preferred_element_type=jnp.float32)            # (tt, 3*hdim) f32

    cos = cos_ref[...]        # (tt, head_dim) == concat([cos,  cos], -1)
    sin = sin_ref[...]        # (tt, head_dim) == concat([sin, -sin], -1)
    lam0 = lam_ref[0]
    lam1 = lam_ref[1] if has_ve else None

    def rope(u):
        # [u1*cos + u2*sin, -u1*sin + u2*cos]: swapping the two halves is a
        # roll by head_dim//2 (cheap XLU lane rotation, direction irrelevant).
        return u * cos + pltpu.roll(u, shift=half, axis=1) * sin

    # Short static loop (num_heads=2 here); each head is written in place.
    for h in range(num_heads):
        sl = slice(h * head_dim, (h + 1) * head_dim)
        q = _rms_norm(qkv[:, h * head_dim:(h + 1) * head_dim])
        k = _rms_norm(qkv[:, hdim + h * head_dim:hdim + (h + 1) * head_dim])
        v = qkv[:, 2 * hdim + h * head_dim:2 * hdim + (h + 1) * head_dim]

        q = rope(q) * _ATTN_SCALE             # fold softmax scale into q
        k = rope(k)
        if has_ve:
            v = lam0 * v + lam1 * ve_ref[:, sl].astype(jnp.float32)
        else:
            v = lam0 * v

        q_out[:, sl] = q.astype(q_out.dtype)
        k_out[:, sl] = k.astype(k_out.dtype)
        v_out[:, sl] = v.astype(v_out.dtype)


# ---- kernel 2: flash attention (triangular step grid) + fused projection ---- #

def flash_attn_proj_kernel(qi_map_ref, kv_map_ref,
                           q_ref, k_ref, v_ref, wproj_ref, o_ref,
                           m_ref, l_ref, acc_ref,
                           *, num_heads, head_dim, q_tile, kv_tile):
    step = pl.program_id(0)
    qi = qi_map_ref[step]                   # current q-tile block index
    kv = kv_map_ref[step]                   # current kv-tile block index
    last_kv = ((qi + 1) * q_tile - 1) // kv_tile
    q_start = qi * q_tile
    kv_start = kv * kv_tile

    # Online-softmax state is (re)initialised at the first kv step of each q
    # tile.  Correctness relies on kv ascending from 0 for every q tile (dense
    # causal schedule built in _triangular_steps); every q row then sees at
    # least one unmasked key in its first kv tile, so m stays well-defined.
    @pl.when(kv == 0)
    def _():
        m_ref[...] = jnp.full(m_ref.shape, _NEG_BIG, m_ref.dtype)
        l_ref[...] = jnp.zeros(l_ref.shape, l_ref.dtype)
        acc_ref[...] = jnp.zeros(acc_ref.shape, acc_ref.dtype)

    def one_pass(apply_mask):
        for h in range(num_heads):
            hs = slice(h * head_dim, (h + 1) * head_dim)
            # q already carries the 0.12 softmax scale (folded in kernel 1).
            s = jax.lax.dot_general(q_ref[:, hs], k_ref[:, hs],
                                    (((1,), (1,)), ((), ())),
                                    preferred_element_type=jnp.float32)
            if apply_mask:
                row = q_start + jax.lax.broadcasted_iota(jnp.int32, s.shape, 0)
                col = kv_start + jax.lax.broadcasted_iota(jnp.int32, s.shape, 1)
                s = jnp.where(col <= row, s, _NEG_BIG)
            m_prev = m_ref[h]                                       # (q_tile, 1)
            m_new = jnp.maximum(m_prev, jnp.max(s, axis=-1, keepdims=True))
            alpha = jnp.exp(m_prev - m_new)
            p = jnp.exp(s - m_new)
            l_ref[h] = alpha * l_ref[h] + jnp.sum(p, axis=-1, keepdims=True)
            acc_ref[:, hs] = alpha * acc_ref[:, hs] + jnp.dot(
                p.astype(v_ref.dtype), v_ref[:, hs],
                preferred_element_type=jnp.float32)
            m_ref[h] = m_new

    # Tiles fully below the diagonal need no in-tile mask; only the
    # diagonal-straddling tile pays for the iota compare/select.
    straddles = (kv_start + (kv_tile - 1)) > q_start

    @pl.when(jnp.logical_not(straddles))
    def _():
        one_pass(False)

    @pl.when(straddles)
    def _():
        one_pass(True)

    # Finalize + fused output projection at the last kv step of this q tile:
    # one (q_tile, hdim) x (hdim, D) MXU matmul; y never touches HBM.
    @pl.when(kv == last_kv)
    def _():
        for h in range(num_heads):
            hs = slice(h * head_dim, (h + 1) * head_dim)
            inv = pl.reciprocal(l_ref[h], approx=True)   # EUP; ~1e-3 rel err
            acc_ref[:, hs] = acc_ref[:, hs] * inv
        y = acc_ref[...].astype(wproj_ref.dtype)          # (q_tile, hdim) bf16
        o_ref[...] = jnp.dot(y, wproj_ref[...],
                             preferred_element_type=jnp.float32
                             ).astype(o_ref.dtype)


# ------------------------------ pallas wrappers ------------------------------ #

def _pick_tile(n, preferred=256):
    t = min(n, preferred)
    while n % t:
        t -= 8
    return max(t, 8)


def _triangular_steps(T, q_tile, kv_tile):
    """Lower-triangular enumeration of (q_tile, kv_tile) pairs, kv ascending."""
    qi_list, kv_list = [], []
    for qi in range(T // q_tile):
        last_kv = ((qi + 1) * q_tile - 1) // kv_tile
        for kv in range(last_kv + 1):
            qi_list.append(qi)
            kv_list.append(kv)
    return (jnp.asarray(qi_list, jnp.int32), jnp.asarray(kv_list, jnp.int32))


def qkv_prep(x2d, ve2d, wqkv_t, cos_full, sin_signed, lambdas,
             *, num_heads, head_dim, t_tile):
    T, D = x2d.shape
    hdim = num_heads * head_dim
    has_ve = ve2d is not None
    kernel = functools.partial(qkv_prep_kernel, num_heads=num_heads,
                               head_dim=head_dim, has_ve=has_ve)
    in_specs = [
        pl.BlockSpec((t_tile, D), lambda i: (i, 0)),                  # x tile (bf16)
        pl.BlockSpec((D, 3 * hdim), lambda i: (0, 0)),                # Wqkv resident
        pl.BlockSpec((t_tile, head_dim), lambda i: (i, 0)),           # cos (full width)
        pl.BlockSpec((t_tile, head_dim), lambda i: (i, 0)),           # sin (signed)
        pl.BlockSpec(memory_space=pltpu.MemorySpace.SMEM),            # lambdas
    ]
    args = [x2d, wqkv_t, cos_full, sin_signed, lambdas]
    if has_ve:
        in_specs.append(pl.BlockSpec((t_tile, hdim), lambda i: (i, 0)))
        args.append(ve2d)
    out_specs = tuple(pl.BlockSpec((t_tile, hdim), lambda i: (i, 0))
                      for _ in range(3))
    out_shape = tuple(jax.ShapeDtypeStruct((T, hdim), jnp.bfloat16)
                      for _ in range(3))
    return pl.pallas_call(
        kernel,
        grid=(T // t_tile,),
        in_specs=in_specs,
        out_specs=out_specs,
        out_shape=out_shape,
        compiler_params=pltpu.CompilerParams(
            dimension_semantics=("parallel",),
            vmem_limit_bytes=_VMEM_LIMIT),
    )(*args)


def flash_attention_proj(q, k, v, wproj_t, *, num_heads, head_dim,
                         q_tile, kv_tile):
    T, hdim = q.shape
    Dp = wproj_t.shape[1]
    qi_map, kv_map = _triangular_steps(T, q_tile, kv_tile)
    n_steps = int(qi_map.shape[0])
    kernel = functools.partial(flash_attn_proj_kernel, num_heads=num_heads,
                               head_dim=head_dim, q_tile=q_tile, kv_tile=kv_tile)
    grid_spec = pltpu.PrefetchScalarGridSpec(
        num_scalar_prefetch=2,
        grid=(n_steps,),
        in_specs=[
            # q loaded once per q tile (index constant across its kv steps).
            pl.BlockSpec((q_tile, hdim), lambda s, qi, kv: (qi[s], 0)),
            # one fat K / V DMA per (q,kv) step — only needed tiles enumerated.
            pl.BlockSpec((kv_tile, hdim), lambda s, qi, kv: (kv[s], 0)),
            pl.BlockSpec((kv_tile, hdim), lambda s, qi, kv: (kv[s], 0)),
            # Wproj resident for the whole grid.
            pl.BlockSpec((hdim, Dp), lambda s, qi, kv: (0, 0)),
        ],
        out_specs=pl.BlockSpec((q_tile, Dp), lambda s, qi, kv: (qi[s], 0)),
        scratch_shapes=[
            pltpu.VMEM((num_heads, q_tile, 1), jnp.float32),   # m (per head)
            pltpu.VMEM((num_heads, q_tile, 1), jnp.float32),   # l (per head)
            pltpu.VMEM((q_tile, hdim), jnp.float32),           # acc (heads concat)
        ],
    )
    return pl.pallas_call(
        kernel,
        grid_spec=grid_spec,
        out_shape=jax.ShapeDtypeStruct((T, Dp), jnp.float32),
        compiler_params=pltpu.CompilerParams(
            dimension_semantics=("arbitrary",),
            vmem_limit_bytes=_VMEM_LIMIT),
    )(qi_map, kv_map, q, k, v, wproj_t)


def causal_self_attention(x, ve, params, *, num_heads, head_dim,
                          q_tile=None, kv_tile=None):
    """Equivalent of CausalSelfAttention.forward(x, ve, block_mask), causal mask."""
    B, T, D = x.shape
    assert B == 1, "batch size must be 1 (matches the FlexAttention path)"
    hdim = num_heads * head_dim

    q_tile = q_tile or _pick_tile(T)
    kv_tile = kv_tile or q_tile
    assert T % q_tile == 0 and T % kv_tile == 0

    # bf16 inputs: halves x/ve HBM->VMEM traffic of the mem-bound prep kernel.
    x2d = x[0].astype(jnp.bfloat16)
    ve2d = None if ve is None else ve.reshape(T, hdim).astype(jnp.bfloat16)
    cos_full = params["rot_cos_full"][:T]
    sin_signed = params["rot_sin_signed"][:T]

    q, k, v = qkv_prep(x2d, ve2d, params["qkv_w_t_bf16"], cos_full, sin_signed,
                       params["attn_lambdas"],
                       num_heads=num_heads, head_dim=head_dim, t_tile=q_tile)
    out = flash_attention_proj(q, k, v, params["proj_w_t_pad_bf16"],
                               num_heads=num_heads, head_dim=head_dim,
                               q_tile=q_tile, kv_tile=kv_tile)
    if out.shape[1] != D:          # only when D is not already lane-dense
        out = out[:, :D]
    return out[None]

    # TODO(synk): arbitrary FlexAttention BlockMask sparsity patterns (document
    # masking) are not implemented; only the dense causal semantics are fused.


# -------------------------------- parameters --------------------------------- #

def init_params(key, dim, num_heads, max_seq_len, head_dim=128):
    hdim = num_heads * head_dim
    k1, k2 = jax.random.split(key, 2)

    bound = (3.0 ** 0.5) * 0.5 * dim ** -0.5
    qkv_w = jax.random.uniform(k1, (3, hdim, dim), jnp.float32, -bound, bound)

    # original module zero-inits c_proj.weight; use CastedLinear default init
    # so the kernel does non-trivial work (documented deviation).
    b_proj = (3.0 ** 0.5) * 0.5 * hdim ** -0.5
    proj_w = jax.random.uniform(k2, (dim, hdim), jnp.float32, -b_proj, b_proj)

    # Rotary tables: head_dim//4 real freqs + head_dim//4 zero freqs.
    freqs = (1.0 / 1024.0) ** jnp.linspace(0.0, 1.0, head_dim // 4, dtype=jnp.float32)
    freqs = jnp.concatenate([freqs, jnp.zeros(head_dim // 4, jnp.float32)])
    t = jnp.arange(max_seq_len, dtype=jnp.float32)
    theta = t[:, None] * freqs[None, :]                  # (S, head_dim // 2)
    cos, sin = jnp.cos(theta), jnp.sin(theta)

    Dp = ((dim + 127) // 128) * 128                      # lane-dense padded width
    proj_w_t_pad = jnp.zeros((hdim, Dp), jnp.float32).at[:, :dim].set(proj_w.T)

    return dict(
        # reference-form (f32) parameters
        qkv_w=qkv_w,
        proj_w=proj_w,
        attn_lambdas=jnp.array([0.5, 0.5], jnp.float32),
        rot_cos=cos,
        rot_sin=sin,
        # kernel-form parameters: pre-transposed, bf16, padded, full-width rotary
        qkv_w_t_bf16=qkv_w.reshape(3 * hdim, dim).T.astype(jnp.bfloat16),
        proj_w_t_pad_bf16=proj_w_t_pad.astype(jnp.bfloat16),
        rot_cos_full=jnp.concatenate([cos, cos], axis=-1),
        rot_sin_signed=jnp.concatenate([sin, -sin], axis=-1),
    )


# ------------------------------ pure-JAX reference ---------------------------- #

def reference_attention(x, ve, p, *, num_heads, head_dim):
    B, T, D = x.shape
    hdim = num_heads * head_dim
    w = p["qkv_w"].reshape(3 * hdim, D)
    qkv = (x @ w.T).reshape(B, T, 3 * num_heads, head_dim)
    q, k, v = jnp.split(qkv, 3, axis=2)
    q, k = _rms_norm(q), _rms_norm(k)

    cos = p["rot_cos"][:T][None, :, None, :]
    sin = p["rot_sin"][:T][None, :, None, :]

    def rope(u):
        u1, u2 = jnp.split(u, 2, axis=-1)
        return jnp.concatenate([u1 * cos + u2 * sin, -u1 * sin + u2 * cos], axis=-1)

    q, k = rope(q), rope(k)
    lam = p["attn_lambdas"]
    if ve is not None:
        v = lam[0] * v + lam[1] * ve.reshape(B, T, num_heads, head_dim)
    else:
        v = lam[0] * v

    att = jnp.einsum("bthd,bshd->bhts", q, k) * _ATTN_SCALE
    mask = jnp.tril(jnp.ones((T, T), bool))
    att = jnp.where(mask[None, None], att, -jnp.inf)
    att = jax.nn.softmax(att, axis=-1)
    y = jnp.einsum("bhts,bshd->bthd", att, v).reshape(B, T, hdim)
    return y @ p["proj_w"].T


# ------------------------------------ main ------------------------------------ #

if __name__ == "__main__":
    dim, num_heads, head_dim = 128, 2, 128      # D % 128 == 0 -> lane-dense output
    B, T, max_seq_len = 1, 512, 512             # 2 q tiles x 2 kv tiles @ 256

    key = jax.random.PRNGKey(0)
    kp, kx, kve = jax.random.split(key, 3)
    params = init_params(kp, dim, num_heads, max_seq_len, head_dim)

    x = jax.random.normal(kx, (B, T, dim), jnp.float32)
    ve = jax.random.normal(kve, (B, T, num_heads * head_dim), jnp.float32)

    # with value embeddings (default 256 tiles -> triangular grid of 3 steps)
    out = causal_self_attention(x, ve, params, num_heads=num_heads,
                                head_dim=head_dim)
    jax.block_until_ready(out)
    assert out.shape == (B, T, dim) and out.dtype == jnp.float32
    ref = reference_attention(x, ve, params, num_heads=num_heads, head_dim=head_dim)
    err = float(jnp.max(jnp.abs(out - ref)))
    assert err < 1e-1, f"max abs err (ve path) = {err}"

    # ve=None variant (no ve DMA / mixing compiled in)
    out2 = causal_self_attention(x, None, params, num_heads=num_heads,
                                 head_dim=head_dim)
    jax.block_until_ready(out2)
    ref2 = reference_attention(x, None, params, num_heads=num_heads, head_dim=head_dim)
    err2 = float(jnp.max(jnp.abs(out2 - ref2)))
    assert err2 < 1e-1, f"max abs err (no-ve path) = {err2}"

    print("KERNEL_OK")
</pallas_src>

<mosaic_0001>
module attributes {stable_mosaic.version = 11 : i64} {
  func.func @qkv_prep_kernel(%arg0: i32, %arg1: memref<256x128xbf16, #tpu.memory_space<vmem>>, %arg2: memref<128x768xbf16, #tpu.memory_space<vmem>>, %arg3: memref<256x128xf32, #tpu.memory_space<vmem>>, %arg4: memref<256x128xf32, #tpu.memory_space<vmem>>, %arg5: memref<2xf32, #tpu.memory_space<smem>>, %arg6: memref<256x256xbf16, #tpu.memory_space<vmem>>, %arg7: memref<256x256xbf16, #tpu.memory_space<vmem>>, %arg8: memref<256x256xbf16, #tpu.memory_space<vmem>>, %arg9: memref<256x256xbf16, #tpu.memory_space<vmem>>) attributes {dimension_semantics = [#tpu.dimension_semantics<parallel>], iteration_bounds = array<i64: 2>, scalar_prefetch = 0 : i64, scratch_operands = 0 : i64, tpu.core_type = #tpu.core_type<tc>, window_params = [{transform_indices = @transform_0, window_bounds = array<i64: 256, 128>}, {pipeline_mode = #tpu.pipeline_mode<synchronous>, transform_indices = @transform_1, window_bounds = array<i64: 128, 768>}, {transform_indices = @transform_2, window_bounds = array<i64: 256, 128>}, {transform_indices = @transform_3, window_bounds = array<i64: 256, 128>}, {transform_indices = @transform_4, window_bounds = array<i64: 2>}, {transform_indices = @transform_5, window_bounds = array<i64: 256, 256>}, {transform_indices = @transform_6, window_bounds = array<i64: 256, 256>}, {transform_indices = @transform_7, window_bounds = array<i64: 256, 256>}, {transform_indices = @transform_8, window_bounds = array<i64: 256, 256>}]} {
    %c0 = arith.constant 0 : index
    %c0_0 = arith.constant 0 : index
    %0 = vector.load %arg1[%c0, %c0_0] : memref<256x128xbf16, #tpu.memory_space<vmem>>, vector<256x128xbf16>
    %c0_1 = arith.constant 0 : index
    %c0_2 = arith.constant 0 : index
    %1 = vector.load %arg2[%c0_1, %c0_2] : memref<128x768xbf16, #tpu.memory_space<vmem>>, vector<128x768xbf16>
    %cst = arith.constant dense<0.000000e+00> : vector<256x768xf32>
    %2 = tpu.matmul %0, %1, %cst {dimension_numbers = #tpu.dot_dimension_numbers<[1], [0], [0], [1], [0, 0, 1, 1], [], []>} : vector<256x128xbf16>, vector<128x768xbf16>, vector<256x768xf32> -> vector<256x768xf32>
    %c0_3 = arith.constant 0 : index
    %c0_4 = arith.constant 0 : index
    %3 = vector.load %arg3[%c0_3, %c0_4] : memref<256x128xf32, #tpu.memory_space<vmem>>, vector<256x128xf32>
    %c0_5 = arith.constant 0 : index
    %c0_6 = arith.constant 0 : index
    %4 = vector.load %arg4[%c0_5, %c0_6] : memref<256x128xf32, #tpu.memory_space<vmem>>, vector<256x128xf32>
    %c0_7 = arith.constant 0 : index
    %5 = memref.load %arg5[%c0_7] : memref<2xf32, #tpu.memory_space<smem>>
    %c1 = arith.constant 1 : index
    %6 = memref.load %arg5[%c1] : memref<2xf32, #tpu.memory_space<smem>>
    %7 = vector.extract_strided_slice %2 {offsets = [0, 0], sizes = [256, 128], strides = [1, 1]} : vector<256x768xf32> to vector<256x128xf32>
    %8 = arith.mulf %7, %7 : vector<256x128xf32>
    %cst_8 = arith.constant dense<0.000000e+00> : vector<256xf32>
    %9 = vector.multi_reduction <add>, %8, %cst_8 [1] : vector<256x128xf32> to vector<256xf32>
    %10 = vector.shape_cast %9 : vector<256xf32> to vector<256x1xf32>
    %cst_9 = arith.constant 1.280000e+02 : f32
    %11 = vector.broadcast %cst_9 : f32 to vector<256x1xf32>
    %12 = arith.divf %10, %11 : vector<256x1xf32>
    %cst_10 = arith.constant 1.1920929E-7 : f32
    %13 = vector.broadcast %cst_10 : f32 to vector<256x1xf32>
    %14 = arith.addf %12, %13 : vector<256x1xf32>
    %15 = math.rsqrt %14 : vector<256x1xf32>
    %16 = vector.broadcast %15 : vector<256x1xf32> to vector<256x128xf32>
    %17 = arith.mulf %7, %16 : vector<256x128xf32>
    %18 = vector.extract_strided_slice %2 {offsets = [0, 256], sizes = [256, 128], strides = [1, 1]} : vector<256x768xf32> to vector<256x128xf32>
    %19 = arith.mulf %18, %18 : vector<256x128xf32>
    %cst_11 = arith.constant dense<0.000000e+00> : vector<256xf32>
    %20 = vector.multi_reduction <add>, %19, %cst_11 [1] : vector<256x128xf32> to vector<256xf32>
    %21 = vector.shape_cast %20 : vector<256xf32> to vector<256x1xf32>
    %cst_12 = arith.constant 1.280000e+02 : f32
    %22 = vector.broadcast %cst_12 : f32 to vector<256x1xf32>
    %23 = arith.divf %21, %22 : vector<256x1xf32>
    %cst_13 = arith.constant 1.1920929E-7 : f32
    %24 = vector.broadcast %cst_13 : f32 to vector<256x1xf32>
    %25 = arith.addf %23, %24 : vector<256x1xf32>
    %26 = math.rsqrt %25 : vector<256x1xf32>
    %27 = vector.broadcast %26 : vector<256x1xf32> to vector<256x128xf32>
    %28 = arith.mulf %18, %27 : vector<256x128xf32>
    %29 = vector.extract_strided_slice %2 {offsets = [0, 512], sizes = [256, 128], strides = [1, 1]} : vector<256x768xf32> to vector<256x128xf32>
    %30 = arith.mulf %17, %3 : vector<256x128xf32>
    %c64_i32 = arith.constant 64 : i32
    %31 = tpu.dynamic_rotate %17 by %c64_i32 dim 1 : vector<256x128xf32>, i32 -> vector<256x128xf32>
    %32 = arith.mulf %31, %4 : vector<256x128xf32>
    %33 = arith.addf %30, %32 : vector<256x128xf32>
    %cst_14 = arith.constant 1.200000e-01 : f32
    %34 = vector.broadcast %cst_14 : f32 to vector<256x128xf32>
    %35 = arith.mulf %33, %34 : vector<256x128xf32>
    %36 = arith.mulf %28, %3 : vector<256x128xf32>
    %c64_i32_15 = arith.constant 64 : i32
    %37 = tpu.dynamic_rotate %28 by %c64_i32_15 dim 1 : vector<256x128xf32>, i32 -> vector<256x128xf32>
    %38 = arith.mulf %37, %4 : vector<256x128xf32>
    %39 = arith.addf %36, %38 : vector<256x128xf32>
    %40 = vector.broadcast %5 : f32 to vector<256x128xf32>
    %41 = arith.mulf %40, %29 : vector<256x128xf32>
    %c0_16 = arith.constant 0 : index
    %c0_17 = arith.constant 0 : index
    %42 = vector.load %arg6[%c0_16, %c0_17] : memref<256x256xbf16, #tpu.memory_space<vmem>>, vector<256x128xbf16>
    %43 = arith.extf %42 : vector<256x128xbf16> to vector<256x128xf32>
    %44 = vector.broadcast %6 : f32 to vector<256x128xf32>
    %45 = arith.mulf %44, %43 : vector<256x128xf32>
    %46 = arith.addf %41, %45 : vector<256x128xf32>
    %47 = arith.truncf %35 : vector<256x128xf32> to vector<256x128xbf16>
    %c0_18 = arith.constant 0 : index
    %c0_19 = arith.constant 0 : index
    %48 = vector.load %arg7[%c0_18, %c0_19] : memref<256x256xbf16, #tpu.memory_space<vmem>>, vector<256x128xbf16>
    tpu.vector_store %arg7[%c0_18, %c0_19], %47 {strides = array<i32>} : memref<256x256xbf16, #tpu.memory_space<vmem>>, vector<256x128xbf16>,
    %49 = arith.truncf %39 : vector<256x128xf32> to vector<256x128xbf16>
    %c0_20 = arith.constant 0 : index
    %c0_21 = arith.constant 0 : index
    %50 = vector.load %arg8[%c0_20, %c0_21] : memref<256x256xbf16, #tpu.memory_space<vmem>>, vector<256x128xbf16>
    tpu.vector_store %arg8[%c0_20, %c0_21], %49 {strides = array<i32>} : memref<256x256xbf16, #tpu.memory_space<vmem>>, vector<256x128xbf16>,
    %51 = arith.truncf %46 : vector<256x128xf32> to vector<256x128xbf16>
    %c0_22 = arith.constant 0 : index
    %c0_23 = arith.constant 0 : index
    %52 = vector.load %arg9[%c0_22, %c0_23] : memref<256x256xbf16, #tpu.memory_space<vmem>>, vector<256x128xbf16>
    tpu.vector_store %arg9[%c0_22, %c0_23], %51 {strides = array<i32>} : memref<256x256xbf16, #tpu.memory_space<vmem>>, vector<256x128xbf16>,
    %53 = vector.extract_strided_slice %2 {offsets = [0, 128], sizes = [256, 128], strides = [1, 1]} : vector<256x768xf32> to vector<256x128xf32>
    %54 = arith.mulf %53, %53 : vector<256x128xf32>
    %cst_24 = arith.constant dense<0.000000e+00> : vector<256xf32>
    %55 = vector.multi_reduction <add>, %54, %cst_24 [1] : vector<256x128xf32> to vector<256xf32>
    %56 = vector.shape_cast %55 : vector<256xf32> to vector<256x1xf32>
    %cst_25 = arith.constant 1.280000e+02 : f32
    %57 = vector.broadcast %cst_25 : f32 to vector<256x1xf32>
    %58 = arith.divf %56, %57 : vector<256x1xf32>
    %cst_26 = arith.constant 1.1920929E-7 : f32
    %59 = vector.broadcast %cst_26 : f32 to vector<256x1xf32>
    %60 = arith.addf %58, %59 : vector<256x1xf32>
    %61 = math.rsqrt %60 : vector<256x1xf32>
    %62 = vector.broadcast %61 : vector<256x1xf32> to vector<256x128xf32>
    %63 = arith.mulf %53, %62 : vector<256x128xf32>
    %64 = vector.extract_strided_slice %2 {offsets = [0, 384], sizes = [256, 128], strides = [1, 1]} : vector<256x768xf32> to vector<256x128xf32>
    %65 = arith.mulf %64, %64 : vector<256x128xf32>
    %cst_27 = arith.constant dense<0.000000e+00> : vector<256xf32>
    %66 = vector.multi_reduction <add>, %65, %cst_27 [1] : vector<256x128xf32> to vector<256xf32>
    %67 = vector.shape_cast %66 : vector<256xf32> to vector<256x1xf32>
    %cst_28 = arith.constant 1.280000e+02 : f32
    %68 = vector.broadcast %cst_28 : f32 to vector<256x1xf32>
    %69 = arith.divf %67, %68 : vector<256x1xf32>
    %cst_29 = arith.constant 1.1920929E-7 : f32
    %70 = vector.broadcast %cst_29 : f32 to vector<256x1xf32>
    %71 = arith.addf %69, %70 : vector<256x1xf32>
    %72 = math.rsqrt %71 : vector<256x1xf32>
    %73 = vector.broadcast %72 : vector<256x1xf32> to vector<256x128xf32>
    %74 = arith.mulf %64, %73 : vector<256x128xf32>
    %75 = vector.extract_strided_slice %2 {offsets = [0, 640], sizes = [256, 128], strides = [1, 1]} : vector<256x768xf32> to vector<256x128xf32>
    %76 = arith.mulf %63, %3 : vector<256x128xf32>
    %c64_i32_30 = arith.constant 64 : i32
    %77 = tpu.dynamic_rotate %63 by %c64_i32_30 dim 1 : vector<256x128xf32>, i32 -> vector<256x128xf32>
    %78 = arith.mulf %77, %4 : vector<256x128xf32>
    %79 = arith.addf %76, %78 : vector<256x128xf32>
    %cst_31 = arith.constant 1.200000e-01 : f32
    %80 = vector.broadcast %cst_31 : f32 to vector<256x128xf32>
    %81 = arith.mulf %79, %80 : vector<256x128xf32>
    %82 = arith.mulf %74, %3 : vector<256x128xf32>
    %c64_i32_32 = arith.constant 64 : i32
    %83 = tpu.dynamic_rotate %74 by %c64_i32_32 dim 1 : vector<256x128xf32>, i32 -> vector<256x128xf32>
    %84 = arith.mulf %83, %4 : vector<256x128xf32>
    %85 = arith.addf %82, %84 : vector<256x128xf32>
    %86 = vector.broadcast %5 : f32 to vector<256x128xf32>
    %87 = arith.mulf %86, %75 : vector<256x128xf32>
    %c0_33 = arith.constant 0 : index
    %c128 = arith.constant 128 : index
    %88 = vector.load %arg6[%c0_33, %c128] : memref<256x256xbf16, #tpu.memory_space<vmem>>, vector<256x128xbf16>
    %89 = arith.extf %88 : vector<256x128xbf16> to vector<256x128xf32>
    %90 = vector.broadcast %6 : f32 to vector<256x128xf32>
    %91 = arith.mulf %90, %89 : vector<256x128xf32>
    %92 = arith.addf %87, %91 : vector<256x128xf32>
    %93 = arith.truncf %81 : vector<256x128xf32> to vector<256x128xbf16>
    %c0_34 = arith.constant 0 : index
    %c128_35 = arith.constant 128 : index
    %94 = vector.load %arg7[%c0_34, %c128_35] : memref<256x256xbf16, #tpu.memory_space<vmem>>, vector<256x128xbf16>
    tpu.vector_store %arg7[%c0_34, %c128_35], %93 {strides = array<i32>} : memref<256x256xbf16, #tpu.memory_space<vmem>>, vector<256x128xbf16>,
    %95 = arith.truncf %85 : vector<256x128xf32> to vector<256x128xbf16>
    %c0_36 = arith.constant 0 : index
    %c128_37 = arith.constant 128 : index
    %96 = vector.load %arg8[%c0_36, %c128_37] : memref<256x256xbf16, #tpu.memory_space<vmem>>, vector<256x128xbf16>
    tpu.vector_store %arg8[%c0_36, %c128_37], %95 {strides = array<i32>} : memref<256x256xbf16, #tpu.memory_space<vmem>>, vector<256x128xbf16>,
    %97 = arith.truncf %92 : vector<256x128xf32> to vector<256x128xbf16>
    %c0_38 = arith.constant 0 : index
    %c128_39 = arith.constant 128 : index
    %98 = vector.load %arg9[%c0_38, %c128_39] : memref<256x256xbf16, #tpu.memory_space<vmem>>, vector<256x128xbf16>
    tpu.vector_store %arg9[%c0_38, %c128_39], %97 {strides = array<i32>} : memref<256x256xbf16, #tpu.memory_space<vmem>>, vector<256x128xbf16>,
    return
  }
  func.func @transform_0(%arg0: i32) -> (i32, i32) {
    %c0_i32 = arith.constant 0 : i32
    %c0_i32_0 = arith.constant 0 : i32
    return %arg0, %c0_i32 : i32, i32
  }
  func.func @transform_1(%arg0: i32) -> (i32, i32) {
    %c0_i32 = arith.constant 0 : i32
    %c0_i32_0 = arith.constant 0 : i32
    %c0_i32_1 = arith.constant 0 : i32
    return %c0_i32, %c0_i32_0 : i32, i32
  }
  func.func @transform_2(%arg0: i32) -> (i32, i32) {
    %c0_i32 = arith.constant 0 : i32
    %c0_i32_0 = arith.constant 0 : i32
    return %arg0, %c0_i32 : i32, i32
  }
  func.func @transform_3(%arg0: i32) -> (i32, i32) {
    %c0_i32 = arith.constant 0 : i32
    %c0_i32_0 = arith.constant 0 : i32
    return %arg0, %c0_i32 : i32, i32
  }
  func.func @transform_4(%arg0: i32) -> i32 {
    %c0_i32 = arith.constant 0 : i32
    %c0_i32_0 = arith.constant 0 : i32
    return %c0_i32 : i32
  }
  func.func @transform_5(%arg0: i32) -> (i32, i32) {
    %c0_i32 = arith.constant 0 : i32
    %c0_i32_0 = arith.constant 0 : i32
    return %arg0, %c0_i32 : i32, i32
  }
  func.func @transform_6(%arg0: i32) -> (i32, i32) {
    %c0_i32 = arith.constant 0 : i32
    %c0_i32_0 = arith.constant 0 : i32
    return %arg0, %c0_i32 : i32, i32
  }
  func.func @transform_7(%arg0: i32) -> (i32, i32) {
    %c0_i32 = arith.constant 0 : i32
    %c0_i32_0 = arith.constant 0 : i32
    return %arg0, %c0_i32 : i32, i32
  }
  func.func @transform_8(%arg0: i32) -> (i32, i32) {
    %c0_i32 = arith.constant 0 : i32
    %c0_i32_0 = arith.constant 0 : i32
    return %arg0, %c0_i32 : i32, i32
  }
}

</mosaic_0001>

<bundles_post_ra>
// kernel: tpu_custom_call.1
= control target key start
LH: loop header
LB: loop body
LE: loop exit
PB: predicated region body
PF: predicated region fallthrough
CT: control target
= control target key end

     0   :  { %s9218_s0 = inlined_call_operand.hbm [shape: bf16[512,128], index: 0, kind: input, shape index: {}]   ;;  %s9219_s1 = inlined_call_operand.hbm [shape: bf16[128,768], index: 1, kind: input, shape index: {}]   ;;  %s9220_s2 = inlined_call_operand.hbm [shape: f32[512,128], index: 2, kind: input, shape index: {}]   ;;  %s9221_s3 = inlined_call_operand.hbm [shape: f32[512,128], index: 3, kind: input, shape index: {}]   ;;  %s9222_s4 = inlined_call_operand.vmem [shape: f32[2], index: 4, kind: input, shape index: {}]   ;;  %s9223_s5 = inlined_call_operand.hbm [shape: bf16[512,256], index: 5, kind: input, shape index: {}]   ;;  %s9224_s6 = inlined_call_operand.hbm [shape: bf16[512,256], index: 6, kind: output, shape index: {0}]   ;;  %s9225_s7 = inlined_call_operand.hbm [shape: bf16[512,256], index: 7, kind: output, shape index: {1}]   ;;  %s9226_s8 = inlined_call_operand.hbm [shape: bf16[512,256], index: 8, kind: output, shape index: {2}]  }
   0x1   :  { %9386 = sst [smem:[#allocation210_spill]] %s9218_s0 }
   0x2   :  { %9387 = sst [smem:[#allocation211_spill]] %s9220_s2 }
   0x3   :  { %9388 = sst [smem:[#allocation212_spill]] %s9221_s3 }
   0x4   :  { %9389 = sst [smem:[#allocation213_spill]] %s9222_s4 }
   0x5   :  { %14 = vsyncpa [#allocation3], 0 }
   0x6   :  { %16 = vsyncpa [#allocation3 + $0x1], 0 }
   0x7   :  { %17 = vsyncpa [#allocation7], 0 }
   0x8   :  { %18 = vsyncpa [#allocation5], 0 }
   0x9   :  { %19 = vsyncpa [#allocation4], 0 }
   0xa   :  { %21 = vsyncpa [#allocation4 + $0x1], 0 }
   0xb   :  { %22 = vsyncpa [#allocation14], 0 }
   0xc   :  { %24 = vsyncpa [#allocation14 + $0x1], 0  ;;  %s6121_s27 = smov 0   ;;  %s6123_s28 = smov 0  }
   0xd   :  { %s6125_s29 = smov 0   ;;  %s6127_s30 = smov 0  }
   0xe LB: > { %9390 = sst [smem:[#allocation23_spill]] %s6051_s29  ;;  %s6142_s9 = sadd.s32 1, %s6055_s30   ;;  %s6055_s30 = sphi %s6127_s30, %s9958_s30   ;;  %s6051_s29 = sphi %s6125_s29, %s9960_s29   ;;  %s6047_s28 = sphi %s6123_s28, %s9962_s28   ;;  %s6043_s27 = sphi %s6121_s27, %s9961_s27  }
   0xf   : > { %9391 = sst [smem:[#allocation24_spill]] %s6142_s9  ;;  %s37_s10 = sadd.s32 1, %s6051_s29 }
  0x10   : > { %s34_s11 = ssub.s32 %s6055_s30, %s6142_s9  ;;  %p9227_p0 = scmp.ne.s32.totalorder %s6051_s29, %s6047_s28 }
  0x11   : > { %p35_p1 = scmp.eq.s32.totalorder %s34_s11, 0  ;;  %p45_p2 = scmp.eq.s32.totalorder %s6055_s30, 0 }
  0x12   : > { %p5282_p4 = scmp.lt.s32.totalorder %s6055_s30, 2  ;;  %s296_s13 = sand.u32 1, %s6055_s30  }
  0x13   : > { %s6153_s12 = scalar_select %p35_p1, %s6051_s29, %s37_s10  }
  0x14   : > { %p46_p5 = por %p45_p2, %p9227_p0  ;;  %s298_s14 = sand.u32 1, %s6051_s29  }
  0x15   : > { %9392 = sst [smem:[#allocation25_spill]] %s6153_s12  ;;  %s4715_s15 = sshll.u32 %s298_s14, 7 }
  0x16   : > { %s5009_s16 = sshll.u32 %s6055_s30, 11  ;;  %s9393_s0 = sld [smem:[#allocation210_spill]] }
  0x17   : > { %s300_s20 = scalar_lea.vmem [#allocation2], %s4715_s15  ;;  %p6168_p6 = pnand %p5282_p4, %p46_p5 }
  0x18   : > { %s307_s21 = sshll.u32 %s300_s20, 4  ;;  %s6174_s23 = scalar_lea.sflag [#allocation3], %s296_s13  ;;  %s6172_s21 = int_to_ptr.vmem [resolvable:$true] %s307_s21 }
  0x19   : > { %p6180_p8 = pneg %p6168_p6 }
  0x1c   : > { %s6166_s19 = scalar_lea.hbm %s9393_s0, %s5009_s16  ;;  %s5755_s11 = scalar_lea.hbm %s9393_s0, 4096 }
  0x1d   : > { %s5750_s24 = scalar_lea.hbm %s6166_s19, 2048  ;;  %p5756_p11 = scmp.lt.u32.totalorder %s6166_s19, %s9393_s0 }
  0x1e   : > { %p5751_p7 = scmp.ne.s32.totalorder %s6166_s19, %s5750_s24  ;;  %p5757_p12 = scmp.lt.u32.totalorder %s5755_s11, %s5750_s24 }
  0x1f   : > { %p5759_p1 = scmp.lt.u32.totalorder %s5750_s24, %s6166_s19 }
  0x20   : > { %p5753_p9 = pnand %p6180_p8, %p5751_p7  ;;  %p5758_p13 = por %p5757_p12, %p5756_p11 }
  0x22   : > { %p5754_p10 = pneg %p5753_p9  ;;  %p5760_p2 = por %p5759_p1, %p5758_p13 }
  0x24   : > { %p5761_p4 = pnand %p5760_p2, %p5754_p10 }
  0x26   : > { %5764 = shalt.err (!%p5761_p4)
}
  0x27   : > { %s5765_s13 = scalar_lea.vmem %s6172_s21, 2048  ;;  %s6057_s17 = smov [#allocation2]  }
  0x28   : > { %p5766_p5 = scmp.ne.s32.totalorder %s6172_s21, %s5765_s13  ;;  %s5770_s18 = sshll.u32 %s6057_s17, 4  ;;  %s5771_s18 = int_to_ptr.vmem [resolvable:$false] %s5770_s18 }
  0x29   : > { %s5772_s20 = scalar_lea.vmem %s5771_s18, 4096  ;;  %p5773_p3 = scmp.lt.s32.totalorder %s6172_s21, %s5771_s18 }
  0x2a   : > { %p5768_p7 = pnand %p5766_p5, %p6180_p8  ;;  %p5774_p0 = scmp.lt.s32.totalorder %s5772_s20, %s5765_s13 }
  0x2c   : > { %p5769_p9 = pneg %p5768_p7  ;;  %p5775_p11 = por %p5774_p0, %p5773_p3 }
  0x2e   : > { %p5776_p12 = pnand %p5775_p11, %p5769_p9 }
  0x30   : > { %5779 = shalt.err (!%p5776_p12)
}
  0x31   : > { %s6058_s24 = smov 64   ;;  %s6059_s26 = smov 4  }
  0x32   : > { %5260 = dma.hbm_to_vmem [thread:$0]  (!%p6168_p6), %s6166_s19, 2048, %s6172_s21, %s6174_s23, %s6058_s24, %s6058_s24, %s6059_s26  }
  0x33   : > { %s6206_s10 = sshll.u32 %s298_s14, 8  ;;  %s6209_s11 = sshll.u32 %s6055_s30, 12 }
  0x34   : > { %s9396_s2 = sld [smem:[#allocation211_spill]]  ;;  %s321_s17 = scalar_lea.vmem [#allocation8], %s6206_s10 }
  0x35   : > { %s328_s18 = sshll.u32 %s321_s17, 4  ;;  %s6218_s18 = int_to_ptr.vmem [resolvable:$true] %s328_s18 }
  0x3a   : > { %s6215_s13 = scalar_lea.hbm %s9396_s2, %s6209_s11  ;;  %s5785_s20 = scalar_lea.hbm %s9396_s2, 8192 }
  0x3b   : > { %s5780_s19 = scalar_lea.hbm %s6215_s13, 4096  ;;  %p5786_p13 = scmp.lt.u32.totalorder %s6215_s13, %s9396_s2 }
  0x3c   : > { %p5781_p0 = scmp.ne.s32.totalorder %s6215_s13, %s5780_s19  ;;  %p5787_p1 = scmp.lt.u32.totalorder %s5785_s20, %s5780_s19 }
  0x3d   : > { %p5789_p4 = scmp.lt.u32.totalorder %s5780_s19, %s6215_s13 }
  0x3e   : > { %p5783_p3 = pnand %p5781_p0, %p6180_p8  ;;  %p5788_p2 = por %p5787_p1, %p5786_p13 }
  0x40   : > { %p5784_p10 = pneg %p5783_p3  ;;  %p5790_p5 = por %p5789_p4, %p5788_p2 }
  0x42   : > { %p5791_p7 = pnand %p5790_p5, %p5784_p10 }
  0x44   : > { %5794 = shalt.err (!%p5791_p7)
}
  0x45   : > { %s5795_s15 = scalar_lea.vmem %s6218_s18, 4096  ;;  %s6060_s16 = smov [#allocation8]  }
  0x46   : > { %p5796_p9 = scmp.ne.s32.totalorder %s6218_s18, %s5795_s15  ;;  %s5800_s17 = sshll.u32 %s6060_s16, 4  ;;  %s5801_s17 = int_to_ptr.vmem [resolvable:$false] %s5800_s17 }
  0x47   : > { %s5802_s14 = scalar_lea.vmem %s5801_s17, 8192  ;;  %p5803_p0 = scmp.lt.s32.totalorder %s6218_s18, %s5801_s17 }
  0x48   : > { %p5798_p11 = pnand %p5796_p9, %p6180_p8  ;;  %p5804_p3 = scmp.lt.s32.totalorder %s5802_s14, %s5795_s15 }
  0x4a   : > { %p5799_p12 = pneg %p5798_p11  ;;  %p5805_p13 = por %p5804_p3, %p5803_p0 }
  0x4c   : > { %p5806_p1 = pnand %p5805_p13, %p5799_p12 }
  0x4e   : > { %5809 = shalt.err (!%p5806_p1)
}
  0x4f   : > { %s9229_s19 = smov 128   ;;  %s9230_s21 = smov 8  }
  0x50   : > { %5263 = dma.hbm_to_vmem [thread:$0]  (!%p6168_p6), %s6215_s13, 4096, %s6218_s18, %s6174_s23, %s9229_s19, %s9229_s19, %s9230_s21  }
  0x51   : > { %s9397_s3 = sld [smem:[#allocation212_spill]]  ;;  %s342_s15 = scalar_lea.vmem [#allocation9], %s6206_s10 }
  0x52   : > { %s349_s16 = sshll.u32 %s342_s15, 4  ;;  %s6252_s16 = int_to_ptr.vmem [resolvable:$true] %s349_s16 }
  0x57   : > { %s6249_s26 = scalar_lea.hbm %s9397_s3, %s6209_s11  ;;  %s5815_s18 = scalar_lea.hbm %s9397_s3, 8192 }
  0x58   : > { %s5810_s17 = scalar_lea.hbm %s6249_s26, 4096  ;;  %p5816_p5 = scmp.lt.u32.totalorder %s6249_s26, %s9397_s3 }
  0x59   : > { %p5811_p10 = scmp.ne.s32.totalorder %s6249_s26, %s5810_s17  ;;  %p5817_p7 = scmp.lt.u32.totalorder %s5815_s18, %s5810_s17 }
  0x5a   : > { %p5819_p11 = scmp.lt.u32.totalorder %s5810_s17, %s6249_s26 }
  0x5b   : > { %p5813_p2 = pnand %p5811_p10, %p6180_p8  ;;  %p5818_p9 = por %p5817_p7, %p5816_p5 }
  0x5d   : > { %p5814_p4 = pneg %p5813_p2  ;;  %p5820_p12 = por %p5819_p11, %p5818_p9 }
  0x5f   : > { %p5821_p0 = pnand %p5820_p12, %p5814_p4 }
  0x61   : > { %5824 = shalt.err (!%p5821_p0)
}
  0x62   : > { %s5825_s15 = scalar_lea.vmem %s6252_s16, 4096  ;;  %s6063_s14 = smov [#allocation9]  }
  0x63   : > { %p5826_p3 = scmp.ne.s32.totalorder %s6252_s16, %s5825_s15  ;;  %s5830_s13 = sshll.u32 %s6063_s14, 4  ;;  %s5831_s13 = int_to_ptr.vmem [resolvable:$false] %s5830_s13 }
  0x64   : > { %s5832_s20 = scalar_lea.vmem %s5831_s13, 8192  ;;  %p5833_p10 = scmp.lt.s32.totalorder %s6252_s16, %s5831_s13 }
  0x65   : > { %p5828_p13 = pnand %p5826_p3, %p6180_p8  ;;  %p5834_p2 = scmp.lt.s32.totalorder %s5832_s20, %s5825_s15 }
  0x67   : > { %p5829_p1 = pneg %p5828_p13  ;;  %p5835_p5 = por %p5834_p2, %p5833_p10 }
  0x69   : > { %p5836_p7 = pnand %p5835_p5, %p5829_p1 }
  0x6b   : > { %5839 = shalt.err (!%p5836_p7)
}
  0x6c   : > { %5266 = dma.hbm_to_vmem [thread:$0]  (!%p6168_p6), %s6249_s26, 4096, %s6252_s16, %s6174_s23, %s9229_s19, %s9229_s19, %s9230_s21  }
  0x6d   : > { %s6280_s17 = sadd.s32 4294967295, %s6055_s30   ;;  %s9228_s18 = sadd.s32 4294967294, %s6055_s30  }
  0x6e   : > { %p50_p4 = scmp.ne.s32.totalorder %s6047_s28, %s6043_s27  ;;  %p9234_p9 = scmp.eq.s32.totalorder %s6280_s17, 0 }
  0x6f   : > { %p194_p11 = scmp.eq.s32.totalorder %s6280_s17, 1  ;;  %p200_p12 = scmp.eq.s32.totalorder %s9228_s18, 1 }
  0x70   : > { %p6291_p0 = por %p9234_p9, %p50_p4  ;;  %p4711_p3 = scmp.ge.s32.totalorder %s6055_s30, 1 }
  0x71   : > { %p9399_p13 = scmp.ne.s32.totalorder %s6051_s29, %s6047_s28  ;;  %p6303_p10 = por %p200_p12, %p50_p4 }
  0x72   : > { %s9398_s24 = scalar_select %p6291_p0, 1, 0 }
  0x73   : > { %p6299_p1 = por %p194_p11, %p9399_p13  ;;  %p259_p2 = scmp.lt.s32.totalorder %s6055_s30, 3 }
  0x74   : > { %s9401_s16 = scalar_select %p6303_p10, 1, 0 }
  0x75   : > { %s9400_s26 = scalar_select %p6299_p1, 1, 0 }
  0x76   : > { %p6308_p5 = pnand %p4711_p3, %p259_p2  ;;  %s6064_s14 = smov [#allocation6]  }
  0x77   : > { %s271_s13 = sshll.u32 %s6064_s14, 4  ;;  %s9403_s4 = sld [smem:[#allocation213_spill]]  ;;  %s6312_s13 = int_to_ptr.vmem [resolvable:$true] %s271_s13 }
  0x78   : > { %s9402_s15 = scalar_select %p6308_p5, 1, 0 }
  0x79   : > { %p5250_p7 = pneg %p6308_p5  ;;  %s6331_s14 = scalar_lea.hbm %s9223_s5, %s6209_s11 }
  0x7a   : > { %s363_s3 = scalar_lea.vmem [#allocation11], %s6206_s10 }
  0x7b   : > { %p6323_p4 = pnand %p5250_p7, %p9234_p9  ;;  %s371_s12 = sshll.u32 %s363_s3, 4  ;;  %s6334_s12 = int_to_ptr.vmem [resolvable:$true] %s371_s12 }
  0x7d   : > { %s285_s19 = sshll.u32 %s9403_s4, 4  ;;  %s5840_s4 = scalar_lea.hbm %s9219_s1, 6144  ;;  %s6319_s19 = int_to_ptr.vmem [resolvable:$true] %s285_s19 }
  0x7e   : > { %p5841_p11 = scmp.ne.s32.totalorder %s9219_s1, %s5840_s4  ;;  %p5842_p12 = pneg %p6323_p4 }
  0x7f   : > { %p5847_p2 = scmp.lt.u32.totalorder %s5840_s4, %s9219_s1 }
  0x80   : > { %p5843_p3 = pnand %p5842_p12, %p5841_p11 }
  0x82   : > { %p5844_p13 = pneg %p5843_p3 }
  0x84   : > { %p5849_p7 = pnand %p5847_p2, %p5844_p13 }
  0x86   : > { %5852 = shalt.err (!%p5849_p7)
}
  0x87   : > { %s5853_s3 = scalar_lea.vmem %s6312_s13, 6144  ;;  %p5861_p0 = scmp.lt.s32.totalorder %s6312_s13, %s6312_s13 }
  0x88   : > { %p5854_p9 = scmp.ne.s32.totalorder %s6312_s13, %s5853_s3  ;;  %p5862_p11 = scmp.lt.s32.totalorder %s5853_s3, %s5853_s3 }
  0x8a   : > { %p5856_p10 = pnand %p5854_p9, %p5842_p12  ;;  %p5863_p3 = por %p5862_p11, %p5861_p0 }
  0x8c   : > { %p5857_p1 = pneg %p5856_p10 }
  0x8e   : > { %p5864_p5 = pnand %p5863_p3, %p5857_p1 }
  0x90   : > { %5867 = shalt.err (!%p5864_p5)
}
  0x91   : > { %s6065_s29 = smov 384   ;;  %s6066_s4 = smov 24  }
  0x92   : > { %5253 = dma.hbm_to_vmem [thread:$0]  (!%p6323_p4), %s9219_s1, 6144, %s6312_s13, [#allocation7], %s6065_s29, %s6065_s29, %s6066_s4  }
  0x93   : > { %s5868_s11 = scalar_lea.vmem %s6319_s19, 16  ;;  %p5876_p10 = scmp.lt.s32.totalorder %s6319_s19, %s6319_s19 }
  0x94   : > { %p5869_p9 = scmp.ne.s32.totalorder %s6319_s19, %s5868_s11  ;;  %p5877_p5 = scmp.lt.s32.totalorder %s5868_s11, %s5868_s11 }
  0x96   : > { %p5871_p0 = pnand %p5869_p9, %p5842_p12  ;;  %p5878_p13 = por %p5877_p5, %p5876_p10 }
  0x98   : > { %p5872_p1 = pneg %p5871_p0 }
  0x9a   : > { %p5879_p2 = pnand %p5878_p13, %p5872_p1 }
  0x9c   : > { %5882 = shalt.err (!%p5879_p2)
}
  0x9d   : > { %s6067_s18 = smov [#allocation10]   ;;  %s5883_s13 = scalar_lea.hbm %s6331_s14, 4096 }
  0x9e   : > { %5256 = dma.vmem_to_smem (!%p6323_p4), %s6319_s19, 16, %s6067_s18, [#allocation5]  }
  0x9f   : > { %p5884_p7 = scmp.ne.s32.totalorder %s6331_s14, %s5883_s13  ;;  %s5888_s2 = scalar_lea.hbm %s9223_s5, 8192 }
  0xa0   : > { %p5889_p3 = scmp.lt.u32.totalorder %s6331_s14, %s9223_s5  ;;  %p5890_p9 = scmp.lt.u32.totalorder %s5888_s2, %s5883_s13 }
  0xa1   : > { %p5886_p12 = pnand %p5884_p7, %p6180_p8  ;;  %p5892_p1 = scmp.lt.u32.totalorder %s5883_s13, %s6331_s14 }
  0xa2   : > { %p5891_p0 = por %p5890_p9, %p5889_p3 }
  0xa3   : > { %p5887_p11 = pneg %p5886_p12 }
  0xa4   : > { %p5893_p10 = por %p5892_p1, %p5891_p0 }
  0xa6   : > { %p5894_p5 = pnand %p5893_p10, %p5887_p11 }
  0xa8   : > { %5897 = shalt.err (!%p5894_p5)
}
  0xa9   : > { %s5898_s19 = scalar_lea.vmem %s6334_s12, 4096  ;;  %s6068_s21 = smov [#allocation11]  }
  0xaa   : > { %p5899_p4 = scmp.ne.s32.totalorder %s6334_s12, %s5898_s19  ;;  %s5903_s4 = sshll.u32 %s6068_s21, 4  ;;  %s5904_s4 = int_to_ptr.vmem [resolvable:$false] %s5903_s4 }
  0xab   : > { %s5905_s9 = scalar_lea.vmem %s5904_s4, 8192  ;;  %p5906_p7 = scmp.lt.s32.totalorder %s6334_s12, %s5904_s4 }
  0xac   : > { %p5901_p13 = pnand %p5899_p4, %p6180_p8  ;;  %p5907_p12 = scmp.lt.s32.totalorder %s5905_s9, %s5898_s19 }
  0xae   : > { %p5902_p2 = pneg %p5901_p13  ;;  %p5908_p3 = por %p5907_p12, %p5906_p7 }
  0xb0   : > { %p5909_p9 = pnand %p5908_p3, %p5902_p2 }
  0xb2   : > { %5912 = shalt.err (!%p5909_p9)
}
  0xb3   : > { %s9405_s10 = smov 8   ;;  %s9406_s11 = smov 128  }
  0xb4   : > { %5269 = dma.hbm_to_vmem [thread:$0]  (!%p6168_p6), %s6331_s14, 4096, %s6334_s12, %s6174_s23, %s9406_s11, %s9406_s11, %s9405_s10  }
  0xb5   : > { %p9407_p8 = scmp.ne.s32.totalorder %s9402_s15, 0 }
  0xb7   : > { %383 = sbr.rel (%p9407_p8) target bundleno = 1527 (0x5f7), region = 44 }
  0xbe   : > { %s385_s25 = sand.u32 1, %s6280_s17   ;;  %s6402_s18 = sand.u32 1, %s6047_s28  }
  0xbf   : > { %s4729_s13 = sshll.u32 %s6402_s18, 7  ;;  %s386_s22 = scalar_lea.sflag [#allocation3], %s385_s25 }
  0xc0   : > { %s6407_s20 = scalar_lea.vmem [#allocation2], %s4729_s13  ;;  %p9408_p11 = scmp.ne.s32.totalorder %s9398_s24, 0 }
  0xc2   : > { %6014 = dma.done.wait (%p9408_p11), %s386_s22, 2048  }
  0xc3   : > { %6016 = vsyncadd (%p9408_p11), %s386_s22, 4294965248  ;;  %p9409_p6 = scmp.eq.s32.totalorder %s6280_s17, 0 }
  0xc5   : > { %6018 = dma.done.wait (%p9409_p6), [#allocation7], 6144   ;;  %p9410_p0 = pmov %p9409_p6 }
  0xc6   : > { %s6418_s12 = sshll.u32 %s6402_s18, 8 }
  0xc7   : > { %6020 = vsyncadd (%p9410_p0), [#allocation7], 4294961152  ;;  %s6421_s23 = scalar_lea.vmem [#allocation8], %s6418_s12 }
  0xc8   : > { %6022 = dma.done.wait (%p9408_p11), %s386_s22, 8192  }
  0xc9   : > { %6024 = vsyncadd (%p9408_p11), %s386_s22, 4294959104  ;;  %s6428_s15 = scalar_lea.vmem [#allocation9], %s6418_s12  ;;  %p9411_p1 = pmov %p9410_p0 }
  0xca   : > { %p9412_p10 = pmov %p9410_p0 }
  0xcb   : > { %6026 = dma.done.wait (%p9411_p1), [#allocation5], 16  }
  0xcc   : > { %6028 = vsyncadd (%p9412_p10), [#allocation5], 4294967280  ;;  %s6435_s14 = scalar_lea.vmem [#allocation11], %s6418_s12 }
  0xcd   : > { %6030 = dma.done.wait (%p9408_p11), %s386_s22, 4096  }
  0xce   : > { %6032 = vsyncadd (%p9408_p11), %s386_s22, 4294963200 }
  0xcf   : > { %429 = sfence }
  0xd0   : > { %v5330_v0 = vld [vmem:[#allocation6 + $0x4] ss:$24 sps:$4 sm:$0xff]   ;;  %v5332_v1 = vld [vmem:[#allocation6] ss:$24 sps:$4 sm:$0xff]   ;;  %v9238_v2 = vmov 0   ;;  %v6454_v22 = vld [vmem:[%s6407_s20 + $0x8] sm:$0xff]  }
  0xd1   : > { %939 = vmatprep.mubr.bf16.mxu0 %v9238_v2  ;;  %1019 = vmatprep.mubr.bf16.mxu1 %v9238_v2  ;;  %v5333_v3 = vld [vmem:[#allocation6 + $0x34] ss:$24 sps:$4 sm:$0xff]   ;;  %v5335_v4 = vld [vmem:[#allocation6 + $0x30] ss:$24 sps:$4 sm:$0xff]   ;;  %v5336_v5 = vld [vmem:[#allocation6 + $0x64] ss:$24 sps:$4 sm:$0xff]  }
  0xd2   : > { %907 = vmatprep.subr.bf16.mxu0 %v5330_v0  ;;  %5212 = vmatprep.subr.bf16.mxu1 %v5330_v0  ;;  %v5338_v6 = vld [vmem:[#allocation6 + $0x60] ss:$24 sps:$4 sm:$0xff]   ;;  %v5339_v7 = vld [vmem:[#allocation6 + $0x94] ss:$24 sps:$4 sm:$0xff]   ;;  %v5341_v8 = vld [vmem:[#allocation6 + $0x90] ss:$24 sps:$4 sm:$0xff]  }
  0xd3   : > { %908 = vmatpush1.bf16.msra.mxu0 %v5332_v1  ;;  %5220 = vmatpush1.bf16.msra.mxu1 %v5332_v1  ;;  %v5342_v9 = vld [vmem:[#allocation6 + $0xc4] ss:$24 sps:$4 sm:$0xff]   ;;  %v5344_v10 = vld [vmem:[#allocation6 + $0xc0] ss:$24 sps:$4 sm:$0xff]   ;;  %v5345_v11 = vld [vmem:[#allocation6 + $0xf4] ss:$24 sps:$4 sm:$0xff]  }
  0xd4   : > { %909 = vmatprep.subr.bf16.mxu0 %v5333_v3  ;;  %5213 = vmatprep.subr.bf16.mxu1 %v5333_v3  ;;  %v5347_v12 = vld [vmem:[#allocation6 + $0xf0] ss:$24 sps:$4 sm:$0xff]   ;;  %v5348_v13 = vld [vmem:[#allocation6 + $0x124] ss:$24 sps:$4 sm:$0xff]   ;;  %v5350_v14 = vld [vmem:[#allocation6 + $0x120] ss:$24 sps:$4 sm:$0xff]  }
  0xd5   : > { %v5351_v15 = vld [vmem:[#allocation6 + $0x154] ss:$24 sps:$4 sm:$0xff]   ;;  %v5353_v16 = vld [vmem:[#allocation6 + $0x150] ss:$24 sps:$4 sm:$0xff]   ;;  %v6444_v18 = vld [vmem:[%s6407_s20] sm:$0xff]   ;;  %s6070_s24 = smov 64  }
  0xd6   : > { %v5365_v17 = vld [vmem:[#allocation6 + $0xc] ss:$24 sps:$4 sm:$0xff]   ;;  %v5363_v20 = vld [vmem:[#allocation6 + $0x8] ss:$24 sps:$4 sm:$0xff]   ;;  %v5369_v21 = vld [vmem:[#allocation6 + $0x3c] ss:$24 sps:$4 sm:$0xff]  }
  0xd7   : > { %910 = vmatpush1.bf16.msra.mxu0 %v5335_v4  ;;  %5221 = vmatpush1.bf16.msra.mxu1 %v5335_v4  ;;  %v6447_v19 = vld [vmem:[%s6407_s20 + $0x40] sm:$0xff]   ;;  %v6457_v23 = vld [vmem:[%s6407_s20 + $0x48] sm:$0xff]   ;;  %v5367_v24 = vld [vmem:[#allocation6 + $0x38] ss:$24 sps:$4 sm:$0xff]   ;;  %s7263_s0 = scalar_lea.vmem [#allocation12], %s6418_s12  ;;  %s8151_s2 = sld [smem:[#allocation10]] }
  0xd8   : > { %911 = vmatprep.subr.bf16.mxu0 %v5336_v5  ;;  %5214 = vmatprep.subr.bf16.mxu1 %v5336_v5  ;;  %v5373_v25 = vld [vmem:[#allocation6 + $0x6c] ss:$24 sps:$4 sm:$0xff]   ;;  %v5371_v26 = vld [vmem:[#allocation6 + $0x68] ss:$24 sps:$4 sm:$0xff]   ;;  %v5377_v27 = vld [vmem:[#allocation6 + $0x9c] ss:$24 sps:$4 sm:$0xff]  }
  0xd9   : > { %v5375_v28 = vld [vmem:[#allocation6 + $0x98] ss:$24 sps:$4 sm:$0xff]   ;;  %v5381_v29 = vld [vmem:[#allocation6 + $0xcc] ss:$24 sps:$4 sm:$0xff]   ;;  %v5379_v32 = vld [vmem:[#allocation6 + $0xc8] ss:$24 sps:$4 sm:$0xff]  }
  0xda   : > { %v5358_v30 = vld [vmem:[%s6407_s20 + $0x10] sm:$0xff]   ;;  %v5389_v35 = vld [vmem:[#allocation6 + $0x12c] ss:$24 sps:$4 sm:$0xff]   ;;  %v5360_v36 = vld [vmem:[%s6407_s20 + $0x18] sm:$0xff]   ;;  %s8162_s3 = sld [smem:[#allocation10 + $0x1]]  ;;  %s8247_s29 = scalar_lea.vmem [#allocation15], %s6418_s12 }
  0xdb   : > { %912 = vmatpush1.bf16.msra.mxu0 %v5338_v6  ;;  %5222 = vmatpush1.bf16.msra.mxu1 %v5338_v6  ;;  %v6465_v31 = vld [vmem:[%s6407_s20 + $0x50] sm:$0xff]   ;;  %v5361_v37 = vld [vmem:[%s6407_s20 + $0x58] sm:$0xff]   ;;  %v5387_v38 = vld [vmem:[#allocation6 + $0x128] ss:$24 sps:$4 sm:$0xff]   ;;  %s8848_s19 = scalar_lea.vmem [#allocation13], %s6418_s12  ;;  %s8880_s21 = sshll.u32 %s6280_s17, 12 }
  0xdc   : > { %913 = vmatprep.subr.bf16.mxu0 %v5339_v7  ;;  %5215 = vmatprep.subr.bf16.mxu1 %v5339_v7  ;;  %v5385_v33 = vld [vmem:[#allocation6 + $0xfc] ss:$24 sps:$4 sm:$0xff]   ;;  %v5383_v34 = vld [vmem:[#allocation6 + $0xf8] ss:$24 sps:$4 sm:$0xff]   ;;  %v5362_v41 = vld [vmem:[%s6407_s20 + $0x20] sm:$0xff]   ;;  %s8901_s10 = scalar_lea.hbm %s9224_s6, %s8880_s21  ;;  %s4460_s11 = sshll.u32 %s7263_s0, 4  ;;  %s8909_s11 = int_to_ptr.vmem [resolvable:$true] %s4460_s11 }
  0xdd   : > { %v5393_v39 = vld [vmem:[#allocation6 + $0x15c] ss:$24 sps:$4 sm:$0xff]   ;;  %v5391_v40 = vld [vmem:[#allocation6 + $0x158] ss:$24 sps:$4 sm:$0xff]   ;;  %v5366_v42 = vld [vmem:[%s6407_s20 + $0x60] sm:$0xff]   ;;  %s4436_s13 = scalar_lea.sflag [#allocation4], %s6402_s18 }
  0xde   : > { %v5370_v43 = vld [vmem:[%s6407_s20 + $0x28] sm:$0xff]   ;;  %v5378_v45 = vld [vmem:[%s6407_s20 + $0x30] sm:$0xff]   ;;  %v5386_v47 = vld [vmem:[%s6407_s20 + $0x38] sm:$0xff]   ;;  %s5913_s22 = scalar_lea.vmem %s8909_s11, 4096  ;;  %p9921_p4 = scmp.ne.s32.totalorder %s9400_s26, 0 }
  0xdf   : > { %914 = vmatpush1.bf16.msra.mxu0 %v5341_v8  ;;  %5223 = vmatpush1.bf16.msra.mxu1 %v5341_v8  ;;  %v5374_v44 = vld [vmem:[%s6407_s20 + $0x68] sm:$0xff]   ;;  %v5382_v46 = vld [vmem:[%s6407_s20 + $0x70] sm:$0xff]   ;;  %v5390_v48 = vld [vmem:[%s6407_s20 + $0x78] sm:$0xff]   ;;  %p5914_p5 = scmp.ne.s32.totalorder %s8909_s11, %s5913_s22 }
  0xe0   : > { %915 = vmatprep.subr.bf16.mxu0 %v5342_v9  ;;  %5216 = vmatprep.subr.bf16.mxu1 %v5342_v9 }
  0xe1   : > { %p5915_p13 = pnand %p5914_p5, %p9921_p4 }
  0xe3   : > { %916 = vmatpush1.bf16.msra.mxu0 %v5344_v10  ;;  %5224 = vmatpush1.bf16.msra.mxu1 %v5344_v10  ;;  %p5916_p2 = pneg %p5915_p13 }
  0xe4   : > { %917 = vmatprep.subr.bf16.mxu0 %v5345_v11  ;;  %5217 = vmatprep.subr.bf16.mxu1 %v5345_v11 }
  0xe7   : > { %918 = vmatpush1.bf16.msra.mxu0 %v5347_v12  ;;  %5225 = vmatpush1.bf16.msra.mxu1 %v5347_v12 }
  0xe8   : > { %919 = vmatprep.subr.bf16.mxu0 %v5348_v13  ;;  %5218 = vmatprep.subr.bf16.mxu1 %v5348_v13 }
  0xeb   : > { %920 = vmatpush1.bf16.msra.mxu0 %v5350_v14  ;;  %5226 = vmatpush1.bf16.msra.mxu1 %v5350_v14 }
  0xec   : > { %921 = vmatprep.subr.bf16.mxu0 %v5351_v15  ;;  %5219 = vmatprep.subr.bf16.mxu1 %v5351_v15 }
  0xef   : > { %922 = vmatpush1.bf16.msra.mxu0 %v5353_v16  ;;  %5227 = vmatpush1.bf16.msra.mxu1 %v5353_v16 }
  0xf0   : > { %1100 = vmatprep.subr.bf16.mxu1 %v5365_v17 }
  0xf2   : > { %940 = vmatmul.mubr.bf16.vlgmr.msra.gmra.mrb[0].mxu0 %v6444_v18  ;;  %1020 = vmatmul.mubr.bf16.vlgmr.msra.gmra.mrb[0].mxu1 %v6447_v19 }
  0xf3   : > { %949 = vmatprep.mubr.bf16.mxu0 %v9238_v2  ;;  %1029 = vmatprep.mubr.bf16.mxu1 %v9238_v2 }
  0xf4   : > { %1101 = vmatpush1.bf16.msra.mxu1 %v5363_v20 }
  0xf5   : > { %1102 = vmatprep.subr.bf16.mxu1 %v5369_v21 }
  0xf8   : > { %1103 = vmatpush1.bf16.msra.mxu1 %v5367_v24 }
  0xf9   : > { %1104 = vmatprep.subr.bf16.mxu1 %v5373_v25 }
  0xfa   : > { %950 = vmatmul.mubr.bf16.gmra.mrb[4].mxu0 %v6454_v22  ;;  %1030 = vmatmul.mubr.bf16.gmra.mrb[4].mxu1 %v6457_v23 }
  0xfb   : > { %959 = vmatprep.mubr.bf16.mxu0 %v9238_v2  ;;  %1039 = vmatprep.mubr.bf16.mxu1 %v9238_v2 }
  0xfc   : > { %1105 = vmatpush1.bf16.msra.mxu1 %v5371_v26 }
  0xfd   : > { %1106 = vmatprep.subr.bf16.mxu1 %v5377_v27 }
 0x100   : > { %1107 = vmatpush1.bf16.msra.mxu1 %v5375_v28 }
 0x101   : > { %1108 = vmatprep.subr.bf16.mxu1 %v5381_v29 }
 0x102   : > { %960 = vmatmul.mubr.bf16.gmra.mrb[8].mxu0 %v5358_v30  ;;  %1040 = vmatmul.mubr.bf16.gmra.mrb[8].mxu1 %v6465_v31 }
 0x103   : > { %969 = vmatprep.mubr.bf16.mxu0 %v9238_v2  ;;  %1049 = vmatprep.mubr.bf16.mxu1 %v9238_v2 }
 0x104   : > { %1109 = vmatpush1.bf16.msra.mxu1 %v5379_v32 }
 0x105   : > { %1110 = vmatprep.subr.bf16.mxu1 %v5385_v33 }
 0x108   : > { %1111 = vmatpush1.bf16.msra.mxu1 %v5383_v34 }
 0x109   : > { %1112 = vmatprep.subr.bf16.mxu1 %v5389_v35 }
 0x10a   : > { %970 = vmatmul.mubr.bf16.gmra.mrb[12].mxu0 %v5360_v36  ;;  %1050 = vmatmul.mubr.bf16.gmra.mrb[12].mxu1 %v5361_v37 }
 0x10b   : > { %979 = vmatprep.mubr.bf16.mxu0 %v9238_v2  ;;  %1059 = vmatprep.mubr.bf16.mxu1 %v9238_v2 }
 0x10c   : > { %1113 = vmatpush1.bf16.msra.mxu1 %v5387_v38 }
 0x10d   : > { %1114 = vmatprep.subr.bf16.mxu1 %v5393_v39 }
 0x110   : > { %1115 = vmatpush1.bf16.msra.mxu1 %v5391_v40 }
 0x112   : > { %980 = vmatmul.mubr.bf16.gmra.mrb[16].mxu0 %v5362_v41  ;;  %1060 = vmatmul.mubr.bf16.gmra.mrb[16].mxu1 %v5366_v42 }
 0x113   : > { %989 = vmatprep.mubr.bf16.mxu0 %v9238_v2  ;;  %1069 = vmatprep.mubr.bf16.mxu1 %v9238_v2 }
 0x11a   : > { %990 = vmatmul.mubr.bf16.gmra.mrb[20].mxu0 %v5370_v43  ;;  %1070 = vmatmul.mubr.bf16.gmra.mrb[20].mxu1 %v5374_v44 }
 0x11b   : > { %999 = vmatprep.mubr.bf16.mxu0 %v9238_v2  ;;  %1079 = vmatprep.mubr.bf16.mxu1 %v9238_v2 }
 0x122   : > { %1000 = vmatmul.mubr.bf16.gmra.mrb[24].mxu0 %v5378_v45  ;;  %1080 = vmatmul.mubr.bf16.gmra.mrb[24].mxu1 %v5382_v46 }
 0x123   : > { %1009 = vmatprep.mubr.bf16.mxu0 %v9238_v2  ;;  %1089 = vmatprep.mubr.bf16.mxu1 %v9238_v2 }
 0x12a   : > { %1010 = vmatmul.mubr.bf16.gmra.mrb[28].mxu0 %v5386_v47  ;;  %1090 = vmatmul.mubr.bf16.gmra.mrb[28].mxu1 %v5390_v48 }
 0x12b   : > { %1132 = vmatprep.mubr.bf16.mxu1 %v9238_v2  ;;  %1325 = vmatprep.mubr.bf16.mxu0 %v9238_v2 }
 0x132   : > { %1133 = vmatmul.mubr.bf16.vlgmr.msra.gmra.mrb[32].mxu1 %v6444_v18 }
 0x133   : > { %1142 = vmatprep.mubr.bf16.mxu1 %v9238_v2 }
 0x13a   : > { %1143 = vmatmul.mubr.bf16.gmra.mrb[36].mxu1 %v6454_v22 }
 0x13b   : > { %1152 = vmatprep.mubr.bf16.mxu1 %v9238_v2 }
 0x142   : > { %1153 = vmatmul.mubr.bf16.gmra.mrb[40].mxu1 %v5358_v30 }
 0x143   : > { %1162 = vmatprep.mubr.bf16.mxu1 %v9238_v2 }
 0x14a   : > { %1163 = vmatmul.mubr.bf16.gmra.mrb[44].mxu1 %v5360_v36 }
 0x14b   : > { %1172 = vmatprep.mubr.bf16.mxu1 %v9238_v2 }
 0x152   : > { %1173 = vmatmul.mubr.bf16.gmra.mrb[48].mxu1 %v5362_v41 }
 0x153   : > { %1182 = vmatprep.mubr.bf16.mxu1 %v9238_v2 }
 0x15a   : > { %1183 = vmatmul.mubr.bf16.gmra.mrb[52].mxu1 %v5370_v43 }
 0x15b   : > { %1192 = vmatprep.mubr.bf16.mxu1 %v9238_v2 }
 0x162   : > { %1193 = vmatmul.mubr.bf16.gmra.mrb[56].mxu1 %v5378_v45 }
 0x163   : > { %1202 = vmatprep.mubr.bf16.mxu1 %v9238_v2 }
 0x16a   : > { %1203 = vmatmul.mubr.bf16.gmra.mrb[60].mxu1 %v5386_v47 }
 0x16b   : > { %1212 = vmatprep.mubr.bf16.mxu1 %v9238_v2 }
 0x172   : > { %1213 = vmatmul.mubr.bf16.gmra.mrb[64].mxu1 %v6447_v19 }
 0x173   : > { %1222 = vmatprep.mubr.bf16.mxu1 %v9238_v2 }
 0x17a   : > { %1223 = vmatmul.mubr.bf16.gmra.mrb[68].mxu1 %v6457_v23 }
 0x17b   : > { %1232 = vmatprep.mubr.bf16.mxu1 %v9238_v2 }
 0x182   : > { %1233 = vmatmul.mubr.bf16.gmra.mrb[72].mxu1 %v6465_v31 }
 0x183   : > { %1242 = vmatprep.mubr.bf16.mxu1 %v9238_v2 }
 0x18a   : > { %1243 = vmatmul.mubr.bf16.gmra.mrb[76].mxu1 %v5361_v37 }
 0x18b   : > { %1252 = vmatprep.mubr.bf16.mxu1 %v9238_v2 }
 0x192   : > { %1253 = vmatmul.mubr.bf16.gmra.mrb[80].mxu1 %v5366_v42 }
 0x193   : > { %1262 = vmatprep.mubr.bf16.mxu1 %v9238_v2 }
 0x19a   : > { %1263 = vmatmul.mubr.bf16.gmra.mrb[84].mxu1 %v5374_v44 }
 0x19b   : > { %1272 = vmatprep.mubr.bf16.mxu1 %v9238_v2 }
 0x1a2   : > { %1273 = vmatmul.mubr.bf16.gmra.mrb[88].mxu1 %v5382_v46 }
 0x1a3   : > { %1282 = vmatprep.mubr.bf16.mxu1 %v9238_v2 }
 0x1aa   : > { %1283 = vmatmul.mubr.bf16.gmra.mrb[92].mxu1 %v5390_v48 }
 0x1c5   : > { %v6510_v49 = vpop.f32.mrb[0].mxu0  ;;  %v6512_v50 = vpop.f32.mrb[0].mxu1 }
 0x1c6   : > { %v6514_v51 = vpop.f32.mrb[1].mxu0  ;;  %v6516_v52 = vpop.f32.mrb[1].mxu1  ;;  %v1552_v53 = vmul.f32 %v6510_v49, %v6510_v49  ;;  %v1568_v59 = vmul.f32 %v6512_v50, %v6512_v50 }
 0x1c7   : > { %v6520_v54 = vpop.f32.mrb[2].mxu0  ;;  %v6522_v55 = vpop.f32.mrb[2].mxu1  ;;  %v2995_v63 = vmul.f32 %v6514_v51, %v6514_v51  ;;  %v3011_v8 = vmul.f32 %v6516_v52, %v6516_v52 }
 0x1c8   : > { %v6524_v56 = vpop.f32.mrb[3].mxu1  ;;  %1584 = vadd.xlane.f32.xlu0 %v1552_v53  ;;  %v6526_v57 = vpop.f32.mrb[3].mxu0  ;;  %v1569_v58 = vmul.f32 %v6522_v55, %v6522_v55  ;;  %v1553_v12 = vmul.f32 %v6520_v54, %v6520_v54 }
 0x1c9   : > { %v2996_v60 = vmul.f32 %v6526_v57, %v6526_v57  ;;  %v3012_v5 = vmul.f32 %v6524_v56, %v6524_v56 }
 0x1ca   : > { %1618 = vadd.xlane.f32.xlu1 %v1569_v58 }
 0x1cc   : > { %1616 = vadd.xlane.f32.xlu0 %v1568_v59 }
 0x1cd   : > { %v6534_v61 = vpop.f32.mrb[4].mxu0  ;;  %v6536_v62 = vpop.f32.mrb[4].mxu1 }
 0x1ce   : > { %3029 = vadd.xlane.f32.xlu1 %v2996_v60  ;;  %v6540_v0 = vpop.f32.mrb[5].mxu0  ;;  %v6542_v1 = vpop.f32.mrb[5].mxu1  ;;  %v1554_v9 = vmul.f32 %v6534_v61, %v6534_v61  ;;  %v1570_v18 = vmul.f32 %v6536_v62, %v6536_v62 }
 0x1cf   : > { %v6544_v3 = vpop.f32.mrb[6].mxu0  ;;  %v6546_v4 = vpop.f32.mrb[6].mxu1  ;;  %v2997_v24 = vmul.f32 %v6540_v0, %v6540_v0  ;;  %v3013_v32 = vmul.f32 %v6542_v1, %v6542_v1 }
 0x1d0   : > { %3027 = vadd.xlane.f32.xlu0 %v2995_v63  ;;  %v6550_v6 = vpop.f32.mrb[7].mxu0  ;;  %v6552_v7 = vpop.f32.mrb[7].mxu1  ;;  %v1555_v17 = vmul.f32 %v6544_v3, %v6544_v3  ;;  %v1571_v21 = vmul.f32 %v6546_v4, %v6546_v4 }
 0x1d1   : > { %9413 = vst [vmem:[#allocation26_spill] sm:$0xff] %v6552_v7  ;;  %v3014_v29 = vmul.f32 %v6552_v7, %v6552_v7  ;;  %v2998_v36 = vmul.f32 %v6550_v6, %v6550_v6 }
 0x1d2   : > { %3061 = vadd.xlane.f32.xlu1 %v3012_v5 }
 0x1d4   : > { %3059 = vadd.xlane.f32.xlu0 %v3011_v8 }
 0x1d5   : > { %v6558_v10 = vpop.f32.mrb[8].mxu0  ;;  %v6560_v11 = vpop.f32.mrb[8].mxu1 }
 0x1d6   : > { %9414 = vst [vmem:[#allocation27_spill] sm:$0xff] %v6558_v10  ;;  %9415 = vst [vmem:[#allocation28_spill] sm:$0xff] %v6560_v11  ;;  %1588 = vadd.xlane.f32.xlu1 %v1554_v9  ;;  %v6564_v13 = vpop.f32.mrb[9].mxu0  ;;  %v6566_v14 = vpop.f32.mrb[9].mxu1  ;;  %v1556_v44 = vmul.f32 %v6558_v10, %v6558_v10  ;;  %v1572_v48 = vmul.f32 %v6560_v11, %v6560_v11 }
 0x1d7   : > { %9416 = vst [vmem:[#allocation29_spill] sm:$0xff] %v6564_v13  ;;  %9417 = vst [vmem:[#allocation30_spill] sm:$0xff] %v6566_v14  ;;  %v6568_v15 = vpop.f32.mrb[10].mxu0  ;;  %v6570_v16 = vpop.f32.mrb[10].mxu1  ;;  %v2999_v9 = vmul.f32 %v6564_v13, %v6564_v13 }
 0x1d8   : > { %9418 = vst [vmem:[#allocation31_spill] sm:$0xff] %v6568_v15  ;;  %9419 = vst [vmem:[#allocation32_spill] sm:$0xff] %v6570_v16  ;;  %1586 = vadd.xlane.f32.xlu0 %v1553_v12  ;;  %v6576_v19 = vpop.f32.mrb[11].mxu0  ;;  %v6578_v20 = vpop.f32.mrb[11].mxu1  ;;  %v1557_v33 = vmul.f32 %v6568_v15, %v6568_v15  ;;  %v1573_v41 = vmul.f32 %v6570_v16, %v6570_v16 }
 0x1d9   : > { %9420 = vst [vmem:[#allocation33_spill] sm:$0xff] %v6576_v19  ;;  %9421 = vst [vmem:[#allocation34_spill] sm:$0xff] %v6578_v20  ;;  %v3000_v45 = vmul.f32 %v6576_v19, %v6576_v19  ;;  %v3016_v63 = vmul.f32 %v6578_v20, %v6578_v20 }
 0x1da   : > { %1590 = vadd.xlane.f32.xlu1 %v1555_v17 }
 0x1dc   : > { %1620 = vadd.xlane.f32.xlu0 %v1570_v18 }
 0x1dd   : > { %v6582_v22 = vpop.f32.mrb[12].mxu0  ;;  %v6584_v23 = vpop.f32.mrb[12].mxu1 }
 0x1de   : > { %9422 = vst [vmem:[#allocation35_spill] sm:$0xff] %v6582_v22  ;;  %9423 = vst [vmem:[#allocation36_spill] sm:$0xff] %v6584_v23  ;;  %1622 = vadd.xlane.f32.xlu1 %v1571_v21  ;;  %v6588_v25 = vpop.f32.mrb[13].mxu0  ;;  %v6590_v26 = vpop.f32.mrb[13].mxu1  ;;  %v3015_v21 = vmul.f32 %v6566_v14, %v6566_v14 }
 0x1df   : > { %9424 = vst [vmem:[#allocation37_spill] sm:$0xff] %v6588_v25  ;;  %9425 = vst [vmem:[#allocation38_spill] sm:$0xff] %v6590_v26  ;;  %v6592_v27 = vpop.f32.mrb[14].mxu0  ;;  %v6594_v28 = vpop.f32.mrb[14].mxu1 }
 0x1e0   : > { %9426 = vst [vmem:[#allocation39_spill] sm:$0xff] %v6592_v27  ;;  %9427 = vst [vmem:[#allocation40_spill] sm:$0xff] %v6594_v28  ;;  %3031 = vadd.xlane.f32.xlu0 %v2997_v24  ;;  %v6598_v30 = vpop.f32.mrb[15].mxu0  ;;  %v6600_v31 = vpop.f32.mrb[15].mxu1  ;;  %v1559_v12 = vmul.f32 %v6592_v27, %v6592_v27 }
 0x1e1   : > { %9428 = vst [vmem:[#allocation41_spill] sm:$0xff] %v6598_v30  ;;  %9429 = vst [vmem:[#allocation42_spill] sm:$0xff] %v6600_v31 }
 0x1e2   : > { %3065 = vadd.xlane.f32.xlu1 %v3014_v29 }
 0x1e4   : > { %3063 = vadd.xlane.f32.xlu0 %v3013_v32 }
 0x1e5   : > { %v6606_v34 = vpop.f32.mrb[16].mxu0  ;;  %v6608_v35 = vpop.f32.mrb[16].mxu1 }
 0x1e6   : > { %9430 = vst [vmem:[#allocation43_spill] sm:$0xff] %v6606_v34  ;;  %9431 = vst [vmem:[#allocation44_spill] sm:$0xff] %v6608_v35  ;;  %1594 = vadd.xlane.f32.xlu1 %v1557_v33  ;;  %v6612_v37 = vpop.f32.mrb[17].mxu0  ;;  %v6614_v38 = vpop.f32.mrb[17].mxu1 }
 0x1e7   : > { %9432 = vst [vmem:[#allocation45_spill] sm:$0xff] %v6612_v37  ;;  %9433 = vst [vmem:[#allocation46_spill] sm:$0xff] %v6614_v38  ;;  %v6616_v39 = vpop.f32.mrb[18].mxu0  ;;  %v6618_v40 = vpop.f32.mrb[18].mxu1 }
 0x1e8   : > { %9434 = vst [vmem:[#allocation47_spill] sm:$0xff] %v6616_v39  ;;  %9435 = vst [vmem:[#allocation48_spill] sm:$0xff] %v6618_v40  ;;  %3033 = vadd.xlane.f32.xlu0 %v2998_v36  ;;  %v6622_v42 = vpop.f32.mrb[19].mxu0  ;;  %v6624_v43 = vpop.f32.mrb[19].mxu1  ;;  %v1575_v36 = vmul.f32 %v6594_v28, %v6594_v28 }
 0x1e9   : > { %9436 = vst [vmem:[#allocation49_spill] sm:$0xff] %v6622_v42  ;;  %9437 = vst [vmem:[#allocation50_spill] sm:$0xff] %v6624_v43 }
 0x1ea   : > { %1626 = vadd.xlane.f32.xlu1 %v1573_v41 }
 0x1ec   : > { %1592 = vadd.xlane.f32.xlu0 %v1556_v44 }
 0x1ed   : > { %v6630_v46 = vpop.f32.mrb[20].mxu0  ;;  %v6632_v47 = vpop.f32.mrb[20].mxu1 }
 0x1ee   : > { %9438 = vst [vmem:[#allocation51_spill] sm:$0xff] %v6630_v46  ;;  %9439 = vst [vmem:[#allocation52_spill] sm:$0xff] %v6632_v47  ;;  %3037 = vadd.xlane.f32.xlu1 %v3000_v45  ;;  %v6636_v53 = vpop.f32.mrb[21].mxu0  ;;  %v6638_v58 = vpop.f32.mrb[21].mxu1  ;;  %v1558_v45 = vmul.f32 %v6582_v22, %v6582_v22 }
 0x1ef   : > { %9440 = vst [vmem:[#allocation53_spill] sm:$0xff] %v6636_v53  ;;  %9441 = vst [vmem:[#allocation54_spill] sm:$0xff] %v6638_v58  ;;  %v6640_v59 = vpop.f32.mrb[22].mxu0  ;;  %v6642_v60 = vpop.f32.mrb[22].mxu1 }
 0x1f0   : > { %9442 = vst [vmem:[#allocation55_spill] sm:$0xff] %v6640_v59  ;;  %9443 = vst [vmem:[#allocation56_spill] sm:$0xff] %v6642_v60  ;;  %1624 = vadd.xlane.f32.xlu0 %v1572_v48  ;;  %v6646_v5 = vpop.f32.mrb[23].mxu0  ;;  %v6648_v8 = vpop.f32.mrb[23].mxu1  ;;  %v3002_v48 = vmul.f32 %v6598_v30, %v6598_v30 }
 0x1f1   : > { %9444 = vst [vmem:[#allocation57_spill] sm:$0xff] %v6646_v5  ;;  %9445 = vst [vmem:[#allocation58_spill] sm:$0xff] %v6648_v8 }
 0x1f2   : > { %3069 = vadd.xlane.f32.xlu1 %v3016_v63 }
 0x1f4   : > { %3035 = vadd.xlane.f32.xlu0 %v2999_v9 }
 0x1f5   : > { %v6654_v17 = vpop.f32.mrb[24].mxu0  ;;  %v6656_v18 = vpop.f32.mrb[24].mxu1 }
 0x1f6   : > { %9446 = vst [vmem:[#allocation59_spill] sm:$0xff] %v6654_v17  ;;  %9447 = vst [vmem:[#allocation60_spill] sm:$0xff] %v6656_v18  ;;  %1598 = vadd.xlane.f32.xlu1 %v1559_v12  ;;  %v6660_v24 = vpop.f32.mrb[25].mxu0  ;;  %v6662_v29 = vpop.f32.mrb[25].mxu1  ;;  %v1574_v12 = vmul.f32 %v6584_v23, %v6584_v23  ;;  %v1561_v23 = vmul.f32 %v6616_v39, %v6616_v39 }
 0x1f7   : > { %9448 = vst [vmem:[#allocation61_spill] sm:$0xff] %v6660_v24  ;;  %9449 = vst [vmem:[#allocation62_spill] sm:$0xff] %v6662_v29  ;;  %v6664_v32 = vpop.f32.mrb[26].mxu0  ;;  %v6666_v33 = vpop.f32.mrb[26].mxu1 }
 0x1f8   : > { %9450 = vst [vmem:[#allocation63_spill] sm:$0xff] %v6664_v32  ;;  %9451 = vst [vmem:[#allocation64_spill] sm:$0xff] %v6666_v33  ;;  %3067 = vadd.xlane.f32.xlu0 %v3015_v21  ;;  %v6670_v41 = vpop.f32.mrb[27].mxu0  ;;  %v6672_v44 = vpop.f32.mrb[27].mxu1 }
 0x1f9   : > { %9452 = vst [vmem:[#allocation65_spill] sm:$0xff] %v6670_v41  ;;  %9453 = vst [vmem:[#allocation66_spill] sm:$0xff] %v6672_v44 }
 0x1fa   : > { %1630 = vadd.xlane.f32.xlu1 %v1575_v36 }
 0x1fc   : > { %1596 = vadd.xlane.f32.xlu0 %v1558_v45  ;;  %v3018_v45 = vmul.f32 %v6600_v31, %v6600_v31 }
 0x1fd   : > { %v6678_v63 = vpop.f32.mrb[28].mxu0  ;;  %v6680_v9 = vpop.f32.mrb[28].mxu1 }
 0x1fe   : > { %9454 = vst [vmem:[#allocation67_spill] sm:$0xff] %v6678_v63  ;;  %9455 = vst [vmem:[#allocation68_spill] sm:$0xff] %v6680_v9  ;;  %3041 = vadd.xlane.f32.xlu1 %v3002_v48  ;;  %v6684_v21 = vpop.f32.mrb[29].mxu0  ;;  %v6686_v2 = vpop.f32.mrb[29].mxu1  ;;  %v3001_v48 = vmul.f32 %v6588_v25, %v6588_v25 }
 0x1ff   : > { %9456 = vst [vmem:[#allocation69_spill] sm:$0xff] %v6684_v21  ;;  %9457 = vst [vmem:[#allocation70_spill] sm:$0xff] %v6686_v2  ;;  %v6688_v36 = vpop.f32.mrb[30].mxu0  ;;  %v6690_v28 = vpop.f32.mrb[30].mxu1 }
 0x200   : > { %9458 = vst [vmem:[#allocation71_spill] sm:$0xff] %v6688_v36  ;;  %9459 = vst [vmem:[#allocation72_spill] sm:$0xff] %v6690_v28  ;;  %1628 = vadd.xlane.f32.xlu0 %v1574_v12  ;;  %v6694_v30 = vpop.f32.mrb[31].mxu0  ;;  %v6696_v27 = vpop.f32.mrb[31].mxu1  ;;  %v3017_v12 = vmul.f32 %v6590_v26, %v6590_v26  ;;  %v1576_v26 = vmul.f32 %v6608_v35, %v6608_v35  ;;  %v3019_v35 = vmul.f32 %v6614_v38, %v6614_v38 }
 0x201   : > { %9460 = vst [vmem:[#allocation73_spill] sm:$0xff] %v6694_v30  ;;  %9461 = vst [vmem:[#allocation74_spill] sm:$0xff] %v6696_v27  ;;  %v1578_v38 = vmul.f32 %v6632_v47, %v6632_v47  ;;  %v3021_v47 = vmul.f32 %v6638_v58, %v6638_v58  ;;  %v1580_v58 = vmul.f32 %v6656_v18, %v6656_v18 }
 0x202   : > { %3073 = vadd.xlane.f32.xlu1 %v3018_v45  ;;  %v1577_v45 = vmul.f32 %v6618_v40, %v6618_v40  ;;  %v3023_v18 = vmul.f32 %v6662_v29, %v6662_v29  ;;  %v1582_v29 = vmul.f32 %v6680_v9, %v6680_v9  ;;  %v3025_v9 = vmul.f32 %v6686_v2, %v6686_v2 }
 0x204   : > { %3039 = vadd.xlane.f32.xlu0 %v3001_v48  ;;  %v1560_v48 = vmul.f32 %v6606_v34, %v6606_v34 }
 0x205   : > { %v6702_v22 = vpop.f32.mrb[32].mxu1 }
 0x206   : > { %9462 = vst [vmem:[#allocation75_spill] sm:$0xff] %v6702_v22  ;;  %1602 = vadd.xlane.f32.xlu1 %v1561_v23  ;;  %v6706_v20 = vpop.f32.mrb[33].mxu1  ;;  %v3004_v23 = vmul.f32 %v6622_v42, %v6622_v42 }
 0x207   : > { %9463 = vst [vmem:[#allocation76_spill] sm:$0xff] %v6706_v20  ;;  %v6708_v31 = vpop.f32.mrb[34].mxu1  ;;  %v3219_v2 = vmul.f32 %v6706_v20, %v6706_v20 }
 0x208   : > { %9464 = vst [vmem:[#allocation77_spill] sm:$0xff] %v6708_v31  ;;  %3071 = vadd.xlane.f32.xlu0 %v3017_v12  ;;  %v6712_v19 = vpop.f32.mrb[35].mxu1 }
 0x209   : > { %9465 = vst [vmem:[#allocation78_spill] sm:$0xff] %v6712_v19 }
 0x20a   : > { %1634 = vadd.xlane.f32.xlu1 %v1577_v45  ;;  %v3020_v45 = vmul.f32 %v6624_v43, %v6624_v43 }
 0x20c   : > { %1600 = vadd.xlane.f32.xlu0 %v1560_v48  ;;  %v3003_v48 = vmul.f32 %v6612_v37, %v6612_v37 }
 0x20d   : > { %v6718_v39 = vpop.f32.mrb[36].mxu1 }
 0x20e   : > { %9466 = vst [vmem:[#allocation79_spill] sm:$0xff] %v6718_v39  ;;  %3045 = vadd.xlane.f32.xlu1 %v3004_v23  ;;  %v6722_v12 = vpop.f32.mrb[37].mxu1  ;;  %v1563_v23 = vmul.f32 %v6640_v59, %v6640_v59 }
 0x20f   : > { %9467 = vst [vmem:[#allocation80_spill] sm:$0xff] %v6722_v12  ;;  %v6724_v25 = vpop.f32.mrb[38].mxu1 }
 0x210   : > { %9468 = vst [vmem:[#allocation81_spill] sm:$0xff] %v6724_v25  ;;  %1632 = vadd.xlane.f32.xlu0 %v1576_v26  ;;  %v6728_v40 = vpop.f32.mrb[39].mxu1 }
 0x211   : > { %9469 = vst [vmem:[#allocation82_spill] sm:$0xff] %v6728_v40 }
 0x212   : > { %3077 = vadd.xlane.f32.xlu1 %v3020_v45  ;;  %v1579_v45 = vmul.f32 %v6642_v60, %v6642_v60 }
 0x214   : > { %3043 = vadd.xlane.f32.xlu0 %v3003_v48  ;;  %v1562_v48 = vmul.f32 %v6630_v46, %v6630_v46 }
 0x215   : > { %v6734_v42 = vpop.f32.mrb[40].mxu1 }
 0x216   : > { %9470 = vst [vmem:[#allocation83_spill] sm:$0xff] %v6734_v42  ;;  %1606 = vadd.xlane.f32.xlu1 %v1563_v23  ;;  %v6738_v26 = vpop.f32.mrb[41].mxu1  ;;  %v3006_v23 = vmul.f32 %v6646_v5, %v6646_v5 }
 0x217   : > { %9471 = vst [vmem:[#allocation84_spill] sm:$0xff] %v6738_v26  ;;  %v6740_v34 = vpop.f32.mrb[42].mxu1 }
 0x218   : > { %9472 = vst [vmem:[#allocation85_spill] sm:$0xff] %v6740_v34  ;;  %3075 = vadd.xlane.f32.xlu0 %v3019_v35  ;;  %v6744_v43 = vpop.f32.mrb[43].mxu1 }
 0x219   : > { %9473 = vst [vmem:[#allocation86_spill] sm:$0xff] %v6744_v43 }
 0x21a   : > { %1638 = vadd.xlane.f32.xlu1 %v1579_v45  ;;  %v3022_v45 = vmul.f32 %v6648_v8, %v6648_v8 }
 0x21c   : > { %1604 = vadd.xlane.f32.xlu0 %v1562_v48  ;;  %v3005_v48 = vmul.f32 %v6636_v53, %v6636_v53 }
 0x21d   : > { %v6750_v59 = vpop.f32.mrb[44].mxu1 }
 0x21e   : > { %9474 = vst [vmem:[#allocation87_spill] sm:$0xff] %v6750_v59  ;;  %3049 = vadd.xlane.f32.xlu1 %v3006_v23  ;;  %v6754_v35 = vpop.f32.mrb[45].mxu1  ;;  %v1565_v23 = vmul.f32 %v6664_v32, %v6664_v32 }
 0x21f   : > { %9475 = vst [vmem:[#allocation88_spill] sm:$0xff] %v6754_v35  ;;  %v6756_v37 = vpop.f32.mrb[46].mxu1 }
 0x220   : > { %9476 = vst [vmem:[#allocation89_spill] sm:$0xff] %v6756_v37  ;;  %1636 = vadd.xlane.f32.xlu0 %v1578_v38  ;;  %v6760_v60 = vpop.f32.mrb[47].mxu1 }
 0x221   : > { %9477 = vst [vmem:[#allocation90_spill] sm:$0xff] %v6760_v60 }
 0x222   : > { %3081 = vadd.xlane.f32.xlu1 %v3022_v45  ;;  %v1581_v45 = vmul.f32 %v6666_v33, %v6666_v33 }
 0x224   : > { %3047 = vadd.xlane.f32.xlu0 %v3005_v48  ;;  %v1564_v48 = vmul.f32 %v6654_v17, %v6654_v17 }
 0x225   : > { %v6766_v5 = vpop.f32.mrb[48].mxu1 }
 0x226   : > { %9478 = vst [vmem:[#allocation91_spill] sm:$0xff] %v6766_v5  ;;  %1610 = vadd.xlane.f32.xlu1 %v1565_v23  ;;  %v6770_v38 = vpop.f32.mrb[49].mxu1  ;;  %v3008_v23 = vmul.f32 %v6670_v41, %v6670_v41 }
 0x227   : > { %9479 = vst [vmem:[#allocation92_spill] sm:$0xff] %v6770_v38  ;;  %v6772_v46 = vpop.f32.mrb[50].mxu1 }
 0x228   : > { %9480 = vst [vmem:[#allocation93_spill] sm:$0xff] %v6772_v46  ;;  %3079 = vadd.xlane.f32.xlu0 %v3021_v47  ;;  %v6776_v8 = vpop.f32.mrb[51].mxu1 }
 0x229   : > { %9481 = vst [vmem:[#allocation94_spill] sm:$0xff] %v6776_v8 }
 0x22a   : > { %1642 = vadd.xlane.f32.xlu1 %v1581_v45  ;;  %v3024_v45 = vmul.f32 %v6672_v44, %v6672_v44 }
 0x22c   : > { %1608 = vadd.xlane.f32.xlu0 %v1564_v48  ;;  %v3007_v48 = vmul.f32 %v6660_v24, %v6660_v24 }
 0x22d   : > { %v6782_v32 = vpop.f32.mrb[52].mxu1 }
 0x22e   : > { %9482 = vst [vmem:[#allocation95_spill] sm:$0xff] %v6782_v32  ;;  %3053 = vadd.xlane.f32.xlu1 %v3008_v23  ;;  %v6786_v47 = vpop.f32.mrb[53].mxu1  ;;  %v1567_v23 = vmul.f32 %v6688_v36, %v6688_v36 }
 0x22f   : > { %9483 = vst [vmem:[#allocation96_spill] sm:$0xff] %v6786_v47  ;;  %v6788_v53 = vpop.f32.mrb[54].mxu1 }
 0x230   : > { %9484 = vst [vmem:[#allocation97_spill] sm:$0xff] %v6788_v53  ;;  %1640 = vadd.xlane.f32.xlu0 %v1580_v58  ;;  %v6792_v33 = vpop.f32.mrb[55].mxu1 }
 0x231   : > { %9485 = vst [vmem:[#allocation98_spill] sm:$0xff] %v6792_v33 }
 0x232   : > { %3085 = vadd.xlane.f32.xlu1 %v3024_v45  ;;  %v1583_v45 = vmul.f32 %v6690_v28, %v6690_v28 }
 0x234   : > { %3051 = vadd.xlane.f32.xlu0 %v3007_v48  ;;  %v1566_v48 = vmul.f32 %v6678_v63, %v6678_v63 }
 0x235   : > { %v6798_v41 = vpop.f32.mrb[56].mxu1 }
 0x236   : > { %9486 = vst [vmem:[#allocation99_spill] sm:$0xff] %v6798_v41  ;;  %1614 = vadd.xlane.f32.xlu1 %v1567_v23  ;;  %v6802_v58 = vpop.f32.mrb[57].mxu1  ;;  %v3010_v23 = vmul.f32 %v6694_v30, %v6694_v30 }
 0x237   : > { %9487 = vst [vmem:[#allocation100_spill] sm:$0xff] %v6802_v58  ;;  %v6804_v17 = vpop.f32.mrb[58].mxu1 }
 0x238   : > { %9488 = vst [vmem:[#allocation101_spill] sm:$0xff] %v6804_v17  ;;  %3083 = vadd.xlane.f32.xlu0 %v3023_v18  ;;  %v6808_v44 = vpop.f32.mrb[59].mxu1 }
 0x239   : > { %9489 = vst [vmem:[#allocation102_spill] sm:$0xff] %v6808_v44 }
 0x23a   : > { %1646 = vadd.xlane.f32.xlu1 %v1583_v45  ;;  %v3026_v45 = vmul.f32 %v6696_v27, %v6696_v27 }
 0x23c   : > { %1612 = vadd.xlane.f32.xlu0 %v1566_v48  ;;  %v3009_v48 = vmul.f32 %v6684_v21, %v6684_v21 }
 0x23d   : > { %v6814_v36 = vpop.f32.mrb[60].mxu1 }
 0x23e   : > { %9490 = vst [vmem:[#allocation103_spill] sm:$0xff] %v6814_v36  ;;  %3057 = vadd.xlane.f32.xlu1 %v3010_v23  ;;  %v6818_v18 = vpop.f32.mrb[61].mxu1  ;;  %v1778_v23 = vmul.f32 %v6708_v31, %v6708_v31 }
 0x23f   : > { %9491 = vst [vmem:[#allocation104_spill] sm:$0xff] %v6818_v18  ;;  %v6820_v24 = vpop.f32.mrb[62].mxu1 }
 0x240   : > { %9492 = vst [vmem:[#allocation105_spill] sm:$0xff] %v6820_v24  ;;  %1644 = vadd.xlane.f32.xlu0 %v1582_v29  ;;  %v6824_v28 = vpop.f32.mrb[63].mxu1 }
 0x241   : > { %9493 = vst [vmem:[#allocation106_spill] sm:$0xff] %v6824_v28 }
 0x242   : > { %3089 = vadd.xlane.f32.xlu1 %v3026_v45  ;;  %v3220_v45 = vmul.f32 %v6712_v19, %v6712_v19 }
 0x244   : > { %3055 = vadd.xlane.f32.xlu0 %v3009_v48  ;;  %v1777_v48 = vmul.f32 %v6702_v22, %v6702_v22 }
 0x245   : > { %v6830_v30 = vpop.f32.mrb[64].mxu1 }
 0x246   : > { %9494 = vst [vmem:[#allocation107_spill] sm:$0xff] %v6830_v30  ;;  %1811 = vadd.xlane.f32.xlu1 %v1778_v23  ;;  %v6834_v29 = vpop.f32.mrb[65].mxu1  ;;  %v1780_v23 = vmul.f32 %v6724_v25, %v6724_v25 }
 0x247   : > { %9495 = vst [vmem:[#allocation108_spill] sm:$0xff] %v6834_v29  ;;  %v6836_v63 = vpop.f32.mrb[66].mxu1 }
 0x248   : > { %9496 = vst [vmem:[#allocation109_spill] sm:$0xff] %v6836_v63  ;;  %3087 = vadd.xlane.f32.xlu0 %v3025_v9  ;;  %v6840_v27 = vpop.f32.mrb[67].mxu1 }
 0x249   : > { %9497 = vst [vmem:[#allocation110_spill] sm:$0xff] %v6840_v27 }
 0x24a   : > { %3253 = vadd.xlane.f32.xlu1 %v3220_v45  ;;  %v3222_v45 = vmul.f32 %v6728_v40, %v6728_v40 }
 0x24c   : > { %1809 = vadd.xlane.f32.xlu0 %v1777_v48  ;;  %v1779_v48 = vmul.f32 %v6718_v39, %v6718_v39 }
 0x24d   : > { %v6846_v31 = vpop.f32.mrb[68].mxu1 }
 0x24e   : > { %9498 = vst [vmem:[#allocation111_spill] sm:$0xff] %v6846_v31  ;;  %1815 = vadd.xlane.f32.xlu1 %v1780_v23  ;;  %v6850_v9 = vpop.f32.mrb[69].mxu1  ;;  %v1782_v23 = vmul.f32 %v6740_v34, %v6740_v34 }
 0x24f   : > { %9499 = vst [vmem:[#allocation112_spill] sm:$0xff] %v6850_v9  ;;  %v6852_v21 = vpop.f32.mrb[70].mxu1 }
 0x250   : > { %9500 = vst [vmem:[#allocation113_spill] sm:$0xff] %v6852_v21  ;;  %3251 = vadd.xlane.f32.xlu0 %v3219_v2  ;;  %v6856_v19 = vpop.f32.mrb[71].mxu1  ;;  %v3221_v2 = vmul.f32 %v6722_v12, %v6722_v12  ;;  %v1781_v12 = vmul.f32 %v6734_v42, %v6734_v42 }
 0x251   : > { %9501 = vst [vmem:[#allocation114_spill] sm:$0xff] %v6856_v19 }
 0x252   : > { %3257 = vadd.xlane.f32.xlu1 %v3222_v45 }
 0x254   : > { %1813 = vadd.xlane.f32.xlu0 %v1779_v48  ;;  %v3224_v48 = vmul.f32 %v6744_v43, %v6744_v43 }
 0x255   : > { %v1585_v25 = vpop.xlane.xlu0 %1584  ;;  %v6862_v20 = vpop.f32.mrb[72].mxu1 }
 0x256   : > { %9502 = vst [vmem:[#allocation115_spill] sm:$0xff] %v6862_v20  ;;  %v1649_v22 = vmul.f32 0.0078125, %v1585_v25  ;;  %1819 = vadd.xlane.f32.xlu1 %v1782_v23  ;;  %v6866_v14 = vpop.f32.mrb[73].mxu1 }
 0x257   : > { %9503 = vst [vmem:[#allocation116_spill] sm:$0xff] %v6866_v14  ;;  %v1619_v40 = vpop.xlane.xlu1 %1618  ;;  %v6868_v13 = vpop.f32.mrb[74].mxu1 }
 0x258   : > { %9504 = vst [vmem:[#allocation117_spill] sm:$0xff] %v6868_v13  ;;  %v1681_v45 = vadd.f32 1.1920929e-07, %v1649_v22  ;;  %v1666_v16 = vmul.f32 0.0078125, %v1619_v40  ;;  %3255 = vadd.xlane.f32.xlu0 %v3221_v2  ;;  %v6872_v34 = vpop.f32.mrb[75].mxu1  ;;  %v1784_v22 = vmul.f32 %v6756_v37, %v6756_v37 }
 0x259   : > { %9505 = vst [vmem:[#allocation118_spill] sm:$0xff] %v6872_v34  ;;  %v1617_v39 = vpop.xlane.xlu0 %1616 }
 0x25a   : > { %5418 = vrsqrt.f32 %v1681_v45  ;;  %v1698_v25 = vadd.f32 1.1920929e-07, %v1666_v16  ;;  %v1665_v23 = vmul.f32 0.0078125, %v1617_v39  ;;  %3261 = vadd.xlane.f32.xlu1 %v3224_v48  ;;  %v3223_v16 = vmul.f32 %v6738_v26, %v6738_v26 }
 0x25b   : > { %v3030_v15 = vpop.xlane.xlu1 %3029 }
 0x25c   : > { %5420 = vrsqrt.f32 %v1698_v25  ;;  %v1697_v11 = vadd.f32 1.1920929e-07, %v1665_v23  ;;  %v3092_v10 = vmul.f32 0.0078125, %v3030_v15  ;;  %1817 = vadd.xlane.f32.xlu0 %v1781_v12  ;;  %v3226_v23 = vmul.f32 %v6760_v60, %v6760_v60 }
 0x25d   : > { %v3028_v40 = vpop.xlane.xlu0 %3027  ;;  %v6878_v2 = vpop.f32.mrb[76].mxu1 }
 0x25e   : > { %9506 = vst [vmem:[#allocation119_spill] sm:$0xff] %v6878_v2  ;;  %5422 = vrsqrt.f32 %v1697_v11  ;;  %v3124_v43 = vadd.f32 1.1920929e-07, %v3092_v10  ;;  %v3091_v45 = vmul.f32 0.0078125, %v3028_v40  ;;  %1823 = vadd.xlane.f32.xlu1 %v1784_v22  ;;  %v6882_v39 = vpop.f32.mrb[77].mxu1  ;;  %v1783_v40 = vmul.f32 %v6750_v59, %v6750_v59 }
 0x25f   : > { %9507 = vst [vmem:[#allocation120_spill] sm:$0xff] %v6882_v39  ;;  %v3062_v48 = vpop.xlane.xlu1 %3061  ;;  %v6884_v25 = vpop.f32.mrb[78].mxu1 }
 0x260   : > { %9508 = vst [vmem:[#allocation121_spill] sm:$0xff] %v6884_v25  ;;  %5424 = vrsqrt.f32 %v3124_v43  ;;  %v3123_v15 = vadd.f32 1.1920929e-07, %v3091_v45  ;;  %v3108_v12 = vmul.f32 0.0078125, %v3062_v48  ;;  %3259 = vadd.xlane.f32.xlu0 %v3223_v16  ;;  %v6888_v37 = vpop.f32.mrb[79].mxu1  ;;  %v1786_v16 = vmul.f32 %v6772_v46, %v6772_v46 }
 0x261   : > { %9509 = vst [vmem:[#allocation122_spill] sm:$0xff] %v6888_v37  ;;  %v3060_v10 = vpop.xlane.xlu0 %3059 }
 0x262   : > { %5426 = vrsqrt.f32 %v3123_v15  ;;  %v3140_v11 = vadd.f32 1.1920929e-07, %v3108_v12  ;;  %v3107_v22 = vmul.f32 0.0078125, %v3060_v10  ;;  %3265 = vadd.xlane.f32.xlu1 %v3226_v23  ;;  %v3225_v10 = vmul.f32 %v6754_v35, %v6754_v35 }
 0x263   : > { %v1589_v26 = vpop.xlane.xlu1 %1588 }
 0x264   : > { %v5419_v42 = vpop.eup %5418  ;;  %5428 = vrsqrt.f32 %v3140_v11  ;;  %v3139_v43 = vadd.f32 1.1920929e-07, %v3107_v22  ;;  %v1651_v45 = vmul.f32 0.0078125, %v1589_v26  ;;  %1821 = vadd.xlane.f32.xlu0 %v1783_v40 }
 0x265   : > { %v6894_v48 = vpop.xlane.xlu0 %1586  ;;  %v6897_v60 = vmul.f32 %v5419_v42, %v6510_v49  ;;  %v6899_v15 = vpop.f32.mrb[80].mxu1  ;;  %v3228_v42 = vmul.f32 %v6776_v8, %v6776_v8 }
 0x266   : > { %9510 = vst [vmem:[#allocation123_spill] sm:$0xff] %v6899_v15  ;;  %v5421_v12 = vpop.eup %5420  ;;  %5430 = vrsqrt.f32 %v3139_v43  ;;  %v1683_v23 = vadd.f32 1.1920929e-07, %v1651_v45  ;;  %1827 = vadd.xlane.f32.xlu1 %v1786_v16  ;;  %v6903_v11 = vpop.f32.mrb[81].mxu1 }
 0x267   : > { %9511 = vst [vmem:[#allocation124_spill] sm:$0xff] %v6903_v11  ;;  %v1591_v26 = vpop.xlane.xlu1 %1590  ;;  %v6906_v22 = vmul.f32 %v5421_v12, %v6522_v55  ;;  %v6908_v40 = vpop.f32.mrb[82].mxu1  ;;  %v1785_v55 = vmul.f32 %v6766_v5, %v6766_v5 }
 0x268   : > { %9512 = vst [vmem:[#allocation125_spill] sm:$0xff] %v6908_v40  ;;  %v5423_v46 = vpop.eup %5422  ;;  %5432 = vrsqrt.f32 %v1683_v23  ;;  %v1652_v49 = vmul.f32 0.0078125, %v1591_v26  ;;  %3263 = vadd.xlane.f32.xlu0 %v3225_v10  ;;  %v6912_v43 = vpop.f32.mrb[83].mxu1 }
 0x269   : > { %9513 = vst [vmem:[#allocation126_spill] sm:$0xff] %v6912_v43  ;;  %v1621_v45 = vpop.xlane.xlu0 %1620  ;;  %v6915_v16 = vmul.f32 %v5423_v46, %v6512_v50  ;;  %v1788_v50 = vmul.f32 %v6788_v53, %v6788_v53 }
 0x26a   : > { %v5425_v35 = vpop.eup %5424  ;;  %v1684_v59 = vadd.f32 1.1920929e-07, %v1652_v49  ;;  %v1667_v7 = vmul.f32 0.0078125, %v1621_v45  ;;  %3269 = vadd.xlane.f32.xlu1 %v3228_v42 }
 0x26b   : > { %v1623_v12 = vpop.xlane.xlu1 %1622  ;;  %v6920_v23 = vmul.f32 %v5425_v35, %v6526_v57  ;;  %v3227_v57 = vmul.f32 %v6770_v38, %v6770_v38 }
 0x26c   : > { %v5427_v10 = vpop.eup %5426  ;;  %5434 = vrsqrt.f32 %v1684_v59  ;;  %v1699_v26 = vadd.f32 1.1920929e-07, %v1667_v7  ;;  %v1668_v8 = vmul.f32 0.0078125, %v1623_v12  ;;  %1825 = vadd.xlane.f32.xlu0 %v1785_v55 }
 0x26d   : > { %v3032_v46 = vpop.xlane.xlu0 %3031  ;;  %v6925_v49 = vmul.f32 %v5427_v10, %v6514_v51  ;;  %v3230_v51 = vmul.f32 %v6792_v33, %v6792_v33  ;;  %v7105_v38 = vpop.f32.mrb[84].mxu1 }
 0x26e   : > { %v5429_v42 = vpop.eup %5428  ;;  %5436 = vrsqrt.f32 %v1699_v26  ;;  %v1700_v45 = vadd.f32 1.1920929e-07, %v1668_v8  ;;  %v3093_v5 = vmul.f32 0.0078125, %v3032_v46  ;;  %1831 = vadd.xlane.f32.xlu1 %v1788_v50  ;;  %v1787_v50 = vmul.f32 %v6782_v32, %v6782_v32  ;;  %9534 = vst [vmem:[#allocation147_spill] sm:$0xff] %v7105_v38 }
 0x26f   : > { %v6929_v35 = vpop.xlane.xlu1 %3065  ;;  %v6932_v7 = vmul.f32 %v5429_v42, %v6524_v56  ;;  %v1790_v42 = vmul.f32 %v6804_v17, %v6804_v17 }
 0x270   : > { %v5431_v59 = vpop.eup %5430  ;;  %5438 = vrsqrt.f32 %v1700_v45  ;;  %v3125_v55 = vadd.f32 1.1920929e-07, %v3093_v5  ;;  %3267 = vadd.xlane.f32.xlu0 %v3227_v57  ;;  %v3229_v57 = vmul.f32 %v6786_v47, %v6786_v47 }
 0x271   : > { %v3064_v12 = vpop.xlane.xlu0 %3063  ;;  %v6937_v8 = vmul.f32 %v5431_v59, %v6516_v52 }
 0x272   : > { %v5433_v10 = vpop.eup %5432  ;;  %5440 = vrsqrt.f32 %v3125_v55  ;;  %v3109_v26 = vmul.f32 0.0078125, %v3064_v12  ;;  %3273 = vadd.xlane.f32.xlu1 %v3230_v51  ;;  %v3232_v51 = vmul.f32 %v6808_v44, %v6808_v44 }
 0x273   : > { %v6941_v56 = vpop.xlane.xlu1 %1594  ;;  %v6944_v46 = vmul.f32 %v5433_v10, %v6534_v61 }
 0x274   : > { %v3141_v5 = vadd.f32 1.1920929e-07, %v3109_v26  ;;  %1829 = vadd.xlane.f32.xlu0 %v1787_v50  ;;  %v1789_v50 = vmul.f32 %v6798_v41, %v6798_v41 }
 0x275   : > { %v6948_v45 = vpop.xlane.xlu0 %3033 }
 0x276   : > { %v5435_v52 = vpop.eup %5434  ;;  %5442 = vrsqrt.f32 %v3141_v5  ;;  %1835 = vadd.xlane.f32.xlu1 %v1790_v42 }
 0x277   : > { %v6952_v59 = vpop.xlane.xlu1 %1626  ;;  %v6955_v55 = vmul.f32 %v5435_v52, %v6544_v3  ;;  %v1792_v52 = vmul.f32 %v6820_v24, %v6820_v24 }
 0x278   : > { %v5437_v61 = vpop.eup %5436  ;;  %3271 = vadd.xlane.f32.xlu0 %v3229_v57 }
 0x279   : > { %v6959_v12 = vpop.xlane.xlu0 %1592  ;;  %v6962_v10 = vmul.f32 %v5437_v61, %v6536_v62  ;;  %v3231_v61 = vmul.f32 %v6802_v58, %v6802_v58 }
 0x27a   : > { %v5439_v26 = vpop.eup %5438  ;;  %3277 = vadd.xlane.f32.xlu1 %v3232_v51 }
 0x27b   : > { %v6966_v5 = vpop.xlane.xlu1 %3037  ;;  %v6969_v3 = vmul.f32 %v5439_v26, %v6546_v4  ;;  %v3234_v4 = vmul.f32 %v6824_v28, %v6824_v28 }
 0x27c   : > { %v5441_v42 = vpop.eup %5440  ;;  %1833 = vadd.xlane.f32.xlu0 %v1789_v50 }
 0x27d   : > { %v6973_v57 = vpop.xlane.xlu0 %1624  ;;  %v6976_v62 = vmul.f32 %v5441_v42, %v6540_v0  ;;  %v1791_v0 = vmul.f32 %v6814_v36, %v6814_v36 }
 0x27e   : > { %1839 = vadd.xlane.f32.xlu1 %v1792_v52  ;;  %v1794_v52 = vmul.f32 %v6836_v63, %v6836_v63 }
 0x27f   : > { %v6980_v51 = vpop.xlane.xlu1 %3069 }
 0x280   : > { %v5443_v44 = vpop.eup %5442  ;;  %3275 = vadd.xlane.f32.xlu0 %v3231_v61  ;;  %v3233_v61 = vmul.f32 %v6818_v18, %v6818_v18 }
 0x281   : > { %v6984_v26 = vpop.xlane.xlu0 %3035  ;;  %v6987_v50 = vmul.f32 %v5443_v44, %v6542_v1  ;;  %v3236_v1 = vmul.f32 %v6840_v27, %v6840_v27  ;;  %v3238_v27 = vmul.f32 %v6856_v19, %v6856_v19 }
 0x282   : > { %3281 = vadd.xlane.f32.xlu1 %v3234_v4  ;;  %v1793_v4 = vmul.f32 %v6830_v30, %v6830_v30 }
 0x283   : > { %v6991_v42 = vpop.xlane.xlu1 %1598 }
 0x284   : > { %1837 = vadd.xlane.f32.xlu0 %v1791_v0 }
 0x285   : > { %v6995_v58 = vpop.xlane.xlu0 %3067 }
 0x286   : > { %1843 = vadd.xlane.f32.xlu1 %v1794_v52  ;;  %v1796_v52 = vmul.f32 %v6852_v21, %v6852_v21 }
 0x287   : > { %v6999_v28 = vpop.xlane.xlu1 %1630 }
 0x288   : > { %3279 = vadd.xlane.f32.xlu0 %v3233_v61  ;;  %v3235_v61 = vmul.f32 %v6834_v29, %v6834_v29 }
 0x289   : > { %v7003_v44 = vpop.xlane.xlu0 %1596 }
 0x28a   : > { %3285 = vadd.xlane.f32.xlu1 %v3236_v1  ;;  %v1795_v1 = vmul.f32 %v6846_v31, %v6846_v31 }
 0x28b   : > { %v7007_v0 = vpop.xlane.xlu1 %3041 }
 0x28c   : > { %1841 = vadd.xlane.f32.xlu0 %v1793_v4  ;;  %v1798_v4 = vmul.f32 %v6868_v13, %v6868_v13 }
 0x28d   : > { %v7011_v63 = vpop.xlane.xlu0 %1628 }
 0x28e   : > { %1847 = vadd.xlane.f32.xlu1 %v1796_v52  ;;  %v3237_v52 = vmul.f32 %v6850_v9, %v6850_v9  ;;  %v1800_v9 = vmul.f32 %v6884_v25, %v6884_v25 }
 0x28f   : > { %v7015_v18 = vpop.xlane.xlu1 %3073 }
 0x290   : > { %3283 = vadd.xlane.f32.xlu0 %v3235_v61  ;;  %v3240_v61 = vmul.f32 %v6872_v34, %v6872_v34  ;;  %v3239_v34 = vmul.f32 %v6866_v14, %v6866_v14 }
 0x291   : > { %v7019_v30 = vpop.xlane.xlu0 %3039 }
 0x292   : > { %3289 = vadd.xlane.f32.xlu1 %v3238_v27  ;;  %v1797_v27 = vmul.f32 %v6862_v20, %v6862_v20 }
 0x293   : > { %v7023_v21 = vpop.xlane.xlu1 %1602 }
 0x294   : > { %1845 = vadd.xlane.f32.xlu0 %v1795_v1  ;;  %v1650_v1 = vmul.f32 0.0078125, %v6894_v48  ;;  %v1799_v48 = vmul.f32 %v6878_v2, %v6878_v2 }
 0x295   : > { %v7027_v29 = vpop.xlane.xlu0 %3071 }
 0x296   : > { %1851 = vadd.xlane.f32.xlu1 %v1798_v4  ;;  %v1682_v36 = vadd.f32 1.1920929e-07, %v1650_v1 }
 0x297   : > { %v7031_v19 = vpop.xlane.xlu1 %1634 }
 0x298   : > { %3287 = vadd.xlane.f32.xlu0 %v3237_v52  ;;  %5444 = vrsqrt.f32 %v1682_v36 }
 0x299   : > { %v7035_v31 = vpop.xlane.xlu0 %1600 }
 0x29a   : > { %3293 = vadd.xlane.f32.xlu1 %v3240_v61  ;;  %v3242_v61 = vmul.f32 %v6888_v37, %v6888_v37 }
 0x29b   : > { %v7039_v13 = vpop.xlane.xlu1 %3045 }
 0x29c   : > { %1849 = vadd.xlane.f32.xlu0 %v1797_v27 }
 0x29d   : > { %v7044_v4 = vpop.xlane.xlu0 %1632 }
 0x29e   : > { %1855 = vadd.xlane.f32.xlu1 %v1800_v9  ;;  %v3241_v9 = vmul.f32 %v6882_v39, %v6882_v39 }
 0x29f   : > { %v7048_v52 = vpop.xlane.xlu1 %3077 }
 0x2a0   : > { %9514 = vst [vmem:[#allocation127_spill] sm:$0xff] %v7048_v52  ;;  %3291 = vadd.xlane.f32.xlu0 %v3239_v34 }
 0x2a1   : > { %v7052_v20 = vpop.xlane.xlu0 %3043 }
 0x2a2   : > { %9515 = vst [vmem:[#allocation128_spill] sm:$0xff] %v7052_v20  ;;  %3297 = vadd.xlane.f32.xlu1 %v3242_v61  ;;  %v5445_v2 = vpop.eup %5444 }
 0x2a3   : > { %v7056_v27 = vpop.xlane.xlu1 %1606  ;;  %v7075_v36 = vmul.f32 %v5445_v2, %v6520_v54 }
 0x2a4   : > { %9516 = vst [vmem:[#allocation129_spill] sm:$0xff] %v7056_v27  ;;  %1853 = vadd.xlane.f32.xlu0 %v1799_v48  ;;  %v1534_v27 = vld [vmem:[%s6428_s15 + $0x80] sm:$0xff] }
 0x2a5   : > { %v7058_v25 = vpop.xlane.xlu0 %3075 }
 0x2a6   : > { %9517 = vst [vmem:[#allocation130_spill] sm:$0xff] %v7058_v25  ;;  %v1502_v25 = vld [vmem:[%s6421_s23 + $0x80] sm:$0xff] }
 0x2a7   : > { %v7062_v1 = vpop.xlane.xlu1 %1638 }
 0x2a8   : > { %9518 = vst [vmem:[#allocation131_spill] sm:$0xff] %v7062_v1  ;;  %3295 = vadd.xlane.f32.xlu0 %v3241_v9 }
 0x2a9   : > { %v7064_v37 = vpop.xlane.xlu0 %1604 }
 0x2aa   : > { %9519 = vst [vmem:[#allocation132_spill] sm:$0xff] %v7064_v37 }
 0x2ab   : > { %v7066_v34 = vpop.xlane.xlu1 %3049 }
 0x2ac   : > { %9520 = vst [vmem:[#allocation133_spill] sm:$0xff] %v7066_v34 }
 0x2ad   : > { %v7068_v14 = vpop.xlane.xlu0 %1636 }
 0x2ae   : > { %9521 = vst [vmem:[#allocation134_spill] sm:$0xff] %v7068_v14 }
 0x2af   : > { %v7070_v61 = vpop.xlane.xlu1 %3081 }
 0x2b0   : > { %9522 = vst [vmem:[#allocation135_spill] sm:$0xff] %v7070_v61 }
 0x2b1   : > { %v7072_v24 = vpop.xlane.xlu0 %3047 }
 0x2b2   : > { %9523 = vst [vmem:[#allocation136_spill] sm:$0xff] %v7072_v24  ;;  %v1802_v24 = vmul.f32 %v6908_v40, %v6908_v40 }
 0x2b3   : > { %v7077_v48 = vpop.xlane.xlu1 %1610  ;;  %2035 = vrot.lane.b32.xlu1 %v7075_v36, %s6070_s24 }
 0x2b4   : > { %9524 = vst [vmem:[#allocation137_spill] sm:$0xff] %v7077_v48 }
 0x2b5   : > { %v7081_v9 = vpop.xlane.xlu0 %3079 }
 0x2b6   : > { %9525 = vst [vmem:[#allocation138_spill] sm:$0xff] %v7081_v9 }
 0x2b7   : > { %v7083_v39 = vpop.xlane.xlu1 %1642  ;;  %2067 = vrot.lane.b32.xlu1 %v6906_v22, %s6070_s24 }
 0x2b8   : > { %9526 = vst [vmem:[#allocation139_spill] sm:$0xff] %v7083_v39 }
 0x2b9   : > { %v7087_v41 = vpop.xlane.xlu0 %1608 }
 0x2ba   : > { %9527 = vst [vmem:[#allocation140_spill] sm:$0xff] %v7087_v41 }
 0x2bb   : > { %v7089_v17 = vpop.xlane.xlu1 %3053 }
 0x2bc   : > { %9528 = vst [vmem:[#allocation141_spill] sm:$0xff] %v7089_v17  ;;  %v7109_v17 = vpop.f32.mrb[85].mxu1 }
 0x2bd   : > { %v7091_v47 = vpop.xlane.xlu0 %1640  ;;  %9536 = vst [vmem:[#allocation149_spill] sm:$0xff] %v7109_v17 }
 0x2be   : > { %9529 = vst [vmem:[#allocation142_spill] sm:$0xff] %v7091_v47  ;;  %2033 = vrot.lane.b32.xlu0 %v6897_v60, %s6070_s24  ;;  %v7111_v47 = vpop.f32.mrb[86].mxu1 }
 0x2bf   : > { %v7095_v54 = vpop.xlane.xlu1 %3085  ;;  %9537 = vst [vmem:[#allocation150_spill] sm:$0xff] %v7111_v47  ;;  %v7121_v9 = vpop.f32.mrb[87].mxu1 }
 0x2c0   : > { %9530 = vst [vmem:[#allocation143_spill] sm:$0xff] %v7095_v54  ;;  %9542 = vst [vmem:[#allocation155_spill] sm:$0xff] %v7121_v9 }
 0x2c1   : > { %v7097_v2 = vpop.xlane.xlu0 %3051 }
 0x2c2   : > { %9531 = vst [vmem:[#allocation144_spill] sm:$0xff] %v7097_v2  ;;  %2065 = vrot.lane.b32.xlu0 %v6915_v16, %s6070_s24 }
 0x2c3   : > { %v7101_v33 = vpop.xlane.xlu1 %1614 }
 0x2c4   : > { %9532 = vst [vmem:[#allocation145_spill] sm:$0xff] %v7101_v33 }
 0x2c5   : > { %v7103_v32 = vpop.xlane.xlu0 %3083 }
 0x2c6   : > { %9533 = vst [vmem:[#allocation146_spill] sm:$0xff] %v7103_v32 }
 0x2c7   : > { %v7107_v53 = vpop.xlane.xlu1 %1646 }
 0x2c8   : > { %9535 = vst [vmem:[#allocation148_spill] sm:$0xff] %v7107_v53 }
 0x2c9   : > { %v7113_v41 = vpop.xlane.xlu0 %1612 }
 0x2ca   : > { %9538 = vst [vmem:[#allocation151_spill] sm:$0xff] %v7113_v41 }
 0x2cb   : > { %v7115_v54 = vpop.xlane.xlu1 %3057 }
 0x2cc   : > { %9539 = vst [vmem:[#allocation152_spill] sm:$0xff] %v7115_v54 }
 0x2cd   : > { %v7117_v2 = vpop.xlane.xlu0 %1644 }
 0x2ce   : > { %9540 = vst [vmem:[#allocation153_spill] sm:$0xff] %v7117_v2 }
 0x2cf   : > { %v7119_v39 = vpop.xlane.xlu1 %3089 }
 0x2d0   : > { %9541 = vst [vmem:[#allocation154_spill] sm:$0xff] %v7119_v39  ;;  %v1801_v39 = vmul.f32 %v6899_v15, %v6899_v15 }
 0x2d1   : > { %v7123_v33 = vpop.xlane.xlu0 %3055 }
 0x2d2   : > { %9543 = vst [vmem:[#allocation156_spill] sm:$0xff] %v7123_v33 }
 0x2d3   : > { %v7125_v32 = vpop.xlane.xlu1 %1811 }
 0x2d4   : > { %9544 = vst [vmem:[#allocation157_spill] sm:$0xff] %v7125_v32 }
 0x2d5   : > { %v7127_v48 = vpop.xlane.xlu0 %3087 }
 0x2d6   : > { %9545 = vst [vmem:[#allocation158_spill] sm:$0xff] %v7127_v48 }
 0x2d7   : > { %v7129_v53 = vpop.xlane.xlu1 %3253 }
 0x2d8   : > { %9546 = vst [vmem:[#allocation159_spill] sm:$0xff] %v7129_v53 }
 0x2d9   : > { %v7133_v41 = vpop.xlane.xlu0 %1809 }
 0x2da   : > { %9547 = vst [vmem:[#allocation160_spill] sm:$0xff] %v7133_v41 }
 0x2db   : > { %1859 = vadd.xlane.f32.xlu1 %v1802_v24  ;;  %v7135_v54 = vpop.xlane.xlu1 %1815 }
 0x2dc   : > { %9548 = vst [vmem:[#allocation161_spill] sm:$0xff] %v7135_v54 }
 0x2dd   : > { %v7137_v2 = vpop.xlane.xlu0 %3251 }
 0x2de   : > { %9549 = vst [vmem:[#allocation162_spill] sm:$0xff] %v7137_v2 }
 0x2df   : > { %v7141_v33 = vpop.xlane.xlu1 %3257 }
 0x2e0   : > { %9550 = vst [vmem:[#allocation163_spill] sm:$0xff] %v7141_v33 }
 0x2e1   : > { %1857 = vadd.xlane.f32.xlu0 %v1801_v39  ;;  %v7143_v32 = vpop.xlane.xlu0 %1813 }
 0x2e2   : > { %9551 = vst [vmem:[#allocation164_spill] sm:$0xff] %v7143_v32 }
 0x2e3   : > { %v7145_v48 = vpop.xlane.xlu1 %1819 }
 0x2e4   : > { %9552 = vst [vmem:[#allocation165_spill] sm:$0xff] %v7145_v48 }
 0x2e5   : > { %v7147_v53 = vpop.xlane.xlu0 %3255 }
 0x2e6   : > { %9553 = vst [vmem:[#allocation166_spill] sm:$0xff] %v7147_v53 }
 0x2e7   : > { %v7149_v40 = vpop.xlane.xlu1 %3261 }
 0x2e8   : > { %9554 = vst [vmem:[#allocation167_spill] sm:$0xff] %v7149_v40 }
 0x2e9   : > { %v7151_v41 = vpop.xlane.xlu0 %1817 }
 0x2ea   : > { %9555 = vst [vmem:[#allocation168_spill] sm:$0xff] %v7151_v41 }
 0x2eb   : > { %v7153_v24 = vpop.xlane.xlu1 %1823 }
 0x2ec   : > { %9556 = vst [vmem:[#allocation169_spill] sm:$0xff] %v7153_v24  ;;  %3477 = vrot.lane.b32.xlu1 %v6920_v23, %s6070_s24 }
 0x2ed   : > { %v7157_v2 = vpop.xlane.xlu0 %3259 }
 0x2ee   : > { %9557 = vst [vmem:[#allocation170_spill] sm:$0xff] %v7157_v2 }
 0x2ef   : > { %v7159_v15 = vpop.xlane.xlu1 %3265 }
 0x2f0   : > { %9558 = vst [vmem:[#allocation171_spill] sm:$0xff] %v7159_v15  ;;  %3509 = vrot.lane.b32.xlu1 %v6932_v7, %s6070_s24 }
 0x2f1   : > { %v7163_v39 = vpop.xlane.xlu0 %1821 }
 0x2f2   : > { %9559 = vst [vmem:[#allocation172_spill] sm:$0xff] %v7163_v39 }
 0x2f3   : > { %v7165_v48 = vpop.xlane.xlu1 %1827 }
 0x2f4   : > { %9560 = vst [vmem:[#allocation173_spill] sm:$0xff] %v7165_v48 }
 0x2f5   : > { %v7167_v53 = vpop.xlane.xlu0 %3263 }
 0x2f6   : > { %9561 = vst [vmem:[#allocation174_spill] sm:$0xff] %v7167_v53 }
 0x2f7   : > { %3475 = vrot.lane.b32.xlu0 %v6925_v49, %s6070_s24  ;;  %v7171_v24 = vpop.xlane.xlu1 %3269 }
 0x2f8   : > { %9562 = vst [vmem:[#allocation175_spill] sm:$0xff] %v7171_v24 }
 0x2f9   : > { %v7173_v41 = vpop.xlane.xlu0 %1825 }
 0x2fa   : > { %9563 = vst [vmem:[#allocation176_spill] sm:$0xff] %v7173_v41 }
 0x2fb   : > { %3507 = vrot.lane.b32.xlu0 %v6937_v8, %s6070_s24  ;;  %v7177_v15 = vpop.xlane.xlu1 %1831 }
 0x2fc   : > { %9564 = vst [vmem:[#allocation177_spill] sm:$0xff] %v7177_v15 }
 0x2fd   : > { %v7179_v2 = vpop.xlane.xlu0 %3267 }
 0x2fe   : > { %9565 = vst [vmem:[#allocation178_spill] sm:$0xff] %v7179_v2 }
 0x2ff   : > { %v7181_v40 = vpop.xlane.xlu1 %3273 }
 0x300   : > { %9566 = vst [vmem:[#allocation179_spill] sm:$0xff] %v7181_v40  ;;  %v3244_v40 = vmul.f32 %v6912_v43, %v6912_v43 }
 0x301   : > { %v7183_v39 = vpop.xlane.xlu0 %1829 }
 0x302   : > { %9567 = vst [vmem:[#allocation180_spill] sm:$0xff] %v7183_v39 }
 0x303   : > { %v7185_v48 = vpop.xlane.xlu1 %1835 }
 0x304   : > { %9568 = vst [vmem:[#allocation181_spill] sm:$0xff] %v7185_v48 }
 0x305   : > { %v7187_v53 = vpop.xlane.xlu0 %3271 }
 0x306   : > { %9569 = vst [vmem:[#allocation182_spill] sm:$0xff] %v7187_v53 }
 0x307   : > { %v7189_v32 = vpop.xlane.xlu1 %3277 }
 0x308   : > { %9570 = vst [vmem:[#allocation183_spill] sm:$0xff] %v7189_v32  ;;  %v1486_v32 = vld [vmem:[%s6421_s23] sm:$0xff] }
 0x309   : > { %v7191_v24 = vpop.xlane.xlu0 %1833 }
 0x30a   : > { %9571 = vst [vmem:[#allocation184_spill] sm:$0xff] %v7191_v24  ;;  %v3243_v24 = vmul.f32 %v6903_v11, %v6903_v11 }
 0x30b   : > { %v7193_v41 = vpop.xlane.xlu1 %1839 }
 0x30c   : > { %9572 = vst [vmem:[#allocation185_spill] sm:$0xff] %v7193_v41 }
 0x30d   : > { %v7195_v33 = vpop.xlane.xlu0 %3275 }
 0x30e   : > { %9573 = vst [vmem:[#allocation186_spill] sm:$0xff] %v7195_v33 }
 0x30f   : > { %v7197_v54 = vpop.xlane.xlu1 %3281 }
 0x310   : > { %9574 = vst [vmem:[#allocation187_spill] sm:$0xff] %v7197_v54 }
 0x311   : > { %v7199_v15 = vpop.xlane.xlu0 %1837 }
 0x312   : > { %9575 = vst [vmem:[#allocation188_spill] sm:$0xff] %v7199_v15 }
 0x313   : > { %v7203_v39 = vpop.xlane.xlu1 %1843 }
 0x314   : > { %9576 = vst [vmem:[#allocation189_spill] sm:$0xff] %v7203_v39  ;;  %3301 = vadd.xlane.f32.xlu1 %v3244_v40 }
 0x315   : > { %v7205_v48 = vpop.xlane.xlu0 %3279 }
 0x316   : > { %9577 = vst [vmem:[#allocation190_spill] sm:$0xff] %v7205_v48 }
 0x317   : > { %v7207_v53 = vpop.xlane.xlu1 %3285 }
 0x318   : > { %9578 = vst [vmem:[#allocation191_spill] sm:$0xff] %v7207_v53 }
 0x319   : > { %v7211_v41 = vpop.xlane.xlu0 %1841 }
 0x31a   : > { %9579 = vst [vmem:[#allocation192_spill] sm:$0xff] %v7211_v41  ;;  %3299 = vadd.xlane.f32.xlu0 %v3243_v24  ;;  %v1503_v41 = vld [vmem:[%s6421_s23 + $0x88] sm:$0xff] }
 0x31b   : > { %v7213_v33 = vpop.xlane.xlu1 %1847  ;;  %v2018_v61 = vmul.f32 %v6906_v22, %v1503_v41 }
 0x31c   : > { %9580 = vst [vmem:[#allocation193_spill] sm:$0xff] %v7213_v33 }
 0x31d   : > { %v7215_v54 = vpop.xlane.xlu0 %3283 }
 0x31e   : > { %9581 = vst [vmem:[#allocation194_spill] sm:$0xff] %v7215_v54 }
 0x31f   : > { %v7217_v15 = vpop.xlane.xlu1 %3289 }
 0x320   : > { %9582 = vst [vmem:[#allocation195_spill] sm:$0xff] %v7217_v15 }
 0x321   : > { %v7219_v43 = vpop.xlane.xlu0 %1845 }
 0x322   : > { %9583 = vst [vmem:[#allocation196_spill] sm:$0xff] %v7219_v43 }
 0x323   : > { %v7221_v40 = vpop.xlane.xlu1 %1851 }
 0x324   : > { %9584 = vst [vmem:[#allocation197_spill] sm:$0xff] %v7221_v40  ;;  %v1487_v40 = vld [vmem:[%s6421_s23 + $0x8] sm:$0xff] }
 0x325   : > { %v7223_v48 = vpop.xlane.xlu0 %3287  ;;  %2037 = vrot.lane.b32.xlu1 %v6944_v46, %s6070_s24 }
 0x326   : > { %9585 = vst [vmem:[#allocation198_spill] sm:$0xff] %v7223_v48 }
 0x327   : > { %v7227_v11 = vpop.xlane.xlu1 %3293 }
 0x328   : > { %9586 = vst [vmem:[#allocation199_spill] sm:$0xff] %v7227_v11 }
 0x329   : > { %v7229_v24 = vpop.xlane.xlu0 %1849  ;;  %3479 = vrot.lane.b32.xlu1 %v6976_v62, %s6070_s24 }
 0x32a   : > { %9587 = vst [vmem:[#allocation200_spill] sm:$0xff] %v7229_v24  ;;  %v1519_v24 = vld [vmem:[%s6428_s15 + $0x8] sm:$0xff] }
 0x32b   : > { %v7233_v15 = vpop.xlane.xlu1 %1855 }
 0x32c   : > { %9588 = vst [vmem:[#allocation201_spill] sm:$0xff] %v7233_v15 }
 0x32d   : > { %v7235_v54 = vpop.xlane.xlu0 %3291  ;;  %2039 = vrot.lane.b32.xlu1 %v6955_v55, %s6070_s24 }
 0x32e   : > { %9589 = vst [vmem:[#allocation202_spill] sm:$0xff] %v7235_v54  ;;  %v2002_v54 = vmul.f32 %v7075_v36, %v1487_v40 }
 0x32f   : > { %v7239_v48 = vpop.xlane.xlu1 %3297 }
 0x330   : > { %9590 = vst [vmem:[#allocation203_spill] sm:$0xff] %v7239_v48  ;;  %2069 = vrot.lane.b32.xlu0 %v6962_v10, %s6070_s24  ;;  %v1535_v48 = vld [vmem:[%s6428_s15 + $0x88] sm:$0xff] }
 0x331   : > { %v7243_v11 = vpop.xlane.xlu0 %1853  ;;  %2071 = vrot.lane.b32.xlu1 %v6969_v3, %s6070_s24 }
 0x332   : > { %9591 = vst [vmem:[#allocation204_spill] sm:$0xff] %v7243_v11  ;;  %v1518_v11 = vld [vmem:[%s6428_s15] sm:$0xff] }
 0x333   : > { %v2036_v15 = vpop.permute.xlu1 %2035 }
 0x334   : > { %v2098_v43 = vmul.f32 %v2036_v15, %v1519_v24  ;;  %v2001_v15 = vmul.f32 %v6897_v60, %v1486_v32  ;;  %v2017_v60 = vmul.f32 %v6915_v16, %v1502_v25  ;;  %v3110_v16 = vmul.f32 0.0078125, %v6929_v35 }
 0x335   : > { %v7250_v33 = vpop.xlane.xlu0 %3295 }
 0x336   : > { %9592 = vst [vmem:[#allocation205_spill] sm:$0xff] %v7250_v33  ;;  %v2130_v53 = vadd.f32 %v2098_v43, %v2002_v54  ;;  %v7258_v33 = vpop.f32.mrb[88].mxu1 }
 0x337   : > { %v2068_v39 = vpop.permute.xlu1 %2067  ;;  %9593 = vst [vmem:[#allocation206_spill] sm:$0xff] %v7258_v33  ;;  %v7266_v54 = vpop.f32.mrb[89].mxu1 }
 0x338   : > { %v2162_v2 = vmul.f32 0.12, %v2130_v53  ;;  %v2114_v14 = vmul.f32 %v2068_v39, %v1535_v48  ;;  %9594 = vst [vmem:[#allocation207_spill] sm:$0xff] %v7266_v54 }
 0x339   : > { %v2034_v34 = vpop.permute.xlu0 %2033 }
 0x33a   : > { %v5015_v37 = vpack.c.bf16 %v2162_v2, %v2162_v2  ;;  %v2146_v1 = vadd.f32 %v2114_v14, %v2018_v61  ;;  %v2097_v36 = vmul.f32 %v2034_v34, %v1518_v11  ;;  %v7269_v2 = vpop.f32.mrb[90].mxu1 }
 0x33b   : > { %9595 = vst [vmem:[#allocation208_spill] sm:$0xff] %v7269_v2  ;;  %v7271_v39 = vpop.f32.mrb[91].mxu1 }
 0x33c   : > { %2644 = vst [vmem:[%s7263_s0 + $0x8] sm:$0xf] %v5015_v37  ;;  %v2178_v53 = vmul.f32 0.12, %v2146_v1  ;;  %v2129_v22 = vadd.f32 %v2097_v36, %v2001_v15  ;;  %9596 = vst [vmem:[#allocation209_spill] sm:$0xff] %v7271_v39  ;;  %v1803_v15 = vmul.f32 %v7105_v38, %v7105_v38  ;;  %v3094_v36 = vmul.f32 0.0078125, %v6948_v45 }
 0x33d   : > { %v2066_v43 = vpop.permute.xlu0 %2065  ;;  %v9597_v45 = vld [vmem:[#allocation26_spill] sm:$0xff] }
 0x33e   : > { %v5031_v14 = vpack.c.bf16 %v2178_v53, %v2178_v53  ;;  %v2161_v61 = vmul.f32 0.12, %v2129_v22  ;;  %v2113_v34 = vmul.f32 %v2066_v43, %v1534_v27  ;;  %v3126_v53 = vadd.f32 1.1920929e-07, %v3094_v36  ;;  %v9727_v38 = vld [vmem:[#allocation74_spill] sm:$0xff] }
 0x33f   : > { %v1804_v22 = vmul.f32 %v7111_v47, %v7111_v47  ;;  %v3142_v43 = vadd.f32 1.1920929e-07, %v3110_v16  ;;  %v3460_v16 = vmul.f32 %v6932_v7, %v1503_v41 }
 0x340   : > { %2660 = vst [vmem:[%s7263_s0 + $0x88] sm:$0xf] %v5031_v14  ;;  %v5014_v20 = vpack.c.bf16 %v2161_v61, %v2161_v61  ;;  %v2145_v52 = vadd.f32 %v2113_v34, %v2017_v60  ;;  %5446 = vrsqrt.f32 %v3126_v53 }
 0x341   : > { %5448 = vrsqrt.f32 %v3142_v43 }
 0x342   : > { %2643 = vst [vmem:[%s7263_s0] sm:$0xf] %v5014_v20  ;;  %v2177_v37 = vmul.f32 0.12, %v2145_v52 }
 0x344   : > { %v5030_v1 = vpack.c.bf16 %v2177_v37, %v2177_v37 }
 0x346   : > { %2659 = vst [vmem:[%s7263_s0 + $0x80] sm:$0xf] %v5030_v1 }
 0x34a   : > { %v5447_v20 = vpop.eup %5446 }
 0x34b   : > { %v7283_v52 = vmul.f32 %v5447_v20, %v6550_v6  ;;  %v5449_v14 = vpop.eup %5448  ;;  %v3444_v6 = vmul.f32 %v6920_v23, %v1487_v40 }
 0x34c   : > { %v7292_v61 = vmul.f32 %v5449_v14, %v9597_v45  ;;  %v3443_v14 = vmul.f32 %v6925_v49, %v1486_v32  ;;  %v3245_v32 = vmul.f32 %v7109_v17, %v7109_v17 }
 0x34f   : > { %1861 = vadd.xlane.f32.xlu0 %v1803_v15 }
 0x355   : > { %1863 = vadd.xlane.f32.xlu1 %v1804_v22 }
 0x365   : > { %3511 = vrot.lane.b32.xlu0 %v6987_v50, %s6070_s24 }
 0x366   : > { %3481 = vrot.lane.b32.xlu1 %v7283_v52, %s6070_s24 }
 0x368   : > { %v7289_v35 = vpop.xlane.xlu1 %1859 }
 0x36a   : > { %3513 = vrot.lane.b32.xlu1 %v7292_v61, %s6070_s24 }
 0x36c   : > { %v3478_v60 = vpop.permute.xlu1 %3477 }
 0x36d   : > { %v3540_v34 = vmul.f32 %v3478_v60, %v1519_v24 }
 0x36e   : > { %v7297_v37 = vpop.xlane.xlu0 %1857 }
 0x36f   : > { %v3572_v1 = vadd.f32 %v3540_v34, %v3444_v6  ;;  %v3459_v34 = vmul.f32 %v6937_v8, %v1502_v25 }
 0x370   : > { %v3510_v15 = vpop.permute.xlu1 %3509 }
 0x371   : > { %v3604_v36 = vmul.f32 0.12, %v3572_v1  ;;  %v3556_v53 = vmul.f32 %v3510_v15, %v1535_v48 }
 0x372   : > { %v3476_v22 = vpop.permute.xlu0 %3475 }
 0x373   : > { %v5111_v43 = vpack.c.bf16 %v3604_v36, %v3604_v36  ;;  %v3588_v20 = vadd.f32 %v3556_v53, %v3460_v16  ;;  %v3539_v45 = vmul.f32 %v3476_v22, %v1518_v11  ;;  %v1653_v11 = vmul.f32 0.0078125, %v6959_v12 }
 0x374   : > { %v1669_v36 = vmul.f32 0.0078125, %v6973_v57  ;;  %v1654_v16 = vmul.f32 0.0078125, %v6941_v56  ;;  %v3246_v53 = vmul.f32 %v7121_v9, %v7121_v9  ;;  %v7787_v9 = vld [vmem:[%s6428_s15 + $0xb0] sm:$0xff] }
 0x375   : > { %4084 = vst [vmem:[%s7263_s0 + $0xc] sm:$0xf] %v5111_v43  ;;  %v3620_v23 = vmul.f32 0.12, %v3588_v20  ;;  %v3571_v40 = vadd.f32 %v3539_v45, %v3443_v14  ;;  %v1685_v49 = vadd.f32 1.1920929e-07, %v1653_v11  ;;  %v9598_v43 = vld [vmem:[#allocation27_spill] sm:$0xff] }
 0x376   : > { %v3508_v24 = vpop.permute.xlu0 %3507  ;;  %v1701_v25 = vadd.f32 1.1920929e-07, %v1669_v36  ;;  %v1686_v8 = vadd.f32 1.1920929e-07, %v1654_v16  ;;  %v9600_v45 = vld [vmem:[#allocation31_spill] sm:$0xff]  ;;  %v7345_v36 = vld [vmem:[%s6428_s15 + $0x90] sm:$0xff] }
 0x377   : > { %v5127_v60 = vpack.c.bf16 %v3620_v23, %v3620_v23  ;;  %v3603_v6 = vmul.f32 0.12, %v3571_v40  ;;  %v3555_v1 = vmul.f32 %v3508_v24, %v1534_v27  ;;  %5450 = vrsqrt.f32 %v1685_v49  ;;  %v7342_v49 = vld [vmem:[%s6421_s23 + $0x90] sm:$0xff] }
 0x378   : > { %v1670_v27 = vmul.f32 0.0078125, %v6952_v59  ;;  %5452 = vrsqrt.f32 %v1701_v25  ;;  %v9599_v59 = vld [vmem:[#allocation28_spill] sm:$0xff] }
 0x379   : > { %4100 = vst [vmem:[%s7263_s0 + $0x8c] sm:$0xf] %v5127_v60  ;;  %v5110_v41 = vpack.c.bf16 %v3603_v6, %v3603_v6  ;;  %v3587_v7 = vadd.f32 %v3555_v1, %v3459_v34  ;;  %5454 = vrsqrt.f32 %v1686_v8  ;;  %v9601_v60 = vld [vmem:[#allocation32_spill] sm:$0xff] }
 0x37a   : > { %v1702_v22 = vadd.f32 1.1920929e-07, %v1670_v27  ;;  %v1488_v34 = vld [vmem:[%s6421_s23 + $0x10] sm:$0xff] }
 0x37b   : > { %4083 = vst [vmem:[%s7263_s0 + $0x4] sm:$0xf] %v5110_v41  ;;  %v3619_v48 = vmul.f32 0.12, %v3587_v7  ;;  %v1520_v1 = vld [vmem:[%s6428_s15 + $0x10] sm:$0xff]  ;;  %v2003_v7 = vmul.f32 %v6944_v46, %v1488_v34  ;;  %v3445_v25 = vmul.f32 %v6976_v62, %v1488_v34  ;;  %v7352_v46 = vld [vmem:[%s6428_s15 + $0x18] sm:$0xff] }
 0x37c   : > { %5456 = vrsqrt.f32 %v1702_v22  ;;  %v7364_v34 = vld [vmem:[%s6421_s23 + $0x98] sm:$0xff] }
 0x37d   : > { %v5126_v15 = vpack.c.bf16 %v3619_v48, %v3619_v48 }
 0x37f   : > { %4099 = vst [vmem:[%s7263_s0 + $0x84] sm:$0xf] %v5126_v15 }
 0x381   : > { %v5451_v12 = vpop.eup %5450 }
 0x382   : > { %v7315_v57 = vmul.f32 %v5451_v12, %v9598_v43  ;;  %v5453_v56 = vpop.eup %5452  ;;  %v2019_v43 = vmul.f32 %v6962_v10, %v7342_v49  ;;  %v5396_v10 = vld [vmem:[#allocation6 + $0x14] ss:$24 sps:$4 sm:$0xff]  }
 0x383   : > { %v5455_v20 = vpop.eup %5454  ;;  %v7320_v14 = vmul.f32 %v5453_v56, %v9599_v59  ;;  %1293 = vmatprep.subr.bf16.mxu0 %v5396_v10  ;;  %v5400_v10 = vld [vmem:[#allocation6 + $0x70] ss:$24 sps:$4 sm:$0xff]  }
 0x384   : > { %3303 = vadd.xlane.f32.xlu0 %v3245_v32  ;;  %v7323_v23 = vmul.f32 %v5455_v20, %v9600_v45  ;;  %v7357_v20 = vpop.f32.mrb[92].mxu1 }
 0x385   : > { %9602 = vst [vmem:[#allocation26_spill] sm:$0xff] %v7357_v20 }
 0x386   : > { %v5457_v40 = vpop.eup %5456 }
 0x387   : > { %v7332_v6 = vmul.f32 %v5457_v40, %v9601_v60 }
 0x38e   : > { %3305 = vadd.xlane.f32.xlu1 %v3246_v53  ;;  %v7349_v53 = vld [vmem:[%s6421_s23 + $0x18] sm:$0xff] }
 0x38f   : > { %v2004_v40 = vmul.f32 %v6955_v55, %v7349_v53 }
 0x39a   : > { %2041 = vrot.lane.b32.xlu0 %v7315_v57, %s6070_s24 }
 0x39e   : > { %2073 = vrot.lane.b32.xlu0 %v7320_v14, %s6070_s24 }
 0x39f   : > { %2043 = vrot.lane.b32.xlu1 %v7323_v23, %s6070_s24 }
 0x3a1   : > { %v7329_v24 = vpop.xlane.xlu1 %3301 }
 0x3a3   : > { %2075 = vrot.lane.b32.xlu1 %v7332_v6, %s6070_s24 }
 0x3a5   : > { %v2038_v41 = vpop.permute.xlu1 %2037 }
 0x3a6   : > { %v2099_v48 = vmul.f32 %v2038_v41, %v1520_v1  ;;  %v5394_v41 = vld [vmem:[#allocation6 + $0x10] ss:$24 sps:$4 sm:$0xff]  }
 0x3a7   : > { %v7339_v15 = vpop.xlane.xlu0 %3299  ;;  %1294 = vmatpush1.bf16.msra.mxu0 %v5394_v41 }
 0x3a8   : > { %v2131_v32 = vadd.f32 %v2099_v48, %v2003_v7  ;;  %v7369_v7 = vpop.f32.mrb[93].mxu1 }
 0x3a9   : > { %v3480_v11 = vpop.permute.xlu1 %3479  ;;  %9603 = vst [vmem:[#allocation27_spill] sm:$0xff] %v7369_v7 }
 0x3aa   : > { %v2163_v16 = vmul.f32 0.12, %v2131_v32  ;;  %v3541_v8 = vmul.f32 %v3480_v11, %v1520_v1  ;;  %v7367_v1 = vld [vmem:[%s6428_s15 + $0x98] sm:$0xff] }
 0x3ab   : > { %v2070_v27 = vpop.permute.xlu0 %2069 }
 0x3ac   : > { %v5016_v22 = vpack.c.bf16 %v2163_v16, %v2163_v16  ;;  %v3573_v12 = vadd.f32 %v3541_v8, %v3445_v25  ;;  %v2115_v56 = vmul.f32 %v2070_v27, %v7345_v36  ;;  %v7371_v16 = vpop.f32.mrb[94].mxu1  ;;  %v5399_v8 = vld [vmem:[#allocation6 + $0x44] ss:$24 sps:$4 sm:$0xff]  }
 0x3ad   : > { %v2040_v59 = vpop.permute.xlu1 %2039  ;;  %9604 = vst [vmem:[#allocation28_spill] sm:$0xff] %v7371_v16  ;;  %v7373_v55 = vpop.f32.mrb[95].mxu1  ;;  %1295 = vmatprep.subr.bf16.mxu0 %v5399_v8 }
 0x3ae   : > { %2645 = vst [vmem:[%s7263_s0 + $0x10] sm:$0xf] %v5016_v22  ;;  %v3605_v62 = vmul.f32 0.12, %v3573_v12  ;;  %v2147_v45 = vadd.f32 %v2115_v56, %v2019_v43  ;;  %v2100_v60 = vmul.f32 %v2040_v59, %v7352_v46  ;;  %9605 = vst [vmem:[#allocation31_spill] sm:$0xff] %v7373_v55  ;;  %v2020_v12 = vmul.f32 %v6969_v3, %v7364_v34 }
 0x3af   : > { %v5397_v56 = vld [vmem:[#allocation6 + $0x40] ss:$24 sps:$4 sm:$0xff]   ;;  %v3095_v3 = vmul.f32 0.0078125, %v6984_v26 }
 0x3b0   : > { %v5112_v48 = vpack.c.bf16 %v3605_v62, %v3605_v62  ;;  %v2179_v32 = vmul.f32 0.12, %v2147_v45  ;;  %v2132_v11 = vadd.f32 %v2100_v60, %v2004_v40  ;;  %1296 = vmatpush1.bf16.msra.mxu0 %v5397_v56  ;;  %v1805_v60 = vmul.f32 %v7258_v33, %v7258_v33  ;;  %v9606_v56 = vld [vmem:[#allocation29_spill] sm:$0xff] }
 0x3b1   : > { %v2072_v25 = vpop.permute.xlu1 %2071  ;;  %v3127_v41 = vadd.f32 1.1920929e-07, %v3095_v3  ;;  %v5408_v3 = vld [vmem:[#allocation6 + $0xd4] ss:$24 sps:$4 sm:$0xff]  }
 0x3b2   : > { %4085 = vst [vmem:[%s7263_s0 + $0x14] sm:$0xf] %v5112_v48  ;;  %v5032_v27 = vpack.c.bf16 %v2179_v32, %v2179_v32  ;;  %v2164_v22 = vmul.f32 0.12, %v2132_v11  ;;  %v2116_v43 = vmul.f32 %v2072_v25, %v7367_v1  ;;  %v5402_v48 = vld [vmem:[#allocation6 + $0x74] ss:$24 sps:$4 sm:$0xff]  }
 0x3b3   : > { %1297 = vmatprep.subr.bf16.mxu0 %v5402_v48  ;;  %v3111_v32 = vmul.f32 0.0078125, %v6995_v58  ;;  %v3096_v11 = vmul.f32 0.0078125, %v6966_v5  ;;  %5458 = vrsqrt.f32 %v3127_v41  ;;  %v5406_v48 = vld [vmem:[#allocation6 + $0xd0] ss:$24 sps:$4 sm:$0xff]   ;;  %v9609_v41 = vld [vmem:[#allocation34_spill] sm:$0xff] }
 0x3b4   : > { %2661 = vst [vmem:[%s7263_s0 + $0x90] sm:$0xf] %v5032_v27  ;;  %v5017_v59 = vpack.c.bf16 %v2164_v22, %v2164_v22  ;;  %v2148_v62 = vadd.f32 %v2116_v43, %v2020_v12  ;;  %1298 = vmatpush1.bf16.msra.mxu0 %v5400_v10  ;;  %v3112_v27 = vmul.f32 0.0078125, %v6980_v51  ;;  %v1806_v22 = vmul.f32 %v7269_v2, %v7269_v2  ;;  %v5403_v12 = vld [vmem:[#allocation6 + $0xa0] ss:$24 sps:$4 sm:$0xff]  }
 0x3b5   : > { %v3143_v25 = vadd.f32 1.1920929e-07, %v3111_v32  ;;  %v3128_v8 = vadd.f32 1.1920929e-07, %v3096_v11  ;;  %v5405_v43 = vld [vmem:[#allocation6 + $0xa4] ss:$24 sps:$4 sm:$0xff]  }
 0x3b6   : > { %2646 = vst [vmem:[%s7263_s0 + $0x18] sm:$0xf] %v5017_v59  ;;  %v2180_v45 = vmul.f32 0.12, %v2148_v62  ;;  %1299 = vmatprep.subr.bf16.mxu0 %v5405_v43  ;;  %v3144_v26 = vadd.f32 1.1920929e-07, %v3112_v27  ;;  %v9607_v51 = vld [vmem:[#allocation30_spill] sm:$0xff] }
 0x3b7   : > { %5460 = vrsqrt.f32 %v3143_v25 }
 0x3b8   : > { %v5033_v40 = vpack.c.bf16 %v2180_v45, %v2180_v45  ;;  %1300 = vmatpush1.bf16.msra.mxu0 %v5403_v12  ;;  %5462 = vrsqrt.f32 %v3128_v8  ;;  %v3461_v8 = vmul.f32 %v6987_v50, %v7342_v49  ;;  %v5411_v12 = vld [vmem:[#allocation6 + $0x104] ss:$24 sps:$4 sm:$0xff]  }
 0x3b9   : > { %5464 = vrsqrt.f32 %v3144_v26  ;;  %1301 = vmatprep.subr.bf16.mxu0 %v5408_v3  ;;  %v5417_v49 = vld [vmem:[#allocation6 + $0x164] ss:$24 sps:$4 sm:$0xff]  }
 0x3ba   : > { %2662 = vst [vmem:[%s7263_s0 + $0x98] sm:$0xf] %v5033_v40  ;;  %v9608_v40 = vld [vmem:[#allocation33_spill] sm:$0xff] }
 0x3bc   : > { %1302 = vmatpush1.bf16.msra.mxu0 %v5406_v48 }
 0x3bd   : > { %1865 = vadd.xlane.f32.xlu0 %v1805_v60  ;;  %v5459_v58 = vpop.eup %5458  ;;  %1303 = vmatprep.subr.bf16.mxu0 %v5411_v12  ;;  %v3247_v12 = vmul.f32 %v7266_v54, %v7266_v54  ;;  %v9693_v54 = vld [vmem:[#allocation158_spill] sm:$0xff] }
 0x3be   : > { %v7391_v5 = vmul.f32 %v5459_v58, %v9606_v56  ;;  %v5412_v56 = vld [vmem:[#allocation6 + $0x130] ss:$24 sps:$4 sm:$0xff]  }
 0x3c1   : > { %v5461_v59 = vpop.eup %5460 }
 0x3c2   : > { %v5463_v62 = vpop.eup %5462  ;;  %v7396_v45 = vmul.f32 %v5461_v59, %v9607_v51 }
 0x3c3   : > { %v7399_v60 = vmul.f32 %v5463_v62, %v9608_v40  ;;  %v5465_v10 = vpop.eup %5464  ;;  %v5414_v62 = vld [vmem:[#allocation6 + $0x134] ss:$24 sps:$4 sm:$0xff]   ;;  %v3446_v40 = vmul.f32 %v7283_v52, %v7349_v53 }
 0x3c4   : > { %v7406_v32 = vmul.f32 %v5465_v10, %v9609_v41  ;;  %v5415_v10 = vld [vmem:[#allocation6 + $0x160] ss:$24 sps:$4 sm:$0xff]   ;;  %v3462_v41 = vmul.f32 %v7292_v61, %v7364_v34  ;;  %v5675_v61 = vld [vmem:[%s6407_s20 + $0x8] sm:$0xff]  }
 0x3c7   : > { %1867 = vadd.xlane.f32.xlu1 %v1806_v22  ;;  %v5409_v22 = vld [vmem:[#allocation6 + $0x100] ss:$24 sps:$4 sm:$0xff]  }
 0x3c8   : > { %1304 = vmatpush1.bf16.msra.mxu0 %v5409_v22  ;;  %v9610_v22 = vmov 0  }
 0x3c9   : > { %1305 = vmatprep.subr.bf16.mxu0 %v5414_v62  ;;  %v1672_v62 = vmul.f32 0.0078125, %v6999_v28  ;;  %v9611_v28 = vld [vmem:[#allocation35_spill] sm:$0xff] }
 0x3cc   : > { %1306 = vmatpush1.bf16.msra.mxu0 %v5412_v56 }
 0x3cd   : > { %1307 = vmatprep.subr.bf16.mxu0 %v5417_v49 }
 0x3d0   : > { %1308 = vmatpush1.bf16.msra.mxu0 %v5415_v10  ;;  %v9612_v10 = vld [vmem:[#allocation36_spill] sm:$0xff] }
 0x3d3   : > { %3483 = vrot.lane.b32.xlu0 %v7391_v5, %s6070_s24 }
 0x3d7   : > { %3515 = vrot.lane.b32.xlu0 %v7396_v45, %s6070_s24 }
 0x3d8   : > { %3485 = vrot.lane.b32.xlu1 %v7399_v60, %s6070_s24 }
 0x3dc   : > { %v7408_v11 = vpop.xlane.xlu0 %1861  ;;  %3517 = vrot.lane.b32.xlu1 %v7406_v32, %s6070_s24 }
 0x3e0   : > { %v3512_v25 = vpop.permute.xlu0 %3511 }
 0x3e1   : > { %v3557_v27 = vmul.f32 %v3512_v25, %v7345_v36 }
 0x3e2   : > { %v7415_v43 = vpop.xlane.xlu1 %1863 }
 0x3e3   : > { %v3589_v26 = vadd.f32 %v3557_v27, %v3461_v8  ;;  %v5674_v8 = vld [vmem:[%s6407_s20] sm:$0xff]  }
 0x3e4   : > { %1326 = vmatmul.mubr.bf16.vlgmr.msra.gmra.mrb[32].mxu0 %v5674_v8  ;;  %v7465_v8 = vld [vmem:[%s6428_s15 + $0x20] sm:$0xff] }
 0x3e5   : > { %v3621_v58 = vmul.f32 0.12, %v3589_v26  ;;  %1335 = vmatprep.mubr.bf16.mxu0 %v9610_v22  ;;  %v1655_v26 = vmul.f32 0.0078125, %v7003_v44  ;;  %v5676_v44 = vld [vmem:[%s6407_s20 + $0x10] sm:$0xff]  }
 0x3e6   : > { %v3482_v59 = vpop.permute.xlu1 %3481 }
 0x3e7   : > { %v5128_v51 = vpack.c.bf16 %v3621_v58, %v3621_v58  ;;  %v3542_v50 = vmul.f32 %v3482_v59, %v7352_v46  ;;  %v1687_v34 = vadd.f32 1.1920929e-07, %v1655_v26  ;;  %v1656_v58 = vmul.f32 0.0078125, %v6991_v42  ;;  %v5677_v42 = vld [vmem:[%s6407_s20 + $0x18] sm:$0xff]  }
 0x3e9   : > { %4101 = vst [vmem:[%s7263_s0 + $0x94] sm:$0xf] %v5128_v51  ;;  %v3574_v36 = vadd.f32 %v3542_v50, %v3446_v40  ;;  %5466 = vrsqrt.f32 %v1687_v34  ;;  %v1688_v59 = vadd.f32 1.1920929e-07, %v1656_v58  ;;  %v3248_v51 = vmul.f32 %v7271_v39, %v7271_v39  ;;  %v7479_v58 = vld [vmem:[%s6428_s15 + $0xa0] sm:$0xff] }
 0x3ea   : > { %v3514_v48 = vpop.permute.xlu1 %3513 }
 0x3eb   : > { %v3606_v3 = vmul.f32 0.12, %v3574_v36  ;;  %v3558_v52 = vmul.f32 %v3514_v48, %v7367_v1  ;;  %v1671_v1 = vmul.f32 0.0078125, %v7011_v63  ;;  %v1704_v63 = vadd.f32 1.1920929e-07, %v1672_v62 }
 0x3ec   : > { %1336 = vmatmul.mubr.bf16.gmra.mrb[36].mxu0 %v5675_v61 }
 0x3ed   : > { %v5113_v53 = vpack.c.bf16 %v3606_v3, %v3606_v3  ;;  %v3590_v25 = vadd.f32 %v3558_v52, %v3462_v41  ;;  %1345 = vmatprep.mubr.bf16.mxu0 %v9610_v22  ;;  %v1703_v56 = vadd.f32 1.1920929e-07, %v1671_v1  ;;  %v9613_v3 = vld [vmem:[#allocation39_spill] sm:$0xff]  ;;  %v7476_v1 = vld [vmem:[%s6421_s23 + $0xa0] sm:$0xff] }
 0x3ef   : > { %4086 = vst [vmem:[%s7263_s0 + $0x1c] sm:$0xf] %v5113_v53  ;;  %v3622_v46 = vmul.f32 0.12, %v3590_v25  ;;  %5468 = vrsqrt.f32 %v1703_v56  ;;  %v5678_v53 = vld [vmem:[%s6407_s20 + $0x20] sm:$0xff]  }
 0x3f0   : > { %5470 = vrsqrt.f32 %v1688_v59  ;;  %v5679_v59 = vld [vmem:[%s6407_s20 + $0x28] sm:$0xff]  }
 0x3f1   : > { %v5129_v27 = vpack.c.bf16 %v3622_v46, %v3622_v46  ;;  %5472 = vrsqrt.f32 %v1704_v63  ;;  %v7462_v46 = vld [vmem:[%s6421_s23 + $0x20] sm:$0xff] }
 0x3f2   : > { %v2005_v61 = vmul.f32 %v7315_v57, %v7462_v46  ;;  %v2021_v57 = vmul.f32 %v7320_v14, %v7476_v1 }
 0x3f3   : > { %4102 = vst [vmem:[%s7263_s0 + $0x9c] sm:$0xf] %v5129_v27  ;;  %v5467_v40 = vpop.eup %5466  ;;  %v9615_v27 = vld [vmem:[#allocation40_spill] sm:$0xff] }
 0x3f4   : > { %1346 = vmatmul.mubr.bf16.gmra.mrb[40].mxu0 %v5676_v44  ;;  %v7443_v50 = vmul.f32 %v5467_v40, %v9611_v28  ;;  %v7489_v28 = vld [vmem:[%s6421_s23 + $0x28] sm:$0xff] }
 0x3f5   : > { %1355 = vmatprep.mubr.bf16.mxu0 %v9610_v22  ;;  %v2006_v14 = vmul.f32 %v7323_v23, %v7489_v28 }
 0x3f6   : > { %3307 = vadd.xlane.f32.xlu0 %v3247_v12 }
 0x3f9   : > { %v5469_v49 = vpop.eup %5468 }
 0x3fa   : > { %v5471_v36 = vpop.eup %5470  ;;  %v7448_v48 = vmul.f32 %v5469_v49, %v9612_v10  ;;  %v7492_v49 = vld [vmem:[%s6428_s15 + $0x28] sm:$0xff] }
 0x3fb   : > { %v7451_v41 = vmul.f32 %v5471_v36, %v9613_v3  ;;  %v5473_v52 = vpop.eup %5472 }
 0x3fc   : > { %1356 = vmatmul.mubr.bf16.gmra.mrb[44].mxu0 %v5677_v42  ;;  %v7468_v12 = vmul.f32 %v5473_v52, %v9615_v27  ;;  %v7500_v27 = vld [vmem:[%s6421_s23 + $0xa8] sm:$0xff] }
 0x3fd   : > { %1365 = vmatprep.mubr.bf16.mxu0 %v9610_v22  ;;  %v2022_v23 = vmul.f32 %v7332_v6, %v7500_v27  ;;  %v5682_v6 = vld [vmem:[%s6407_s20 + $0x40] sm:$0xff]  }
 0x400   : > { %3309 = vadd.xlane.f32.xlu1 %v3248_v51 }
 0x404   : > { %1366 = vmatmul.mubr.bf16.gmra.mrb[48].mxu0 %v5678_v53  ;;  %v5680_v53 = vld [vmem:[%s6407_s20 + $0x30] sm:$0xff]  }
 0x405   : > { %1375 = vmatprep.mubr.bf16.mxu0 %v9610_v22 }
 0x40c   : > { %2045 = vrot.lane.b32.xlu0 %v7443_v50, %s6070_s24  ;;  %1376 = vmatmul.mubr.bf16.gmra.mrb[52].mxu0 %v5679_v59 }
 0x40d   : > { %1385 = vmatprep.mubr.bf16.mxu0 %v9610_v22 }
 0x410   : > { %2077 = vrot.lane.b32.xlu0 %v7448_v48, %s6070_s24 }
 0x411   : > { %v7456_v25 = vpop.xlane.xlu0 %3303  ;;  %2047 = vrot.lane.b32.xlu1 %v7451_v41, %s6070_s24 }
 0x412   : > { %9614 = vst [vmem:[#allocation32_spill] sm:$0xff] %v7456_v25  ;;  %v9792_v25 = vld [vmem:[#allocation91_spill] sm:$0xff] }
 0x414   : > { %1386 = vmatmul.mubr.bf16.gmra.mrb[56].mxu0 %v5680_v53 }
 0x415   : > { %v2042_v26 = vpop.permute.xlu0 %2041  ;;  %2079 = vrot.lane.b32.xlu1 %v7468_v12, %s6070_s24  ;;  %1395 = vmatprep.mubr.bf16.mxu0 %v9610_v22 }
 0x416   : > { %v2101_v34 = vmul.f32 %v2042_v26, %v7465_v8  ;;  %v7503_v26 = vld [vmem:[%s6428_s15 + $0xa8] sm:$0xff] }
 0x418   : > { %v2133_v56 = vadd.f32 %v2101_v34, %v2005_v61 }
 0x419   : > { %v2074_v62 = vpop.permute.xlu0 %2073 }
 0x41a   : > { %v2165_v51 = vmul.f32 0.12, %v2133_v56  ;;  %v2117_v44 = vmul.f32 %v2074_v62, %v7479_v58 }
 0x41b   : > { %v7486_v63 = vpop.xlane.xlu1 %3305 }
 0x41c   : > { %9616 = vst [vmem:[#allocation29_spill] sm:$0xff] %v7486_v63  ;;  %v5018_v40 = vpack.c.bf16 %v2165_v51, %v2165_v51  ;;  %v2149_v42 = vadd.f32 %v2117_v44, %v2021_v57  ;;  %v5681_v44 = vld [vmem:[%s6407_s20 + $0x38] sm:$0xff]  }
 0x41d   : > { %1396 = vmatmul.mubr.bf16.gmra.mrb[60].mxu0 %v5681_v44  ;;  %v9619_v44 = vld [vmem:[#allocation41_spill] sm:$0xff] }
 0x41e   : > { %2647 = vst [vmem:[%s7263_s0 + $0x20] sm:$0xf] %v5018_v40  ;;  %v2181_v36 = vmul.f32 0.12, %v2149_v42  ;;  %1405 = vmatprep.mubr.bf16.mxu0 %v9610_v22  ;;  %v1807_v42 = vmul.f32 %v7357_v20, %v7357_v20 }
 0x41f   : > { %v2044_v10 = vpop.permute.xlu1 %2043 }
 0x420   : > { %v5034_v3 = vpack.c.bf16 %v2181_v36, %v2181_v36  ;;  %v2102_v52 = vmul.f32 %v2044_v10, %v7492_v49  ;;  %v3097_v36 = vmul.f32 0.0078125, %v7019_v30  ;;  %v5683_v30 = vld [vmem:[%s6407_s20 + $0x48] sm:$0xff]  }
 0x422   : > { %2663 = vst [vmem:[%s7263_s0 + $0xa0] sm:$0xf] %v5034_v3  ;;  %v2134_v61 = vadd.f32 %v2102_v52, %v2006_v14  ;;  %v3129_v10 = vadd.f32 1.1920929e-07, %v3097_v36  ;;  %v3113_v3 = vmul.f32 0.0078125, %v7027_v29  ;;  %v3098_v14 = vmul.f32 0.0078125, %v7007_v0  ;;  %v5684_v0 = vld [vmem:[%s6407_s20 + $0x50] sm:$0xff]  }
 0x423   : > { %v2076_v34 = vpop.permute.xlu1 %2075 }
 0x424   : > { %v2166_v56 = vmul.f32 0.12, %v2134_v61  ;;  %v2118_v59 = vmul.f32 %v2076_v34, %v7503_v26  ;;  %5474 = vrsqrt.f32 %v3129_v10  ;;  %v3145_v52 = vadd.f32 1.1920929e-07, %v3113_v3  ;;  %v9621_v10 = vld [vmem:[#allocation42_spill] sm:$0xff] }
 0x425   : > { %1406 = vmatmul.mubr.bf16.gmra.mrb[64].mxu0 %v5682_v6  ;;  %v3130_v53 = vadd.f32 1.1920929e-07, %v3098_v14  ;;  %v3114_v61 = vmul.f32 0.0078125, %v7015_v18  ;;  %v1808_v34 = vmul.f32 %v7371_v16, %v7371_v16 }
 0x426   : > { %v5019_v62 = vpack.c.bf16 %v2166_v56, %v2166_v56  ;;  %v2150_v51 = vadd.f32 %v2118_v59, %v2022_v23  ;;  %1415 = vmatprep.mubr.bf16.mxu0 %v9610_v22  ;;  %5476 = vrsqrt.f32 %v3145_v52  ;;  %v9617_v23 = vld [vmem:[#allocation37_spill] sm:$0xff]  ;;  %v3447_v52 = vmul.f32 %v7391_v5, %v7462_v46 }
 0x427   : > { %5478 = vrsqrt.f32 %v3130_v53  ;;  %v3146_v29 = vadd.f32 1.1920929e-07, %v3114_v61  ;;  %v5686_v61 = vld [vmem:[%s6407_s20 + $0x60] sm:$0xff]  }
 0x428   : > { %2648 = vst [vmem:[%s7263_s0 + $0x28] sm:$0xf] %v5019_v62  ;;  %v2182_v57 = vmul.f32 0.12, %v2150_v51  ;;  %v9618_v51 = vld [vmem:[#allocation38_spill] sm:$0xff] }
 0x429   : > { %5480 = vrsqrt.f32 %v3146_v29 }
 0x42a   : > { %v5035_v40 = vpack.c.bf16 %v2182_v57, %v2182_v57 }
 0x42c   : > { %2664 = vst [vmem:[%s7263_s0 + $0xa8] sm:$0xf] %v5035_v40 }
 0x42d   : > { %1416 = vmatmul.mubr.bf16.gmra.mrb[68].mxu0 %v5683_v30 }
 0x42e   : > { %1425 = vmatprep.mubr.bf16.mxu0 %v9610_v22  ;;  %v5475_v56 = vpop.eup %5474 }
 0x42f   : > { %1869 = vadd.xlane.f32.xlu0 %v1807_v42  ;;  %v7529_v18 = vmul.f32 %v5475_v56, %v9617_v23  ;;  %v5685_v42 = vld [vmem:[%s6407_s20 + $0x58] sm:$0xff]   ;;  %v3463_v56 = vmul.f32 %v7396_v45, %v7476_v1  ;;  %v1658_v1 = vmul.f32 0.0078125, %v7023_v21  ;;  %v5688_v21 = vld [vmem:[%s6407_s20 + $0x70] sm:$0xff]  }
 0x430   : > { %v5477_v59 = vpop.eup %5476 }
 0x431   : > { %v5479_v62 = vpop.eup %5478  ;;  %v7534_v57 = vmul.f32 %v5477_v59, %v9618_v51 }
 0x432   : > { %v7537_v40 = vmul.f32 %v5479_v62, %v9619_v44  ;;  %v5687_v62 = vld [vmem:[%s6407_s20 + $0x68] sm:$0xff]   ;;  %v3448_v44 = vmul.f32 %v7399_v60, %v7489_v28  ;;  %v1657_v60 = vmul.f32 0.0078125, %v7035_v31  ;;  %v3100_v28 = vmul.f32 0.0078125, %v7039_v13  ;;  %v9625_v13 = vld [vmem:[#allocation129_spill] sm:$0xff] }
 0x433   : > { %v5481_v36 = vpop.eup %5480 }
 0x434   : > { %v7548_v3 = vmul.f32 %v5481_v36, %v9621_v10  ;;  %v1674_v36 = vmul.f32 0.0078125, %v7031_v19 }
 0x435   : > { %1426 = vmatmul.mubr.bf16.gmra.mrb[72].mxu0 %v5684_v0 }
 0x436   : > { %1435 = vmatprep.mubr.bf16.mxu0 %v9610_v22 }
 0x439   : > { %1871 = vadd.xlane.f32.xlu1 %v1808_v34 }
 0x43d   : > { %1436 = vmatmul.mubr.bf16.gmra.mrb[76].mxu0 %v5685_v42 }
 0x43e   : > { %1445 = vmatprep.mubr.bf16.mxu0 %v9610_v22 }
 0x445   : > { %3487 = vrot.lane.b32.xlu0 %v7529_v18, %s6070_s24  ;;  %1446 = vmatmul.mubr.bf16.gmra.mrb[80].mxu0 %v5686_v61  ;;  %v1690_v61 = vadd.f32 1.1920929e-07, %v1658_v1 }
 0x446   : > { %1455 = vmatprep.mubr.bf16.mxu0 %v9610_v22 }
 0x447   : > { %5482 = vrsqrt.f32 %v1690_v61 }
 0x449   : > { %3519 = vrot.lane.b32.xlu0 %v7534_v57, %s6070_s24 }
 0x44a   : > { %v7543_v6 = vpop.xlane.xlu0 %1865  ;;  %3489 = vrot.lane.b32.xlu1 %v7537_v40, %s6070_s24 }
 0x44b   : > { %9620 = vst [vmem:[#allocation30_spill] sm:$0xff] %v7543_v6  ;;  %v9779_v6 = vld [vmem:[#allocation84_spill] sm:$0xff] }
 0x44d   : > { %1456 = vmatmul.mubr.bf16.gmra.mrb[84].mxu0 %v5687_v62  ;;  %v9627_v62 = vld [vmem:[#allocation131_spill] sm:$0xff] }
 0x44e   : > { %v3484_v14 = vpop.permute.xlu0 %3483  ;;  %3521 = vrot.lane.b32.xlu1 %v7548_v3, %s6070_s24  ;;  %1465 = vmatprep.mubr.bf16.mxu0 %v9610_v22 }
 0x44f   : > { %v3543_v53 = vmul.f32 %v3484_v14, %v7465_v8  ;;  %v3464_v14 = vmul.f32 %v7406_v32, %v7500_v27  ;;  %v1689_v32 = vadd.f32 1.1920929e-07, %v1657_v60  ;;  %v9624_v27 = vld [vmem:[#allocation128_spill] sm:$0xff]  ;;  %v5689_v60 = vld [vmem:[%s6407_s20 + $0x78] sm:$0xff]   ;;  %s6071_s20 = smov [#allocation12]  }
 0x450   : > { %v3099_v31 = vmul.f32 0.0078125, %v9624_v27  ;;  %s5917_s12 = sshll.u32 %s6071_s20, 4  ;;  %s5918_s12 = int_to_ptr.vmem [resolvable:$false] %s5917_s12 }
 0x451   : > { %v3575_v34 = vadd.f32 %v3543_v53, %v3447_v52  ;;  %p5920_p7 = scmp.lt.s32.totalorder %s8909_s11, %s5918_s12 }
 0x452   : > { %v3516_v30 = vpop.permute.xlu0 %3515 }
 0x453   : > { %v3607_v29 = vmul.f32 0.12, %v3575_v34  ;;  %v3559_v0 = vmul.f32 %v3516_v30, %v7479_v58  ;;  %v1673_v34 = vmul.f32 0.0078125, %v7044_v4  ;;  %v1706_v30 = vadd.f32 1.1920929e-07, %v1674_v36  ;;  %v9626_v4 = vld [vmem:[#allocation130_spill] sm:$0xff] }
 0x454   : > { %v7560_v23 = vpop.xlane.xlu1 %1867 }
 0x455   : > { %9622 = vst [vmem:[#allocation33_spill] sm:$0xff] %v7560_v23  ;;  %v5114_v59 = vpack.c.bf16 %v3607_v29, %v3607_v29  ;;  %v3591_v5 = vadd.f32 %v3559_v0, %v3463_v56  ;;  %1466 = vmatmul.mubr.bf16.gmra.mrb[88].mxu0 %v5688_v21  ;;  %v9623_v29 = vld [vmem:[#allocation127_spill] sm:$0xff]  ;;  %v1660_v0 = vmul.f32 0.0078125, %v9625_v13  ;;  %5484 = vrsqrt.f32 %v1706_v30 }
 0x456   : > { %v3116_v19 = vmul.f32 0.0078125, %v9623_v29  ;;  %1475 = vmatprep.mubr.bf16.mxu0 %v9610_v22  ;;  %5486 = vrsqrt.f32 %v1689_v32  ;;  %v9628_v22 = vld [vmem:[#allocation132_spill] sm:$0xff]  ;;  %v9633_v29 = vld [vmem:[#allocation137_spill] sm:$0xff]  ;;  %v9634_v32 = vld [vmem:[#allocation138_spill] sm:$0xff] }
 0x457   : > { %4087 = vst [vmem:[%s7263_s0 + $0x24] sm:$0xf] %v5114_v59  ;;  %v3623_v46 = vmul.f32 0.12, %v3591_v5  ;;  %v1705_v5 = vadd.f32 1.1920929e-07, %v1673_v34  ;;  %v1692_v1 = vadd.f32 1.1920929e-07, %v1660_v0  ;;  %v5483_v0 = vpop.eup %5482 }
 0x458   : > { %v3486_v8 = vpop.permute.xlu1 %3485  ;;  %v9632_v34 = vld [vmem:[#allocation136_spill] sm:$0xff]  ;;  %v3117_v27 = vmul.f32 0.0078125, %v9634_v32 }
 0x459   : > { %v5130_v51 = vpack.c.bf16 %v3623_v46, %v3623_v46  ;;  %v3544_v42 = vmul.f32 %v3486_v8, %v7492_v49  ;;  %v3115_v46 = vmul.f32 0.0078125, %v9626_v4  ;;  %v3148_v8 = vadd.f32 1.1920929e-07, %v3116_v19  ;;  %v1508_v32 = vld [vmem:[%s6421_s23 + $0xb0] sm:$0xff] }
 0x45a   : > { %v3101_v21 = vmul.f32 0.0078125, %v9632_v34  ;;  %v1662_v19 = vmul.f32 0.0078125, %v9633_v29  ;;  %v1492_v29 = vld [vmem:[%s6421_s23 + $0x30] sm:$0xff] }
 0x45b   : > { %4103 = vst [vmem:[%s7263_s0 + $0xa4] sm:$0xf] %v5130_v51  ;;  %v3576_v45 = vadd.f32 %v3544_v42, %v3448_v44  ;;  %v1676_v51 = vmul.f32 0.0078125, %v9627_v62  ;;  %v3131_v44 = vadd.f32 1.1920929e-07, %v3099_v31  ;;  %v1659_v42 = vmul.f32 0.0078125, %v9628_v22  ;;  %v9637_v62 = vld [vmem:[#allocation141_spill] sm:$0xff] }
 0x45c   : > { %v3518_v58 = vpop.permute.xlu1 %3517  ;;  %v3149_v22 = vadd.f32 1.1920929e-07, %v3117_v27 }
 0x45d   : > { %v3608_v10 = vmul.f32 0.12, %v3576_v45  ;;  %v3560_v52 = vmul.f32 %v3518_v58, %v7503_v26  ;;  %v3132_v26 = vadd.f32 1.1920929e-07, %v3100_v28  ;;  %v3249_v45 = vmul.f32 %v7369_v7, %v7369_v7  ;;  %v9629_v58 = vld [vmem:[#allocation133_spill] sm:$0xff]  ;;  %1476 = vmatmul.mubr.bf16.gmra.mrb[92].mxu0 %v5689_v60 }
 0x45e   : > { %v3102_v36 = vmul.f32 0.0078125, %v9629_v58  ;;  %v1708_v28 = vadd.f32 1.1920929e-07, %v1676_v51  ;;  %v1691_v61 = vadd.f32 1.1920929e-07, %v1659_v42  ;;  %v3104_v51 = vmul.f32 0.0078125, %v9637_v62  ;;  %v9638_v42 = vld [vmem:[#allocation142_spill] sm:$0xff] }
 0x45f   : > { %v5115_v49 = vpack.c.bf16 %v3608_v10, %v3608_v10  ;;  %v3592_v53 = vadd.f32 %v3560_v52, %v3464_v14  ;;  %5488 = vrsqrt.f32 %v3132_v26  ;;  %v3147_v10 = vadd.f32 1.1920929e-07, %v3115_v46  ;;  %v9630_v14 = vld [vmem:[#allocation134_spill] sm:$0xff]  ;;  %v9635_v26 = vld [vmem:[#allocation139_spill] sm:$0xff]  ;;  %v5485_v46 = vpop.eup %5484 }
 0x460   : > { %5490 = vrsqrt.f32 %v1705_v5  ;;  %v1675_v52 = vmul.f32 0.0078125, %v9630_v14  ;;  %v3134_v30 = vadd.f32 1.1920929e-07, %v3102_v36  ;;  %v1678_v13 = vmul.f32 0.0078125, %v9635_v26  ;;  %v9636_v5 = vld [vmem:[#allocation140_spill] sm:$0xff]  ;;  %v9641_v26 = vld [vmem:[#allocation145_spill] sm:$0xff] }
 0x461   : > { %4088 = vst [vmem:[%s7263_s0 + $0x2c] sm:$0xf] %v5115_v49  ;;  %v3624_v56 = vmul.f32 0.12, %v3592_v53  ;;  %5492 = vrsqrt.f32 %v3148_v8  ;;  %v9631_v49 = vld [vmem:[#allocation135_spill] sm:$0xff]  ;;  %v1661_v4 = vmul.f32 0.0078125, %v9636_v5  ;;  %v7616_v62 = vmul.f32 %v7443_v50, %v1492_v29 }
 0x462   : > { %v3118_v53 = vmul.f32 0.0078125, %v9631_v49  ;;  %5494 = vrsqrt.f32 %v3131_v44  ;;  %v1694_v8 = vadd.f32 1.1920929e-07, %v1662_v19  ;;  %v5487_v44 = vpop.eup %5486  ;;  %v1710_v36 = vadd.f32 1.1920929e-07, %v1678_v13  ;;  %v1509_v19 = vld [vmem:[%s6421_s23 + $0xb8] sm:$0xff] }
 0x463   : > { %v5131_v59 = vpack.c.bf16 %v3624_v56, %v3624_v56  ;;  %5496 = vrsqrt.f32 %v1692_v1  ;;  %v1707_v56 = vadd.f32 1.1920929e-07, %v1675_v52  ;;  %v3250_v1 = vmul.f32 %v7373_v55, %v7373_v55  ;;  %v9639_v52 = vld [vmem:[#allocation143_spill] sm:$0xff] }
 0x464   : > { %5498 = vrsqrt.f32 %v3147_v10  ;;  %v3150_v31 = vadd.f32 1.1920929e-07, %v3118_v53  ;;  %v1693_v14 = vadd.f32 1.1920929e-07, %v1661_v4  ;;  %v3120_v60 = vmul.f32 0.0078125, %v9639_v52  ;;  %v1493_v53 = vld [vmem:[%s6421_s23 + $0x38] sm:$0xff]  ;;  %v9642_v4 = vld [vmem:[#allocation47_spill] sm:$0xff] }
 0x465   : > { %4104 = vst [vmem:[%s7263_s0 + $0xac] sm:$0xf] %v5131_v59  ;;  %5500 = vrsqrt.f32 %v1708_v28  ;;  %v3133_v59 = vadd.f32 1.1920929e-07, %v3101_v21  ;;  %v3136_v49 = vadd.f32 1.1920929e-07, %v3104_v51  ;;  %v9640_v21 = vld [vmem:[#allocation144_spill] sm:$0xff]  ;;  %v1664_v13 = vmul.f32 0.0078125, %v9641_v26 }
 0x466   : > { %5502 = vrsqrt.f32 %v1691_v61  ;;  %v7619_v51 = vmul.f32 %v7468_v12, %v1509_v19  ;;  %v9645_v12 = vld [vmem:[#allocation49_spill] sm:$0xff]  ;;  %v1494_v26 = vld [vmem:[%s6421_s23 + $0x40] sm:$0xff] }
 0x467   : > { %5504 = vrsqrt.f32 %v3134_v30  ;;  %v3103_v30 = vmul.f32 0.0078125, %v9640_v21  ;;  %v9646_v21 = vld [vmem:[#allocation146_spill] sm:$0xff] }
 0x468   : > { %3311 = vadd.xlane.f32.xlu0 %v3249_v45  ;;  %5506 = vrsqrt.f32 %v1707_v56  ;;  %v1677_v45 = vmul.f32 0.0078125, %v9638_v42 }
 0x469   : > { %v5489_v58 = vpop.eup %5488  ;;  %5508 = vrsqrt.f32 %v3150_v31  ;;  %v3152_v31 = vadd.f32 1.1920929e-07, %v3120_v60  ;;  %v3135_v42 = vadd.f32 1.1920929e-07, %v3103_v30 }
 0x46a   : > { %v5491_v10 = vpop.eup %5490  ;;  %5510 = vrsqrt.f32 %v3133_v59  ;;  %v1709_v34 = vadd.f32 1.1920929e-07, %v1677_v45  ;;  %v7610_v59 = vmul.f32 %v7451_v41, %v1493_v53  ;;  %v7622_v45 = vmul.f32 %v7448_v48, %v1508_v32 }
 0x46b   : > { %v5493_v28 = vpop.eup %5492  ;;  %5512 = vrsqrt.f32 %v1694_v8  ;;  %v7613_v8 = vmul.f32 %v5483_v0, %v9642_v4  ;;  %v7625_v41 = vmul.f32 %v7537_v40, %v1493_v53  ;;  %v7633_v60 = vmul.f32 %v5489_v58, %v9645_v12  ;;  %v9647_v53 = vld [vmem:[#allocation44_spill] sm:$0xff]  ;;  %v1511_v4 = vld [vmem:[%s6421_s23 + $0xc8] sm:$0xff] }
 0x46c   : > { %v5495_v61 = vpop.eup %5494  ;;  %5514 = vrsqrt.f32 %v3149_v22  ;;  %v1696_v48 = vadd.f32 1.1920929e-07, %v1664_v13  ;;  %v3119_v40 = vmul.f32 0.0078125, %v9646_v21  ;;  %v1769_v30 = vmul.f32 %v5491_v10, %v9647_v53  ;;  %v9650_v10 = vld [vmem:[#allocation148_spill] sm:$0xff]  ;;  %v9652_v21 = vld [vmem:[#allocation55_spill] sm:$0xff] }
 0x46d   : > { %v5497_v56 = vpop.eup %5496  ;;  %5516 = vrsqrt.f32 %v1710_v36  ;;  %v9643_v36 = vld [vmem:[#allocation43_spill] sm:$0xff]  ;;  %v7646_v58 = vmul.f32 %v7529_v18, %v1492_v29  ;;  %v9653_v18 = vld [vmem:[#allocation46_spill] sm:$0xff] }
 0x46e   : > { %v5499_v27 = vpop.eup %5498  ;;  %5518 = vrsqrt.f32 %v1693_v14  ;;  %v1753_v50 = vmul.f32 %v5487_v44, %v9643_v36  ;;  %v9644_v14 = vld [vmem:[#allocation48_spill] sm:$0xff]  ;;  %v9648_v44 = vld [vmem:[#allocation50_spill] sm:$0xff]  ;;  %v1680_v36 = vmul.f32 0.0078125, %v9650_v10  ;;  %v1513_v10 = vld [vmem:[%s6421_s23 + $0xd8] sm:$0xff] }
 0x46f   : > { %v5501_v5 = vpop.eup %5500  ;;  %5520 = vrsqrt.f32 %v3136_v49  ;;  %v7630_v52 = vmul.f32 %v5485_v46, %v9644_v14  ;;  %v7636_v49 = vmul.f32 %v7548_v3, %v1509_v19  ;;  %v7643_v46 = vmul.f32 %v5493_v28, %v9648_v44  ;;  %v1510_v19 = vld [vmem:[%s6421_s23 + $0xc0] sm:$0xff]  ;;  %v9651_v14 = vld [vmem:[#allocation45_spill] sm:$0xff] }
 0x470   : > { %v5503_v22 = vpop.eup %5502  ;;  %5522 = vrsqrt.f32 %v1709_v34  ;;  %v7649_v3 = vmul.f32 %v7534_v57, %v1508_v32  ;;  %v3195_v12 = vmul.f32 %v5495_v61, %v9651_v14  ;;  %v7658_v28 = vmul.f32 %v5497_v56, %v9652_v21  ;;  %v9654_v57 = vld [vmem:[#allocation56_spill] sm:$0xff]  ;;  %v9659_v14 = vld [vmem:[#allocation151_spill] sm:$0xff] }
 0x471   : > { %v5505_v0 = vpop.eup %5504  ;;  %5524 = vrsqrt.f32 %v3152_v31  ;;  %v7661_v29 = vmul.f32 %v5499_v27, %v9653_v18  ;;  %v7664_v32 = vmul.f32 %v5501_v5, %v9654_v57  ;;  %v7666_v44 = vmul.f32 %v1753_v50, %v1494_v26  ;;  %v9660_v18 = vld [vmem:[#allocation51_spill] sm:$0xff] }
 0x472   : > { %3313 = vadd.xlane.f32.xlu1 %v3250_v1  ;;  %v1495_v1 = vld [vmem:[%s6421_s23 + $0x48] sm:$0xff]  ;;  %v5507_v34 = vpop.eup %5506  ;;  %5526 = vrsqrt.f32 %v3135_v42  ;;  %v1497_v42 = vld [vmem:[%s6421_s23 + $0x58] sm:$0xff]  ;;  %v3151_v61 = vadd.f32 1.1920929e-07, %v3119_v40  ;;  %v7673_v56 = vmul.f32 %v1769_v30, %v1510_v19  ;;  %v1663_v21 = vmul.f32 0.0078125, %v9659_v14 }
 0x473   : > { %v5509_v55 = vpop.eup %5508  ;;  %v7653_v31 = vmul.f32 %v7613_v8, %v1495_v1  ;;  %9655 = vst [vmem:[#allocation35_spill] sm:$0xff] %v7666_v44  ;;  %5528 = vrsqrt.f32 %v1696_v48  ;;  %v7676_v27 = vmul.f32 %v7633_v60, %v1495_v1  ;;  %v7681_v57 = vmul.f32 %v5503_v22, %v9660_v18  ;;  %v9666_v22 = vld [vmem:[#allocation53_spill] sm:$0xff]  ;;  %v1498_v44 = vld [vmem:[%s6421_s23 + $0x60] sm:$0xff] }
 0x474   : > { %v5511_v13 = vpop.eup %5510  ;;  %9657 = vst [vmem:[#allocation39_spill] sm:$0xff] %v7673_v56  ;;  %v7687_v48 = vmul.f32 %v7643_v46, %v1511_v4  ;;  %v1712_v40 = vadd.f32 1.1920929e-07, %v1680_v36  ;;  %v9663_v56 = vld [vmem:[#allocation52_spill] sm:$0xff]  ;;  %v7692_v1 = vmul.f32 %v3195_v12, %v1494_v26  ;;  %v7696_v20 = vmul.f32 %v7658_v28, %v1497_v42 }
 0x475   : > { %9649 = vst [vmem:[#allocation34_spill] sm:$0xff] %v7653_v31  ;;  %v5513_v53 = vpop.eup %5512  ;;  %v7669_v31 = vmul.f32 %v7630_v52, %v1511_v4  ;;  %9658 = vst [vmem:[#allocation40_spill] sm:$0xff] %v7676_v27  ;;  %v7690_v39 = vmul.f32 %v5507_v34, %v9663_v56  ;;  %v1496_v27 = vld [vmem:[%s6421_s23 + $0x50] sm:$0xff]  ;;  %v7699_v18 = vmul.f32 %v5511_v13, %v9666_v22  ;;  %5530 = vrsqrt.f32 %v3151_v61  ;;  %v9671_v13 = vld [vmem:[#allocation54_spill] sm:$0xff] }
 0x476   : > { %v5515_v7 = vpop.eup %5514  ;;  %9662 = vst [vmem:[#allocation37_spill] sm:$0xff] %v7687_v48  ;;  %9664 = vst [vmem:[#allocation38_spill] sm:$0xff] %v7692_v1  ;;  %v7705_v4 = vmul.f32 %v7661_v29, %v1510_v19  ;;  %v1512_v36 = vld [vmem:[%s6421_s23 + $0xd0] sm:$0xff]  ;;  %v7709_v34 = vmul.f32 %v7664_v32, %v1513_v10  ;;  %v1695_v19 = vadd.f32 1.1920929e-07, %v1663_v21  ;;  %5532 = vrsqrt.f32 %v1712_v40 }
 0x477   : > { %9656 = vst [vmem:[#allocation36_spill] sm:$0xff] %v7669_v31  ;;  %v5517_v5 = vpop.eup %5516  ;;  %v9661_v31 = vld [vmem:[#allocation57_spill] sm:$0xff]  ;;  %9665 = vst [vmem:[#allocation41_spill] sm:$0xff] %v7696_v20  ;;  %v9670_v56 = vld [vmem:[#allocation152_spill] sm:$0xff]  ;;  %v7714_v22 = vmul.f32 %v5515_v7, %v9671_v13  ;;  %v7751_v40 = vmul.f32 %v7699_v18, %v1496_v27 }
 0x478   : > { %v7684_v16 = vmul.f32 %v5505_v0, %v9661_v31  ;;  %v9667_v0 = vld [vmem:[#allocation58_spill] sm:$0xff]  ;;  %9668 = vst [vmem:[#allocation42_spill] sm:$0xff] %v7705_v4  ;;  %9669 = vst [vmem:[#allocation127_spill] sm:$0xff] %v7709_v34  ;;  %v3106_v48 = vmul.f32 0.0078125, %v9670_v56  ;;  %v9674_v61 = vld [vmem:[#allocation64_spill] sm:$0xff]  ;;  %v7727_v56 = vmul.f32 %v7681_v57, %v1496_v27  ;;  %5534 = vrsqrt.f32 %v1695_v19 }
 0x479   : > { %v7702_v31 = vmul.f32 %v5509_v55, %v9667_v0  ;;  %v9672_v55 = vld [vmem:[#allocation63_spill] sm:$0xff]  ;;  %v7724_v34 = vmul.f32 %v5517_v5, %v9674_v61  ;;  %v9680_v61 = vld [vmem:[#allocation153_spill] sm:$0xff]  ;;  %9682 = vst [vmem:[#allocation132_spill] sm:$0xff] %v7751_v40  ;;  %v9687_v27 = vld [vmem:[#allocation156_spill] sm:$0xff] }
 0x47a   : > { %v7717_v0 = vmul.f32 %v5513_v53, %v9672_v55  ;;  %9675 = vst [vmem:[#allocation129_spill] sm:$0xff] %v7727_v56  ;;  %v7730_v7 = vmul.f32 %v7684_v16, %v1497_v42  ;;  %v9677_v53 = vld [vmem:[#allocation59_spill] sm:$0xff]  ;;  %v9678_v55 = vld [vmem:[#allocation65_spill] sm:$0xff]  ;;  %v1679_v1 = vmul.f32 0.0078125, %v9680_v61  ;;  %v7745_v56 = vld [vmem:[%s6428_s15 + $0x30] sm:$0xff]  ;;  %v7760_v61 = vmul.f32 %v7714_v22, %v1512_v36 }
 0x47b   : > { %v1515_v5 = vld [vmem:[%s6421_s23 + $0xe8] sm:$0xff]  ;;  %v9681_v42 = vld [vmem:[#allocation60_spill] sm:$0xff] }
 0x47c   : > { %9676 = vst [vmem:[#allocation130_spill] sm:$0xff] %v7730_v7  ;;  %9685 = vst [vmem:[#allocation134_spill] sm:$0xff] %v7760_v61 }
 0x47e   : > { %2049 = vrot.lane.b32.xlu0 %v1753_v50, %s6070_s24  ;;  %v5519_v50 = vpop.eup %5518 }
 0x47f   : > { %v5521_v14 = vpop.eup %5520  ;;  %v7734_v21 = vmul.f32 %v5519_v50, %v9677_v53  ;;  %v7755_v50 = vmul.f32 %v7702_v31, %v1513_v10  ;;  %v3138_v53 = vadd.f32 1.1920929e-07, %v3106_v48  ;;  %v9688_v48 = vld [vmem:[#allocation66_spill] sm:$0xff] }
 0x480   : > { %v5523_v26 = vpop.eup %5522  ;;  %v7737_v4 = vmul.f32 %v5521_v14, %v9678_v55  ;;  %v9684_v55 = vld [vmem:[#allocation154_spill] sm:$0xff] }
 0x481   : > { %v5525_v13 = vpop.eup %5524  ;;  %v7748_v7 = vmul.f32 %v5523_v26, %v9681_v42  ;;  %9683 = vst [vmem:[#allocation133_spill] sm:$0xff] %v7755_v50  ;;  %v3122_v2 = vmul.f32 0.0078125, %v9684_v55  ;;  %v3105_v42 = vmul.f32 0.0078125, %v9687_v27  ;;  %v9690_v50 = vld [vmem:[#allocation157_spill] sm:$0xff]  ;;  %v1711_v27 = vadd.f32 1.1920929e-07, %v1679_v1 }
 0x482   : > { %2081 = vrot.lane.b32.xlu0 %v1769_v30, %s6070_s24  ;;  %v1499_v30 = vld [vmem:[%s6421_s23 + $0x68] sm:$0xff]  ;;  %v5527_v14 = vpop.eup %5526  ;;  %v7772_v55 = vmul.f32 %v5525_v13, %v9688_v48  ;;  %v1874_v61 = vmul.f32 0.0078125, %v9690_v50  ;;  %v9694_v13 = vld [vmem:[#allocation61_spill] sm:$0xff]  ;;  %5536 = vrsqrt.f32 %v3138_v53 }
 0x483   : > { %v7719_v20 = vpop.xlane.xlu0 %3307  ;;  %2051 = vrot.lane.b32.xlu1 %v7613_v8, %s6070_s24  ;;  %v7740_v8 = vmul.f32 %v7690_v39, %v1512_v36  ;;  %v7766_v26 = vmul.f32 %v7717_v0, %v1499_v30  ;;  %v5529_v36 = vpop.eup %5528  ;;  %v7783_v19 = vmul.f32 %v7737_v4, %v1499_v30  ;;  %v7790_v48 = vmul.f32 %v5527_v14, %v9694_v13  ;;  %v9698_v14 = vld [vmem:[#allocation71_spill] sm:$0xff] }
 0x484   : > { %9673 = vst [vmem:[#allocation128_spill] sm:$0xff] %v7719_v20  ;;  %v3154_v50 = vadd.f32 1.1920929e-07, %v3122_v2  ;;  %v3137_v1 = vadd.f32 1.1920929e-07, %v3105_v42  ;;  %v7804_v13 = vmul.f32 %v5529_v36, %v9698_v14  ;;  %v7807_v2 = vmul.f32 %v7772_v55, %v1515_v5  ;;  %v5531_v53 = vpop.eup %5530 }
 0x485   : > { %9679 = vst [vmem:[#allocation131_spill] sm:$0xff] %v7740_v8  ;;  %v7763_v8 = vld [vmem:[%s6421_s23 + $0xe0] sm:$0xff]  ;;  %9686 = vst [vmem:[#allocation135_spill] sm:$0xff] %v7766_v26  ;;  %v7780_v26 = vmul.f32 %v7734_v21, %v1498_v44  ;;  %5538 = vrsqrt.f32 %v1711_v27  ;;  %v5533_v36 = vpop.eup %5532  ;;  %v9704_v27 = vld [vmem:[#allocation163_spill] sm:$0xff] }
 0x486   : > { %3491 = vrot.lane.b32.xlu0 %v3195_v12, %s6070_s24  ;;  %v7775_v12 = vmul.f32 %v7724_v34, %v1515_v5  ;;  %9692 = vst [vmem:[#allocation138_spill] sm:$0xff] %v7783_v19  ;;  %9699 = vst [vmem:[#allocation140_spill] sm:$0xff] %v7807_v2  ;;  %v7818_v5 = vld [vmem:[%s6421_s23 + $0x78] sm:$0xff]  ;;  %5540 = vrsqrt.f32 %v3154_v50 }
 0x487   : > { %v2046_v10 = vpop.permute.xlu0 %2045  ;;  %2083 = vrot.lane.b32.xlu1 %v7630_v52, %s6070_s24  ;;  %9691 = vst [vmem:[#allocation137_spill] sm:$0xff] %v7780_v26  ;;  %v3121_v52 = vmul.f32 0.0078125, %v9693_v54  ;;  %v9697_v54 = vld [vmem:[#allocation160_spill] sm:$0xff]  ;;  %5542 = vrsqrt.f32 %v3137_v1  ;;  %v9716_v2 = vld [vmem:[#allocation169_spill] sm:$0xff] }
 0x488   : > { %9689 = vst [vmem:[#allocation136_spill] sm:$0xff] %v7775_v12  ;;  %v2103_v40 = vmul.f32 %v2046_v10, %v7745_v56  ;;  %v7794_v12 = vmul.f32 %v7748_v7, %v7763_v8  ;;  %v9696_v10 = vld [vmem:[#allocation159_spill] sm:$0xff]  ;;  %v1873_v30 = vmul.f32 0.0078125, %v9697_v54  ;;  %v9701_v54 = vld [vmem:[#allocation162_spill] sm:$0xff]  ;;  %v9707_v1 = vld [vmem:[#allocation164_spill] sm:$0xff] }
 0x489   : > { %v3316_v33 = vmul.f32 0.0078125, %v9696_v10  ;;  %v1906_v10 = vadd.f32 1.1920929e-07, %v1874_v61  ;;  %v3153_v42 = vadd.f32 1.1920929e-07, %v3121_v52  ;;  %v3315_v17 = vmul.f32 0.0078125, %v9701_v54 }
 0x48a   : > { %9695 = vst [vmem:[#allocation139_spill] sm:$0xff] %v7794_v12  ;;  %v2135_v26 = vadd.f32 %v2103_v40, %v7616_v62  ;;  %3523 = vrot.lane.b32.xlu0 %v7661_v29, %s6070_s24  ;;  %v9700_v62 = vld [vmem:[#allocation161_spill] sm:$0xff]  ;;  %v3318_v52 = vmul.f32 0.0078125, %v9704_v27 }
 0x48b   : > { %v2078_v19 = vpop.permute.xlu0 %2077  ;;  %3493 = vrot.lane.b32.xlu1 %v7633_v60, %s6070_s24  ;;  %v1876_v40 = vmul.f32 0.0078125, %v9700_v62  ;;  %v7815_v60 = vmul.f32 %v7790_v48, %v1498_v44  ;;  %v3348_v61 = vadd.f32 1.1920929e-07, %v3316_v33  ;;  %v7827_v44 = vld [vmem:[%s6428_s15 + $0x38] sm:$0xff]  ;;  %v9705_v62 = vld [vmem:[#allocation62_spill] sm:$0xff]  ;;  %5544 = vrsqrt.f32 %v1906_v10 }
 0x48c   : > { %v2167_v12 = vmul.f32 0.12, %v2135_v26  ;;  %v2119_v29 = vmul.f32 %v2078_v19, %v7787_v9  ;;  %v1905_v19 = vadd.f32 1.1920929e-07, %v1873_v30  ;;  %v7830_v54 = vmul.f32 %v5531_v53, %v9705_v62  ;;  %v9709_v53 = vld [vmem:[#allocation165_spill] sm:$0xff] }
 0x48d   : > { %v7812_v47 = vpop.xlane.xlu1 %3309  ;;  %9703 = vst [vmem:[#allocation142_spill] sm:$0xff] %v7815_v60  ;;  %v1908_v33 = vadd.f32 1.1920929e-07, %v1876_v40  ;;  %5546 = vrsqrt.f32 %v3153_v42  ;;  %v3347_v50 = vadd.f32 1.1920929e-07, %v3315_v17  ;;  %v1878_v10 = vmul.f32 0.0078125, %v9709_v53  ;;  %v9710_v42 = vld [vmem:[#allocation166_spill] sm:$0xff] }
 0x48e   : > { %9702 = vst [vmem:[#allocation141_spill] sm:$0xff] %v7812_v47  ;;  %v5020_v14 = vpack.c.bf16 %v2167_v12, %v2167_v12  ;;  %v2151_v26 = vadd.f32 %v2119_v29, %v7622_v45  ;;  %2053 = vrot.lane.b32.xlu0 %v7681_v57, %s6070_s24  ;;  %v7835_v57 = vmul.f32 %v7804_v13, %v7818_v5  ;;  %v5535_v12 = vpop.eup %5534  ;;  %v9708_v29 = vld [vmem:[#allocation72_spill] sm:$0xff]  ;;  %5548 = vrsqrt.f32 %v3348_v61 }
 0x48f   : > { %3525 = vrot.lane.b32.xlu1 %v7643_v46, %s6070_s24  ;;  %v1875_v46 = vmul.f32 0.0078125, %v9707_v1  ;;  %v7839_v27 = vmul.f32 %v5533_v36, %v9708_v29  ;;  %5550 = vrsqrt.f32 %v1905_v19  ;;  %v3350_v17 = vadd.f32 1.1920929e-07, %v3318_v52  ;;  %v7852_v36 = vld [vmem:[%s6428_s15 + $0xb8] sm:$0xff]  ;;  %v9712_v1 = vld [vmem:[#allocation167_spill] sm:$0xff] }
 0x490   : > { %2649 = vst [vmem:[%s7263_s0 + $0x30] sm:$0xf] %v5020_v14  ;;  %v2183_v45 = vmul.f32 0.12, %v2151_v26  ;;  %9706 = vst [vmem:[#allocation143_spill] sm:$0xff] %v7835_v57  ;;  %v7846_v26 = vld [vmem:[%s6421_s23 + $0xf8] sm:$0xff]  ;;  %v7856_v61 = vmul.f32 %v7830_v54, %v7763_v8  ;;  %5552 = vrsqrt.f32 %v1908_v33 }
 0x491   : > { %v2048_v30 = vpop.permute.xlu1 %2047  ;;  %v3317_v62 = vmul.f32 0.0078125, %v9710_v42  ;;  %v9713_v52 = vld [vmem:[#allocation67_spill] sm:$0xff]  ;;  %5554 = vrsqrt.f32 %v3347_v50  ;;  %v1907_v29 = vadd.f32 1.1920929e-07, %v1875_v46  ;;  %v7867_v8 = vmul.f32 %v7839_v27, %v7846_v26  ;;  %v9717_v46 = vld [vmem:[#allocation170_spill] sm:$0xff] }
 0x492   : > { %v5036_v40 = vpack.c.bf16 %v2183_v45, %v2183_v45  ;;  %v2104_v14 = vmul.f32 %v2048_v30, %v7827_v44  ;;  %2085 = vrot.lane.b32.xlu0 %v7690_v39, %s6070_s24  ;;  %9711 = vst [vmem:[#allocation144_spill] sm:$0xff] %v7856_v61  ;;  %v5537_v45 = vpop.eup %5536  ;;  %v3320_v39 = vmul.f32 0.0078125, %v9712_v1  ;;  %v7862_v30 = vmul.f32 %v5535_v12, %v9713_v52  ;;  %v9718_v1 = vld [vmem:[#allocation73_spill] sm:$0xff]  ;;  %v9719_v52 = vld [vmem:[#allocation171_spill] sm:$0xff] }
 0x493   : > { %2055 = vrot.lane.b32.xlu1 %v7658_v28, %s6070_s24  ;;  %v9714_v28 = vld [vmem:[#allocation168_spill] sm:$0xff]  ;;  %9715 = vst [vmem:[#allocation145_spill] sm:$0xff] %v7867_v8  ;;  %v1910_v57 = vadd.f32 1.1920929e-07, %v1878_v10  ;;  %v1880_v33 = vmul.f32 0.0078125, %v9716_v2  ;;  %v5539_v12 = vpop.eup %5538  ;;  %5556 = vrsqrt.f32 %v3350_v17  ;;  %v3349_v50 = vadd.f32 1.1920929e-07, %v3317_v62 }
 0x494   : > { %2665 = vst [vmem:[%s7263_s0 + $0xb0] sm:$0xf] %v5036_v40  ;;  %v2136_v19 = vadd.f32 %v2104_v14, %v7610_v59  ;;  %v1877_v53 = vmul.f32 0.0078125, %v9714_v28  ;;  %v7874_v59 = vld [vmem:[%s6421_s23 + $0x70] sm:$0xff]  ;;  %v3319_v14 = vmul.f32 0.0078125, %v9717_v46  ;;  %v7880_v10 = vmul.f32 %v5537_v45, %v9718_v1  ;;  %v5541_v2 = vpop.eup %5540  ;;  %v9722_v1 = vld [vmem:[#allocation173_spill] sm:$0xff] }
 0x495   : > { %v2080_v42 = vpop.permute.xlu1 %2079  ;;  %v3322_v28 = vmul.f32 0.0078125, %v9719_v52  ;;  %v5543_v8 = vpop.eup %5542  ;;  %5558 = vrsqrt.f32 %v1907_v29  ;;  %v9720_v62 = vld [vmem:[#allocation172_spill] sm:$0xff]  ;;  %v7887_v46 = vmul.f32 %v7862_v30, %v7874_v59  ;;  %v1912_v45 = vadd.f32 1.1920929e-07, %v1880_v33  ;;  %v9723_v29 = vld [vmem:[#allocation174_spill] sm:$0xff] }
 0x496   : > { %v2168_v61 = vmul.f32 0.12, %v2136_v19  ;;  %v2120_v40 = vmul.f32 %v2080_v42, %v7852_v36  ;;  %3495 = vrot.lane.b32.xlu0 %v7699_v18, %s6070_s24  ;;  %v3352_v19 = vadd.f32 1.1920929e-07, %v3320_v39  ;;  %v1909_v17 = vadd.f32 1.1920929e-07, %v1877_v53 }
 0x497   : > { %2087 = vrot.lane.b32.xlu1 %v7664_v32, %s6070_s24  ;;  %v1879_v60 = vmul.f32 0.0078125, %v9720_v62  ;;  %9721 = vst [vmem:[#allocation47_spill] sm:$0xff] %v7887_v46  ;;  %v5545_v32 = vpop.eup %5544  ;;  %5560 = vrsqrt.f32 %v1910_v57  ;;  %v1882_v39 = vmul.f32 0.0078125, %v9722_v1  ;;  %v3321_v53 = vmul.f32 0.0078125, %v9723_v29  ;;  %v1516_v46 = vld [vmem:[%s6421_s23 + $0xf0] sm:$0xff] }
 0x498   : > { %v5021_v42 = vpack.c.bf16 %v2168_v61, %v2168_v61  ;;  %v2152_v18 = vadd.f32 %v2120_v40, %v7619_v51  ;;  %v5547_v51 = vpop.eup %5546  ;;  %5562 = vrsqrt.f32 %v3349_v50  ;;  %v3351_v61 = vadd.f32 1.1920929e-07, %v3319_v14  ;;  %v9724_v40 = vld [vmem:[#allocation68_spill] sm:$0xff] }
 0x499   : > { %v7897_v62 = vmul.f32 %v5539_v12, %v9724_v40  ;;  %v5549_v57 = vpop.eup %5548  ;;  %5564 = vrsqrt.f32 %v3352_v19  ;;  %v3354_v33 = vadd.f32 1.1920929e-07, %v3322_v28  ;;  %v1911_v50 = vadd.f32 1.1920929e-07, %v1879_v60  ;;  %v9726_v14 = vld [vmem:[#allocation176_spill] sm:$0xff]  ;;  %v9728_v40 = vld [vmem:[#allocation177_spill] sm:$0xff] }
 0x49a   : > { %2650 = vst [vmem:[%s7263_s0 + $0x38] sm:$0xf] %v5021_v42  ;;  %v2184_v52 = vmul.f32 0.12, %v2152_v18  ;;  %3527 = vrot.lane.b32.xlu0 %v7714_v22, %s6070_s24  ;;  %v9725_v42 = vld [vmem:[#allocation175_spill] sm:$0xff]  ;;  %v7901_v22 = vpop.eup %5550  ;;  %5566 = vrsqrt.f32 %v1909_v17  ;;  %v1881_v29 = vmul.f32 0.0078125, %v9726_v14  ;;  %v7905_v47 = vmul.f32 %v5541_v2, %v9727_v38 }
 0x49b   : > { %3497 = vrot.lane.b32.xlu1 %v7684_v16, %s6070_s24  ;;  %v3324_v18 = vmul.f32 0.0078125, %v9725_v42  ;;  %v7907_v16 = vpop.eup %5552  ;;  %5568 = vrsqrt.f32 %v1912_v45  ;;  %v1914_v12 = vadd.f32 1.1920929e-07, %v1882_v39  ;;  %v1884_v19 = vmul.f32 0.0078125, %v9728_v40  ;;  %v9730_v38 = vld [vmem:[#allocation178_spill] sm:$0xff]  ;;  %v9733_v42 = vld [vmem:[#allocation69_spill] sm:$0xff] }
 0x49c   : > { %v5037_v1 = vpack.c.bf16 %v2184_v52, %v2184_v52  ;;  %v7915_v28 = vmul.f32 %v7880_v10, %v7818_v5  ;;  %v7917_v60 = vpop.eup %5554  ;;  %5570 = vrsqrt.f32 %v3351_v61  ;;  %v3353_v17 = vadd.f32 1.1920929e-07, %v3321_v53  ;;  %v9732_v52 = vld [vmem:[#allocation179_spill] sm:$0xff]  ;;  %v9734_v53 = vld [vmem:[#allocation180_spill] sm:$0xff] }
 0x49d   : > { %v3323_v2 = vmul.f32 0.0078125, %v9730_v38  ;;  %v7923_v45 = vmul.f32 %v7897_v62, %v1516_v46  ;;  %5572 = vrsqrt.f32 %v3354_v33  ;;  %v3356_v39 = vadd.f32 1.1920929e-07, %v3324_v18  ;;  %v7929_v5 = vpop.eup %5556  ;;  %v9736_v38 = vld [vmem:[#allocation181_spill] sm:$0xff] }
 0x49e   : > { %2666 = vst [vmem:[%s7263_s0 + $0xb8] sm:$0xf] %v5037_v1  ;;  %2057 = vrot.lane.b32.xlu0 %v7734_v21, %s6070_s24  ;;  %9729 = vst [vmem:[#allocation43_spill] sm:$0xff] %v7915_v28  ;;  %v3326_v21 = vmul.f32 0.0078125, %v9732_v52  ;;  %v7927_v1 = vmul.f32 %v5543_v8, %v9733_v42  ;;  %5574 = vrsqrt.f32 %v1911_v50  ;;  %v1913_v61 = vadd.f32 1.1920929e-07, %v1881_v29  ;;  %v9737_v18 = vld [vmem:[#allocation77_spill] sm:$0xff] }
 0x49f   : > { %3529 = vrot.lane.b32.xlu1 %v7702_v31, %s6070_s24  ;;  %9731 = vst [vmem:[#allocation48_spill] sm:$0xff] %v7923_v45  ;;  %v1883_v14 = vmul.f32 0.0078125, %v9734_v53  ;;  %v7934_v40 = vmul.f32 %v7905_v47, %v7846_v26  ;;  %5576 = vrsqrt.f32 %v1914_v12  ;;  %v1916_v31 = vadd.f32 1.1920929e-07, %v1884_v19  ;;  %v7942_v52 = vpop.eup %5558  ;;  %v9738_v29 = vld [vmem:[#allocation182_spill] sm:$0xff]  ;;  %v9740_v53 = vld [vmem:[#allocation183_spill] sm:$0xff] }
 0x4a0   : > { %v1886_v33 = vmul.f32 0.0078125, %v9736_v38  ;;  %v7940_v8 = vmul.f32 %v5545_v32, %v9737_v18  ;;  %5578 = vrsqrt.f32 %v3353_v17  ;;  %v3355_v50 = vadd.f32 1.1920929e-07, %v3323_v2  ;;  %v9739_v26 = vld [vmem:[#allocation70_spill] sm:$0xff]  ;;  %v9742_v18 = vld [vmem:[#allocation184_spill] sm:$0xff]  ;;  %v9749_v28 = vld [vmem:[#allocation75_spill] sm:$0xff] }
 0x4a1   : > { %9735 = vst [vmem:[#allocation49_spill] sm:$0xff] %v7934_v40  ;;  %v3325_v42 = vmul.f32 0.0078125, %v9738_v29  ;;  %v7948_v12 = vmul.f32 %v5547_v51, %v9739_v26  ;;  %v7950_v19 = vpop.eup %5560  ;;  %5580 = vrsqrt.f32 %v3356_v39  ;;  %v3328_v32 = vmul.f32 0.0078125, %v9740_v53  ;;  %v9744_v39 = vld [vmem:[#allocation185_spill] sm:$0xff]  ;;  %v5690_v53 = vld [vmem:[%s6421_s23 + $0x8] sm:$0xff]  ;;  %v5691_v45 = vld [vmem:[%s6421_s23] sm:$0xff] }
 0x4a2   : > { %2089 = vrot.lane.b32.xlu0 %v7748_v7, %s6070_s24  ;;  %v3358_v7 = vadd.f32 1.1920929e-07, %v3326_v21  ;;  %v7955_v38 = vmul.f32 %v7927_v1, %v7874_v59  ;;  %v5563_v17 = vpop.eup %5562  ;;  %5582 = vrsqrt.f32 %v1913_v61  ;;  %v1915_v2 = vadd.f32 1.1920929e-07, %v1883_v14 }
 0x4a3   : > { %2059 = vrot.lane.b32.xlu1 %v7717_v0, %s6070_s24  ;;  %v1885_v29 = vmul.f32 0.0078125, %v9742_v18  ;;  %v9743_v0 = vld [vmem:[#allocation78_spill] sm:$0xff]  ;;  %v7961_v51 = vpop.eup %5564  ;;  %5584 = vrsqrt.f32 %v1916_v31  ;;  %v1918_v26 = vadd.f32 1.1920929e-07, %v1886_v33  ;;  %v1888_v21 = vmul.f32 0.0078125, %v9744_v39 }
 0x4a4   : > { %9741 = vst [vmem:[#allocation146_spill] sm:$0xff] %v7955_v38  ;;  %v7959_v40 = vmul.f32 %v5549_v57, %v9743_v0  ;;  %v7968_v59 = vmul.f32 %v5690_v53, %v7940_v8  ;;  %v7970_v61 = vpop.eup %5566  ;;  %5586 = vrsqrt.f32 %v3355_v50  ;;  %v3357_v14 = vadd.f32 1.1920929e-07, %v3325_v42  ;;  %v9746_v18 = vld [vmem:[#allocation186_spill] sm:$0xff]  ;;  %v9748_v0 = vld [vmem:[#allocation187_spill] sm:$0xff] }
 0x4a5   : > { %v3327_v57 = vmul.f32 0.0078125, %v9746_v18  ;;  %v7976_v31 = vmul.f32 %v7948_v12, %v1516_v46  ;;  %v7978_v33 = vpop.eup %5568  ;;  %5588 = vrsqrt.f32 %v3358_v7  ;;  %v3330_v39 = vmul.f32 0.0078125, %v9748_v0  ;;  %v9750_v18 = vld [vmem:[#allocation188_spill] sm:$0xff] }
 0x4a6   : > { %3499 = vrot.lane.b32.xlu0 %v7790_v48, %s6070_s24  ;;  %9745 = vst [vmem:[#allocation44_spill] sm:$0xff] %v7968_v59  ;;  %v3360_v48 = vadd.f32 1.1920929e-07, %v3328_v32  ;;  %v7983_v59 = vmul.f32 %v7901_v22, %v9749_v28  ;;  %v7985_v50 = vpop.eup %5570  ;;  %5590 = vrsqrt.f32 %v1915_v2  ;;  %v1917_v42 = vadd.f32 1.1920929e-07, %v1885_v29  ;;  %v9752_v32 = vld [vmem:[#allocation189_spill] sm:$0xff] }
 0x4a7   : > { %2091 = vrot.lane.b32.xlu1 %v7724_v34, %s6070_s24  ;;  %9747 = vst [vmem:[#allocation50_spill] sm:$0xff] %v7976_v31  ;;  %v1887_v38 = vmul.f32 0.0078125, %v9750_v18  ;;  %v7989_v34 = vmul.f32 %v5690_v53, %v7959_v40  ;;  %v7991_v46 = vpop.eup %5572  ;;  %5592 = vrsqrt.f32 %v1918_v26  ;;  %v1920_v7 = vadd.f32 1.1920929e-07, %v1888_v21  ;;  %v9753_v22 = vld [vmem:[#allocation81_spill] sm:$0xff]  ;;  %v9754_v53 = vld [vmem:[#allocation190_spill] sm:$0xff]  ;;  %v9755_v26 = vld [vmem:[#allocation76_spill] sm:$0xff] }
 0x4a8   : > { %v1890_v31 = vmul.f32 0.0078125, %v9752_v32  ;;  %v7998_v28 = vmul.f32 %v7907_v16, %v9753_v22  ;;  %v8000_v2 = vpop.eup %5574  ;;  %5594 = vrsqrt.f32 %v3357_v14  ;;  %v3359_v29 = vadd.f32 1.1920929e-07, %v3327_v57  ;;  %v9756_v16 = vld [vmem:[#allocation191_spill] sm:$0xff]  ;;  %v9757_v22 = vld [vmem:[#allocation82_spill] sm:$0xff] }
 0x4a9   : > { %9751 = vst [vmem:[#allocation148_spill] sm:$0xff] %v7989_v34  ;;  %v3329_v0 = vmul.f32 0.0078125, %v9754_v53  ;;  %v8007_v21 = vmul.f32 %v7917_v60, %v9755_v26  ;;  %v8009_v18 = vpop.eup %5576  ;;  %5596 = vrsqrt.f32 %v3360_v48  ;;  %v3332_v32 = vmul.f32 0.0078125, %v9756_v16 }
 0x4aa   : > { %3531 = vrot.lane.b32.xlu0 %v7830_v54, %s6070_s24  ;;  %v3362_v54 = vadd.f32 1.1920929e-07, %v3330_v39  ;;  %v8014_v34 = vmul.f32 %v7929_v5, %v9757_v22  ;;  %v8016_v14 = vpop.eup %5578  ;;  %5598 = vrsqrt.f32 %v1917_v42  ;;  %v1919_v57 = vadd.f32 1.1920929e-07, %v1887_v38  ;;  %v9760_v39 = vld [vmem:[#allocation193_spill] sm:$0xff]  ;;  %v9761_v5 = vld [vmem:[#allocation79_spill] sm:$0xff] }
 0x4ab   : > { %3501 = vrot.lane.b32.xlu1 %v7737_v4, %s6070_s24  ;;  %v9758_v4 = vld [vmem:[#allocation192_spill] sm:$0xff]  ;;  %v8021_v60 = vmul.f32 %v5691_v45, %v7983_v59  ;;  %v5581_v26 = vpop.eup %5580  ;;  %5600 = vrsqrt.f32 %v1920_v7  ;;  %v1922_v48 = vadd.f32 1.1920929e-07, %v1890_v31  ;;  %v1892_v16 = vmul.f32 0.0078125, %v9760_v39  ;;  %v5692_v7 = vld [vmem:[%s6421_s23 + $0x18] sm:$0xff] }
 0x4ac   : > { %v1889_v53 = vmul.f32 0.0078125, %v9758_v4  ;;  %v8028_v22 = vmul.f32 %v7942_v52, %v9761_v5  ;;  %v5583_v42 = vpop.eup %5582  ;;  %5602 = vrsqrt.f32 %v3359_v29  ;;  %v3361_v38 = vadd.f32 1.1920929e-07, %v3329_v0  ;;  %v9762_v4 = vld [vmem:[#allocation80_spill] sm:$0xff]  ;;  %v9766_v5 = vld [vmem:[#allocation194_spill] sm:$0xff] }
 0x4ad   : > { %9759 = vst [vmem:[#allocation45_spill] sm:$0xff] %v8021_v60  ;;  %v8033_v60 = vmul.f32 %v5563_v17, %v9762_v4  ;;  %v8037_v31 = vmul.f32 %v5692_v7, %v7998_v28  ;;  %v5585_v39 = vpop.eup %5584  ;;  %5604 = vrsqrt.f32 %v3362_v54  ;;  %v8040_v52 = vmul.f32 %v5691_v45, %v8007_v21  ;;  %v9767_v4 = vld [vmem:[#allocation85_spill] sm:$0xff]  ;;  %v9768_v54 = vld [vmem:[#allocation195_spill] sm:$0xff]  ;;  %v5693_v45 = vld [vmem:[%s6421_s23 + $0x10] sm:$0xff] }
 0x4ae   : > { %2061 = vrot.lane.b32.xlu0 %v7862_v30, %s6070_s24  ;;  %v3364_v30 = vadd.f32 1.1920929e-07, %v3332_v32  ;;  %v8043_v29 = vmul.f32 %v5692_v7, %v8014_v34  ;;  %v5587_v0 = vpop.eup %5586  ;;  %5606 = vrsqrt.f32 %v1919_v57  ;;  %v3331_v17 = vmul.f32 0.0078125, %v9766_v5 }
 0x4af   : > { %3533 = vrot.lane.b32.xlu1 %v7772_v55, %s6070_s24  ;;  %9763 = vst [vmem:[#allocation55_spill] sm:$0xff] %v8037_v31  ;;  %9764 = vst [vmem:[#allocation46_spill] sm:$0xff] %v8040_v52  ;;  %v1921_v55 = vadd.f32 1.1920929e-07, %v1889_v53  ;;  %v8048_v20 = vmul.f32 %v7950_v19, %v9767_v4  ;;  %v5589_v31 = vpop.eup %5588  ;;  %5608 = vrsqrt.f32 %v1922_v48  ;;  %v1924_v23 = vadd.f32 1.1920929e-07, %v1892_v16  ;;  %v9770_v53 = vld [vmem:[#allocation196_spill] sm:$0xff]  ;;  %v9771_v19 = vld [vmem:[#allocation86_spill] sm:$0xff] }
 0x4b0   : > { %9765 = vst [vmem:[#allocation56_spill] sm:$0xff] %v8043_v29  ;;  %v3334_v32 = vmul.f32 0.0078125, %v9768_v54  ;;  %v8055_v7 = vmul.f32 %v5693_v45, %v8028_v22  ;;  %v5591_v57 = vpop.eup %5590  ;;  %5610 = vrsqrt.f32 %v3361_v38  ;;  %v1891_v5 = vmul.f32 0.0078125, %v9770_v53  ;;  %v9775_v29 = vld [vmem:[#allocation83_spill] sm:$0xff]  ;;  %v9776_v38 = vld [vmem:[#allocation89_spill] sm:$0xff] }
 0x4b1   : > { %v8062_v48 = vmul.f32 %v7961_v51, %v9771_v19  ;;  %v8065_v16 = vmul.f32 %v5693_v45, %v8033_v60  ;;  %v5593_v4 = vpop.eup %5592  ;;  %5612 = vrsqrt.f32 %v3364_v30  ;;  %v8074_v53 = vmul.f32 %v7978_v33, %v9776_v38  ;;  %v9778_v51 = vld [vmem:[#allocation198_spill] sm:$0xff] }
 0x4b2   : > { %2093 = vrot.lane.b32.xlu0 %v7897_v62, %s6070_s24  ;;  %9769 = vst [vmem:[#allocation151_spill] sm:$0xff] %v8055_v7  ;;  %v9774_v62 = vld [vmem:[#allocation197_spill] sm:$0xff]  ;;  %v8070_v7 = vmul.f32 %v7970_v61, %v9775_v29  ;;  %5614 = vrsqrt.f32 %v1921_v55  ;;  %v3363_v52 = vadd.f32 1.1920929e-07, %v3331_v17  ;;  %v3333_v19 = vmul.f32 0.0078125, %v9778_v51  ;;  %v9781_v61 = vld [vmem:[#allocation90_spill] sm:$0xff]  ;;  %v9783_v17 = vld [vmem:[#allocation200_spill] sm:$0xff] }
 0x4b3   : > { %2063 = vrot.lane.b32.xlu1 %v7804_v13, %s6070_s24  ;;  %9772 = vst [vmem:[#allocation51_spill] sm:$0xff] %v8062_v48  ;;  %9773 = vst [vmem:[#allocation57_spill] sm:$0xff] %v8065_v16  ;;  %v1894_v54 = vmul.f32 0.0078125, %v9774_v62  ;;  %v5595_v13 = vpop.eup %5594  ;;  %v8079_v45 = vmul.f32 %v7985_v50, %v9779_v6  ;;  %5616 = vrsqrt.f32 %v1924_v23  ;;  %v3366_v62 = vadd.f32 1.1920929e-07, %v3334_v32  ;;  %v9780_v16 = vld [vmem:[#allocation199_spill] sm:$0xff]  ;;  %v9785_v50 = vld [vmem:[#allocation93_spill] sm:$0xff] }
 0x4b4   : > { %9777 = vst [vmem:[#allocation52_spill] sm:$0xff] %v8074_v53  ;;  %v5597_v30 = vpop.eup %5596  ;;  %v3336_v63 = vmul.f32 0.0078125, %v9780_v16  ;;  %v8086_v33 = vmul.f32 %v7991_v46, %v9781_v61  ;;  %v1923_v55 = vadd.f32 1.1920929e-07, %v1891_v5  ;;  %v1893_v38 = vmul.f32 0.0078125, %v9783_v17  ;;  %v9784_v6 = vld [vmem:[#allocation87_spill] sm:$0xff]  ;;  %v9787_v51 = vld [vmem:[#allocation201_spill] sm:$0xff] }
 0x4b5   : > { %v5599_v29 = vpop.eup %5598  ;;  %v8093_v23 = vmul.f32 %v8000_v2, %v9784_v6  ;;  %v8097_v32 = vmul.f32 %v8009_v18, %v9785_v50  ;;  %v1926_v16 = vadd.f32 1.1920929e-07, %v1894_v54  ;;  %v1896_v46 = vmul.f32 0.0078125, %v9787_v51  ;;  %v9788_v61 = vld [vmem:[#allocation88_spill] sm:$0xff]  ;;  %v9789_v17 = vld [vmem:[#allocation94_spill] sm:$0xff]  ;;  %v9793_v50 = vld [vmem:[#allocation203_spill] sm:$0xff] }
 0x4b6   : > { %3503 = vrot.lane.b32.xlu0 %v7927_v1, %s6070_s24  ;;  %9782 = vst [vmem:[#allocation53_spill] sm:$0xff] %v8086_v33  ;;  %v5601_v1 = vpop.eup %5600  ;;  %v8102_v5 = vmul.f32 %v8016_v14, %v9788_v61  ;;  %v8105_v33 = vmul.f32 %v5581_v26, %v9789_v17  ;;  %5618 = vrsqrt.f32 %v3363_v52  ;;  %v3365_v53 = vadd.f32 1.1920929e-07, %v3333_v19  ;;  %v9791_v2 = vld [vmem:[#allocation202_spill] sm:$0xff]  ;;  %v9794_v14 = vld [vmem:[#allocation97_spill] sm:$0xff]  ;;  %v9796_v19 = vld [vmem:[#allocation204_spill] sm:$0xff] }
 0x4b7   : > { %2095 = vrot.lane.b32.xlu1 %v7839_v27, %s6070_s24  ;;  %9786 = vst [vmem:[#allocation58_spill] sm:$0xff] %v8097_v32  ;;  %v5603_v27 = vpop.eup %5602  ;;  %v3335_v6 = vmul.f32 0.0078125, %v9791_v2  ;;  %v8109_v48 = vmul.f32 %v5583_v42, %v9792_v25  ;;  %5620 = vrsqrt.f32 %v3366_v62  ;;  %v3368_v54 = vadd.f32 1.1920929e-07, %v3336_v63  ;;  %v9797_v25 = vld [vmem:[#allocation92_spill] sm:$0xff] }
 0x4b8   : > { %9790 = vst [vmem:[#allocation152_spill] sm:$0xff] %v8105_v33  ;;  %v5605_v18 = vpop.eup %5604  ;;  %v3338_v51 = vmul.f32 0.0078125, %v9793_v50  ;;  %v8115_v61 = vmul.f32 %v5585_v39, %v9794_v14  ;;  %5622 = vrsqrt.f32 %v1923_v55  ;;  %v1925_v52 = vadd.f32 1.1920929e-07, %v1893_v38  ;;  %v9801_v39 = vld [vmem:[#allocation98_spill] sm:$0xff] }
 0x4b9   : > { %v5607_v26 = vpop.eup %5606  ;;  %v1895_v17 = vmul.f32 0.0078125, %v9796_v19  ;;  %v8121_v42 = vmul.f32 %v5587_v0, %v9797_v25  ;;  %5624 = vrsqrt.f32 %v1926_v16  ;;  %v1928_v62 = vadd.f32 1.1920929e-07, %v1896_v46  ;;  %v9803_v19 = vld [vmem:[#allocation96_spill] sm:$0xff] }
 0x4ba   : > { %3535 = vrot.lane.b32.xlu0 %v7948_v12, %s6070_s24  ;;  %9795 = vst [vmem:[#allocation54_spill] sm:$0xff] %v8115_v61  ;;  %v5609_v63 = vpop.eup %5608  ;;  %v9799_v12 = vld [vmem:[#allocation95_spill] sm:$0xff]  ;;  %v8129_v14 = vmul.f32 %v5589_v31, %v9801_v39  ;;  %5626 = vrsqrt.f32 %v3365_v53  ;;  %v3367_v38 = vadd.f32 1.1920929e-07, %v3335_v6  ;;  %v8132_v61 = vmul.f32 %v5595_v13, %v9803_v19  ;;  %v9809_v31 = vld [vmem:[#allocation102_spill] sm:$0xff]  ;;  %v9811_v13 = vld [vmem:[#allocation205_spill] sm:$0xff] }
 0x4bb   : > { %3505 = vrot.lane.b32.xlu1 %v7880_v10, %s6070_s24  ;;  %9798 = vst [vmem:[#allocation63_spill] sm:$0xff] %v8121_v42  ;;  %v8126_v50 = vmul.f32 %v5591_v57, %v9799_v12  ;;  %v5611_v55 = vpop.eup %5610  ;;  %v9805_v10 = vld [vmem:[#allocation101_spill] sm:$0xff]  ;;  %5628 = vrsqrt.f32 %v3368_v54  ;;  %v3370_v16 = vadd.f32 1.1920929e-07, %v3338_v51  ;;  %v9807_v57 = vld [vmem:[#allocation99_spill] sm:$0xff]  ;;  %v8143_v12 = vmul.f32 %v5597_v30, %v9809_v31  ;;  %v9814_v51 = vld [vmem:[#allocation100_spill] sm:$0xff] }
 0x4bc   : > { %v8123_v2 = vpop.xlane.xlu0 %1869  ;;  %9802 = vst [vmem:[#allocation59_spill] sm:$0xff] %v8129_v14  ;;  %9804 = vst [vmem:[#allocation65_spill] sm:$0xff] %v8132_v61  ;;  %v8135_v0 = vmul.f32 %v5593_v4, %v9805_v10  ;;  %v5613_v25 = vpop.eup %5612  ;;  %v8140_v46 = vmul.f32 %v5599_v29, %v9807_v57  ;;  %5630 = vrsqrt.f32 %v1925_v52  ;;  %v1927_v6 = vadd.f32 1.1920929e-07, %v1895_v17  ;;  %v9812_v4 = vld [vmem:[#allocation105_spill] sm:$0xff]  ;;  %v9816_v30 = vld [vmem:[#allocation103_spill] sm:$0xff] }
 0x4bd   : > { %9800 = vst [vmem:[#allocation64_spill] sm:$0xff] %v8126_v50  ;;  %9810 = vst [vmem:[#allocation154_spill] sm:$0xff] %v8143_v12  ;;  %v5615_v53 = vpop.eup %5614  ;;  %v3337_v39 = vmul.f32 0.0078125, %v9811_v13  ;;  %v8149_v54 = vmul.f32 %v5601_v1, %v9812_v4  ;;  %5632 = vrsqrt.f32 %v1928_v62  ;;  %v8154_v19 = vmul.f32 %v5603_v27, %v9814_v51  ;;  %v9818_v52 = vld [vmem:[#allocation106_spill] sm:$0xff]  ;;  %v9820_v62 = vld [vmem:[#allocation109_spill] sm:$0xff] }
 0x4be   : > { %9806 = vst [vmem:[#allocation153_spill] sm:$0xff] %v8135_v0  ;;  %2225 = vrot.lane.b32.xlu0 %v7983_v59, %s6070_s24  ;;  %9808 = vst [vmem:[#allocation60_spill] sm:$0xff] %v8140_v46  ;;  %v5617_v59 = vpop.eup %5616  ;;  %v8157_v10 = vmul.f32 %v5607_v26, %v9816_v30  ;;  %v8160_v17 = vmul.f32 %v5605_v18, %v9818_v52  ;;  %5634 = vrsqrt.f32 %v3367_v38  ;;  %v9822_v27 = vld [vmem:[#allocation104_spill] sm:$0xff]  ;;  %v9824_v18 = vld [vmem:[#allocation107_spill] sm:$0xff] }
 0x4bf   : > { %3537 = vrot.lane.b32.xlu1 %v7905_v47, %s6070_s24  ;;  %9813 = vst [vmem:[#allocation156_spill] sm:$0xff] %v8149_v54  ;;  %9815 = vst [vmem:[#allocation66_spill] sm:$0xff] %v8154_v19  ;;  %v1898_v47 = vmul.f32 0.0078125, %v7289_v35  ;;  %v8167_v57 = vmul.f32 %v5609_v63, %v9820_v62  ;;  %5636 = vrsqrt.f32 %v3370_v16  ;;  %v8172_v26 = vmul.f32 %v5611_v55, %v9822_v27  ;;  %v9826_v38 = vld [vmem:[#allocation110_spill] sm:$0xff]  ;;  %v9828_v63 = vld [vmem:[#allocation113_spill] sm:$0xff]  ;;  %v1327_v55 = vpop.f32.mrb[32].mxu0 }
 0x4c0   : > { %v3488_v29 = vpop.permute.xlu0 %3487  ;;  %9817 = vst [vmem:[#allocation157_spill] sm:$0xff] %v8157_v10  ;;  %9819 = vst [vmem:[#allocation158_spill] sm:$0xff] %v8160_v17  ;;  %v8175_v31 = vmul.f32 %v5615_v53, %v9824_v18  ;;  %v8178_v13 = vmul.f32 %v5613_v25, %v9826_v38  ;;  %v5619_v35 = vpop.eup %5618  ;;  %5638 = vrsqrt.f32 %v1927_v6  ;;  %v3369_v4 = vadd.f32 1.1920929e-07, %v3337_v39  ;;  %v2386_v16 = vld [vmem:[%s6435_s14] sm:$0xff]  }
 0x4c1   : > { %v3545_v1 = vmul.f32 %v3488_v29, %v7745_v56  ;;  %9821 = vst [vmem:[#allocation61_spill] sm:$0xff] %v8167_v57  ;;  %9823 = vst [vmem:[#allocation159_spill] sm:$0xff] %v8172_v26  ;;  %v2387_v29 = vld [vmem:[%s6435_s14 + $0x8] sm:$0xff]   ;;  %v8188_v53 = vpop.eup %5620  ;;  %v2418_v25 = vunpack.c.l.bf16 %v2386_v16  ;;  %v1329_v30 = vpop.f32.mrb[33].mxu0  ;;  %v3859_v6 = vunpack.c.h.bf16 %v2386_v16  ;;  %v8204_v16 = vstv %s8162_s3 }
 0x4c2   : > { %3667 = vrot.lane.b32.xlu0 %v8007_v21, %s6070_s24  ;;  %9825 = vst [vmem:[#allocation160_spill] sm:$0xff] %v8175_v31  ;;  %9827 = vst [vmem:[#allocation71_spill] sm:$0xff] %v8178_v13  ;;  %v8184_v21 = vmul.f32 %v5617_v59, %v9828_v63  ;;  %v2419_v39 = vunpack.c.l.bf16 %v2387_v29  ;;  %v3860_v52 = vunpack.c.h.bf16 %v2387_v29  ;;  %v8194_v59 = vstv %s8151_s2  ;;  %v1331_v27 = vpop.f32.mrb[34].mxu0 }
 0x4c3   : > { %v3577_v56 = vadd.f32 %v3545_v1, %v7646_v58  ;;  %2227 = vrot.lane.b32.xlu1 %v7940_v8, %s6070_s24  ;;  %v8190_v58 = vpop.eup %5622  ;;  %v1930_v1 = vadd.f32 1.1920929e-07, %v1898_v47  ;;  %v2354_v63 = vmul.f32 %v8194_v59, %v1327_v55  ;;  %v3795_v29 = vmul.f32 %v8194_v59, %v1329_v30 }
 0x4c4   : > { %9829 = vst [vmem:[#allocation161_spill] sm:$0xff] %v8184_v21  ;;  %v3520_v51 = vpop.permute.xlu0 %3519  ;;  %v8196_v18 = vpop.eup %5624  ;;  %v2355_v47 = vmul.f32 %v8194_v59, %v1331_v27  ;;  %5640 = vrsqrt.f32 %v3369_v4  ;;  %v3891_v13 = vmul.f32 %v3859_v6, %v8204_v16  ;;  %v2452_v30 = vmul.f32 %v8204_v16, %v2419_v39  ;;  %v9830_v4 = vld [vmem:[#allocation108_spill] sm:$0xff] }
 0x4c5   : > { %v3609_v8 = vmul.f32 0.12, %v3577_v56  ;;  %v3561_v62 = vmul.f32 %v3520_v51, %v7787_v9  ;;  %v1333_v9 = vpop.f32.mrb[35].mxu0  ;;  %v8208_v56 = vpop.eup %5626  ;;  %v3892_v57 = vmul.f32 %v3860_v52, %v8204_v16  ;;  %5642 = vrsqrt.f32 %v1930_v1 }
 0x4c6   : > { %2229 = vrot.lane.b32.xlu0 %v8028_v22, %s6070_s24  ;;  %v8200_v38 = vpop.xlane.xlu1 %1871  ;;  %v2451_v22 = vmul.f32 %v8204_v16, %v2418_v25  ;;  %v8214_v55 = vpop.eup %5628  ;;  %v3796_v27 = vmul.f32 %v8194_v59, %v1333_v9  ;;  %v1897_v6 = vmul.f32 0.0078125, %v7297_v37  ;;  %v3923_v52 = vadd.f32 %v3891_v13, %v3795_v29 }
 0x4c7   : > { %v5116_v51 = vpack.c.bf16 %v3609_v8, %v3609_v8  ;;  %v3593_v21 = vadd.f32 %v3561_v62, %v7649_v3  ;;  %3669 = vrot.lane.b32.xlu1 %v7959_v40, %s6070_s24  ;;  %v8220_v17 = vpop.eup %5630  ;;  %v8224_v8 = vmul.f32 %v5619_v35, %v9830_v4  ;;  %v2484_v62 = vadd.f32 %v2452_v30, %v2355_v47 }
 0x4c8   : > { %v2483_v40 = vadd.f32 %v2451_v22, %v2354_v63  ;;  %v8226_v25 = vpop.eup %5632  ;;  %v3924_v9 = vadd.f32 %v3892_v57, %v3796_v27  ;;  %v3340_v35 = vmul.f32 0.0078125, %v7329_v24  ;;  %v2388_v22 = vld [vmem:[%s6435_s14 + $0x10] sm:$0xff]   ;;  %v3339_v57 = vmul.f32 0.0078125, %v7339_v15 }
 0x4c9   : > { %4089 = vst [vmem:[%s7263_s0 + $0x34] sm:$0xf] %v5116_v51  ;;  %v3625_v3 = vmul.f32 0.12, %v3593_v21  ;;  %9831 = vst [vmem:[#allocation162_spill] sm:$0xff] %v8224_v8  ;;  %v8231_v1 = vpop.eup %5634  ;;  %v1337_v51 = vpop.f32.mrb[36].mxu0  ;;  %v5174_v13 = vpack.c.bf16 %v3923_v52, %v3923_v52  ;;  %v5079_v29 = vpack.c.bf16 %v2484_v62, %v2484_v62  ;;  %v3861_v27 = vunpack.c.h.bf16 %v2388_v22 }
 0x4ca   : > { %3671 = vrot.lane.b32.xlu0 %v8033_v60, %s6070_s24  ;;  %v3490_v39 = vpop.permute.xlu1 %3489  ;;  %v5078_v37 = vpack.c.bf16 %v2483_v40, %v2483_v40  ;;  %v2389_v60 = vld [vmem:[%s6435_s14 + $0x18] sm:$0xff]   ;;  %v8239_v4 = vpop.eup %5636  ;;  %v5175_v47 = vpack.c.bf16 %v3924_v9, %v3924_v9 }
 0x4cb   : > { %v5132_v21 = vpack.c.bf16 %v3625_v3, %v3625_v3  ;;  %v3546_v63 = vmul.f32 %v3490_v39, %v7827_v44  ;;  %2231 = vrot.lane.b32.xlu1 %v7998_v28, %s6070_s24  ;;  %v1339_v30 = vpop.f32.mrb[37].mxu0  ;;  %v8242_v24 = vpop.eup %5638  ;;  %v2420_v28 = vunpack.c.l.bf16 %v2388_v22  ;;  %v2421_v15 = vunpack.c.l.bf16 %v2389_v60  ;;  %4403 = vst [vmem:[%s8247_s29 + $0x4] sm:$0xf] %v5174_v13  ;;  %2964 = vst [vmem:[%s8247_s29 + $0x8] sm:$0xf] %v5079_v29 }
 0x4cc   : > { %2963 = vst [vmem:[%s8247_s29] sm:$0xf] %v5078_v37  ;;  %v1341_v3 = vpop.f32.mrb[38].mxu0  ;;  %4404 = vst [vmem:[%s8247_s29 + $0xc] sm:$0xf] %v5175_v47  ;;  %v3797_v39 = vmul.f32 %v8194_v59, %v1339_v30  ;;  %v3862_v9 = vunpack.c.h.bf16 %v2389_v60  ;;  %v3893_v22 = vmul.f32 %v3861_v27, %v8204_v16  ;;  %v1899_v13 = vmul.f32 0.0078125, %v7408_v11 }
 0x4cd   : > { %4105 = vst [vmem:[%s7263_s0 + $0xb4] sm:$0xf] %v5132_v21  ;;  %v3578_v44 = vadd.f32 %v3546_v63, %v7625_v41  ;;  %v2356_v41 = vmul.f32 %v8194_v59, %v1337_v51  ;;  %v2357_v52 = vmul.f32 %v8194_v59, %v1341_v3  ;;  %v1343_v62 = vpop.f32.mrb[39].mxu0  ;;  %v2453_v37 = vmul.f32 %v8204_v16, %v2420_v28 }
 0x4ce   : > { %2233 = vrot.lane.b32.xlu0 %v8070_v7, %s6070_s24  ;;  %v3522_v40 = vpop.permute.xlu1 %3521  ;;  %v2454_v51 = vmul.f32 %v8204_v16, %v2421_v15  ;;  %v3798_v29 = vmul.f32 %v8194_v59, %v1343_v62  ;;  %v3894_v47 = vmul.f32 %v3862_v9, %v8204_v16  ;;  %v8267_v60 = vpop.eup %5640  ;;  %v1929_v28 = vadd.f32 1.1920929e-07, %v1897_v6  ;;  %v2390_v6 = vld [vmem:[%s6435_s14 + $0x20] sm:$0xff]  }
 0x4cf   : > { %v3610_v21 = vmul.f32 0.12, %v3578_v44  ;;  %v3562_v63 = vmul.f32 %v3522_v40, %v7852_v36  ;;  %3673 = vrot.lane.b32.xlu1 %v8014_v34, %s6070_s24  ;;  %v2485_v34 = vadd.f32 %v2453_v37, %v2356_v41  ;;  %v3925_v44 = vadd.f32 %v3893_v22, %v3797_v39  ;;  %v8272_v15 = vpop.eup %5642  ;;  %v1347_v39 = vpop.f32.mrb[40].mxu0 }
 0x4d0   : > { %v3372_v27 = vadd.f32 1.1920929e-07, %v3340_v35  ;;  %v2486_v11 = vadd.f32 %v2454_v51, %v2357_v52  ;;  %v3926_v3 = vadd.f32 %v3894_v47, %v3798_v29  ;;  %v3371_v40 = vadd.f32 1.1920929e-07, %v3339_v57  ;;  %v2391_v35 = vld [vmem:[%s6435_s14 + $0x28] sm:$0xff]  }
 0x4d1   : > { %v5117_v30 = vpack.c.bf16 %v3610_v21, %v3610_v21  ;;  %v3594_v36 = vadd.f32 %v3562_v63, %v7636_v49  ;;  %v5080_v49 = vpack.c.bf16 %v2485_v34, %v2485_v34  ;;  %v5176_v41 = vpack.c.bf16 %v3925_v44, %v3925_v44  ;;  %v1349_v63 = vpop.f32.mrb[41].mxu0 }
 0x4d2   : > { %3675 = vrot.lane.b32.xlu0 %v8079_v45, %s6070_s24  ;;  %v5081_v9 = vpack.c.bf16 %v2486_v11, %v2486_v11  ;;  %v5177_v52 = vpack.c.bf16 %v3926_v3, %v3926_v3  ;;  %v2422_v21 = vunpack.c.l.bf16 %v2390_v6  ;;  %v3863_v37 = vunpack.c.h.bf16 %v2390_v6  ;;  %v1351_v51 = vpop.f32.mrb[42].mxu0  ;;  %v9832_v11 = vld [vmem:[#allocation51_spill] sm:$0xff] }
 0x4d3   : > { %4090 = vst [vmem:[%s7263_s0 + $0x3c] sm:$0xf] %v5117_v30  ;;  %v3626_v62 = vmul.f32 0.12, %v3594_v36  ;;  %2235 = vrot.lane.b32.xlu1 %v8048_v20, %s6070_s24  ;;  %v1931_v57 = vadd.f32 1.1920929e-07, %v1899_v13  ;;  %v2423_v29 = vunpack.c.l.bf16 %v2391_v35  ;;  %v3864_v47 = vunpack.c.h.bf16 %v2391_v35  ;;  %v1353_v13 = vpop.f32.mrb[43].mxu0 }
 0x4d4   : > { %2965 = vst [vmem:[%s8247_s29 + $0x10] sm:$0xf] %v5080_v49  ;;  %4405 = vst [vmem:[%s8247_s29 + $0x14] sm:$0xf] %v5176_v41  ;;  %v1900_v30 = vmul.f32 0.0078125, %v7415_v43  ;;  %v2358_v36 = vmul.f32 %v8194_v59, %v1347_v39  ;;  %v2455_v34 = vmul.f32 %v8204_v16, %v2422_v21  ;;  %v3799_v44 = vmul.f32 %v8194_v59, %v1349_v63  ;;  %v9833_v41 = vld [vmem:[#allocation114_spill] sm:$0xff] }
 0x4d5   : > { %v5133_v22 = vpack.c.bf16 %v3626_v62, %v3626_v62  ;;  %2966 = vst [vmem:[%s8247_s29 + $0x18] sm:$0xf] %v5081_v9  ;;  %4406 = vst [vmem:[%s8247_s29 + $0x1c] sm:$0xf] %v5177_v52  ;;  %v3895_v3 = vmul.f32 %v3863_v37, %v8204_v16  ;;  %v2359_v43 = vmul.f32 %v8194_v59, %v1351_v51  ;;  %5644 = vrsqrt.f32 %v1929_v28  ;;  %v9835_v9 = vld [vmem:[#allocation32_spill] sm:$0xff]  ;;  %v9836_v28 = vld [vmem:[#allocation111_spill] sm:$0xff] }
 0x4d6   : > { %2237 = vrot.lane.b32.xlu0 %v8093_v23, %s6070_s24  ;;  %v2456_v62 = vmul.f32 %v8204_v16, %v2423_v29  ;;  %v3800_v49 = vmul.f32 %v8194_v59, %v1353_v13  ;;  %v8298_v39 = vmul.f32 %v8188_v53, %v9833_v41  ;;  %v2487_v6 = vadd.f32 %v2455_v34, %v2358_v36  ;;  %v1357_v36 = vpop.f32.mrb[44].mxu0  ;;  %v2393_v34 = vld [vmem:[%s6435_s14 + $0x38] sm:$0xff]  }
 0x4d7   : > { %4106 = vst [vmem:[%s7263_s0 + $0xbc] sm:$0xf] %v5133_v22  ;;  %3677 = vrot.lane.b32.xlu1 %v9832_v11, %s6070_s24  ;;  %v3896_v35 = vmul.f32 %v3864_v47, %v8204_v16  ;;  %5646 = vrsqrt.f32 %v3372_v27  ;;  %v3341_v52 = vmul.f32 0.0078125, %v9835_v9  ;;  %v3927_v21 = vadd.f32 %v3895_v3, %v3799_v44  ;;  %v9838_v27 = vld [vmem:[#allocation52_spill] sm:$0xff] }
 0x4d8   : > { %9834 = vst [vmem:[#allocation163_spill] sm:$0xff] %v8298_v39  ;;  %v2488_v63 = vadd.f32 %v2456_v62, %v2359_v43  ;;  %5648 = vrsqrt.f32 %v3371_v40  ;;  %v8306_v37 = vmul.f32 %v8190_v58, %v9836_v28  ;;  %v5082_v53 = vpack.c.bf16 %v2487_v6, %v2487_v6  ;;  %v2392_v40 = vld [vmem:[%s6435_s14 + $0x30] sm:$0xff]   ;;  %v1359_v58 = vpop.f32.mrb[45].mxu0 }
 0x4d9   : > { %v3928_v22 = vadd.f32 %v3896_v35, %v3800_v49  ;;  %5650 = vrsqrt.f32 %v1931_v57  ;;  %v1932_v51 = vadd.f32 1.1920929e-07, %v1900_v30  ;;  %v5178_v29 = vpack.c.bf16 %v3927_v21, %v3927_v21  ;;  %v9839_v57 = vld [vmem:[#allocation29_spill] sm:$0xff]  ;;  %v9840_v49 = vld [vmem:[#allocation30_spill] sm:$0xff]  ;;  %v1361_v6 = vpop.f32.mrb[46].mxu0 }
 0x4da   : > { %3679 = vrot.lane.b32.xlu0 %v8102_v5, %s6070_s24  ;;  %9837 = vst [vmem:[#allocation62_spill] sm:$0xff] %v8306_v37  ;;  %v5083_v47 = vpack.c.bf16 %v2488_v63, %v2488_v63  ;;  %2967 = vst [vmem:[%s8247_s29 + $0x20] sm:$0xf] %v5082_v53  ;;  %v2424_v13 = vunpack.c.l.bf16 %v2392_v40  ;;  %v3865_v3 = vunpack.c.h.bf16 %v2392_v40  ;;  %v2425_v43 = vunpack.c.l.bf16 %v2393_v34  ;;  %v1363_v28 = vpop.f32.mrb[47].mxu0  ;;  %v9841_v53 = vld [vmem:[#allocation53_spill] sm:$0xff] }
 0x4db   : > { %2239 = vrot.lane.b32.xlu1 %v9838_v27, %s6070_s24  ;;  %v5179_v44 = vpack.c.bf16 %v3928_v22, %v3928_v22  ;;  %v3373_v62 = vadd.f32 1.1920929e-07, %v3341_v52  ;;  %v3342_v30 = vmul.f32 0.0078125, %v9839_v57  ;;  %v1901_v41 = vmul.f32 0.0078125, %v9840_v49  ;;  %4407 = vst [vmem:[%s8247_s29 + $0x24] sm:$0xf] %v5178_v29  ;;  %v9844_v57 = vld [vmem:[#allocation128_spill] sm:$0xff] }
 0x4dc   : > { %2968 = vst [vmem:[%s8247_s29 + $0x28] sm:$0xf] %v5083_v47  ;;  %v3866_v35 = vunpack.c.h.bf16 %v2393_v34  ;;  %v2360_v9 = vmul.f32 %v8194_v59, %v1357_v36  ;;  %v2457_v21 = vmul.f32 %v8204_v16, %v2424_v13  ;;  %v3801_v63 = vmul.f32 %v8194_v59, %v1359_v58  ;;  %v9842_v36 = vld [vmem:[#allocation117_spill] sm:$0xff] }
 0x4dd   : > { %4408 = vst [vmem:[%s8247_s29 + $0x2c] sm:$0xf] %v5179_v44  ;;  %v3897_v52 = vmul.f32 %v3865_v3, %v8204_v16  ;;  %v2361_v22 = vmul.f32 %v8194_v59, %v1361_v6  ;;  %v2458_v29 = vmul.f32 %v8204_v16, %v2425_v43  ;;  %v3802_v47 = vmul.f32 %v8194_v59, %v1363_v28  ;;  %v9843_v58 = vld [vmem:[#allocation33_spill] sm:$0xff] }
 0x4de   : > { %2241 = vrot.lane.b32.xlu0 %v8109_v48, %s6070_s24  ;;  %v3898_v40 = vmul.f32 %v3866_v35, %v8204_v16  ;;  %5652 = vrsqrt.f32 %v1932_v51  ;;  %v8332_v34 = vmul.f32 %v8196_v18, %v9842_v36  ;;  %v2489_v44 = vadd.f32 %v2457_v21, %v2360_v9  ;;  %v9845_v18 = vld [vmem:[#allocation112_spill] sm:$0xff] }
 0x4df   : > { %3681 = vrot.lane.b32.xlu1 %v9841_v53, %s6070_s24  ;;  %v3929_v13 = vadd.f32 %v3897_v52, %v3801_v63  ;;  %v1902_v3 = vmul.f32 0.0078125, %v9843_v58  ;;  %v3343_v49 = vmul.f32 0.0078125, %v9844_v57  ;;  %v2490_v53 = vadd.f32 %v2458_v29, %v2361_v22  ;;  %v8336_v43 = vpop.eup %5644  ;;  %v2394_v29 = vld [vmem:[%s6435_s14 + $0x40] sm:$0xff]  }
 0x4e0   : > { %v3930_v6 = vadd.f32 %v3898_v40, %v3802_v47  ;;  %5654 = vrsqrt.f32 %v3373_v62  ;;  %v8342_v51 = vmul.f32 %v8208_v56, %v9845_v18  ;;  %v5084_v35 = vpack.c.bf16 %v2489_v44, %v2489_v44  ;;  %v1367_v62 = vpop.f32.mrb[48].mxu0  ;;  %v2395_v47 = vld [vmem:[%s6435_s14 + $0x48] sm:$0xff]  }
 0x4e1   : > { %v5180_v9 = vpack.c.bf16 %v3929_v13, %v3929_v13  ;;  %v8344_v21 = vpop.eup %5646  ;;  %v3374_v63 = vadd.f32 1.1920929e-07, %v3342_v30  ;;  %v1933_v52 = vadd.f32 1.1920929e-07, %v1901_v41  ;;  %v5085_v28 = vpack.c.bf16 %v2490_v53, %v2490_v53  ;;  %v1369_v36 = vpop.f32.mrb[49].mxu0  ;;  %v9847_v53 = vld [vmem:[#allocation141_spill] sm:$0xff] }
 0x4e2   : > { %3683 = vrot.lane.b32.xlu0 %v8121_v42, %s6070_s24  ;;  %9846 = vst [vmem:[#allocation164_spill] sm:$0xff] %v8342_v51  ;;  %v5181_v22 = vpack.c.bf16 %v3930_v6, %v3930_v6  ;;  %v8350_v40 = vpop.eup %5648  ;;  %2969 = vst [vmem:[%s8247_s29 + $0x30] sm:$0xf] %v5084_v35  ;;  %v2426_v56 = vunpack.c.l.bf16 %v2394_v29  ;;  %v3867_v44 = vunpack.c.h.bf16 %v2394_v29  ;;  %v2427_v13 = vunpack.c.l.bf16 %v2395_v47 }
 0x4e3   : > { %2243 = vrot.lane.b32.xlu1 %v8097_v32, %s6070_s24  ;;  %4409 = vst [vmem:[%s8247_s29 + $0x34] sm:$0xf] %v5180_v9  ;;  %v3868_v30 = vunpack.c.h.bf16 %v2395_v47  ;;  %v8354_v41 = vpop.eup %5650  ;;  %v1934_v58 = vadd.f32 1.1920929e-07, %v1902_v3  ;;  %v3375_v57 = vadd.f32 1.1920929e-07, %v3343_v49  ;;  %v3344_v6 = vmul.f32 0.0078125, %v9847_v53  ;;  %v1371_v32 = vpop.f32.mrb[50].mxu0 }
 0x4e4   : > { %v1903_v18 = vmul.f32 0.0078125, %v8123_v2  ;;  %2970 = vst [vmem:[%s8247_s29 + $0x38] sm:$0xf] %v5085_v28  ;;  %4410 = vst [vmem:[%s8247_s29 + $0x3c] sm:$0xf] %v5181_v22  ;;  %v2362_v35 = vmul.f32 %v8194_v59, %v1367_v62  ;;  %v2459_v9 = vmul.f32 %v8204_v16, %v2426_v56  ;;  %v3803_v29 = vmul.f32 %v8194_v59, %v1369_v36  ;;  %v1373_v3 = vpop.f32.mrb[51].mxu0 }
 0x4e5   : > { %v3899_v47 = vmul.f32 %v3867_v44, %v8204_v16  ;;  %v2363_v2 = vmul.f32 %v8194_v59, %v1371_v32  ;;  %v2460_v49 = vmul.f32 %v8204_v16, %v2427_v13  ;;  %v3804_v28 = vmul.f32 %v8194_v59, %v1373_v3  ;;  %v9848_v62 = vld [vmem:[#allocation118_spill] sm:$0xff] }
 0x4e6   : > { %2245 = vrot.lane.b32.xlu0 %v8126_v50, %s6070_s24  ;;  %v3900_v22 = vmul.f32 %v3868_v30, %v8204_v16  ;;  %5656 = vrsqrt.f32 %v3374_v63  ;;  %v8374_v56 = vmul.f32 %v8214_v55, %v9848_v62  ;;  %v2491_v36 = vadd.f32 %v2459_v9, %v2362_v35  ;;  %v9850_v63 = vld [vmem:[#allocation115_spill] sm:$0xff] }
 0x4e7   : > { %3685 = vrot.lane.b32.xlu1 %v8105_v33, %s6070_s24  ;;  %v3931_v53 = vadd.f32 %v3899_v47, %v3803_v29  ;;  %5658 = vrsqrt.f32 %v1933_v52  ;;  %v3376_v44 = vadd.f32 1.1920929e-07, %v3344_v6  ;;  %v2492_v33 = vadd.f32 %v2460_v49, %v2363_v2  ;;  %v9851_v6 = vld [vmem:[#allocation54_spill] sm:$0xff]  ;;  %v1377_v29 = vpop.f32.mrb[52].mxu0  ;;  %v2397_v47 = vld [vmem:[%s6435_s14 + $0x58] sm:$0xff]  }
 0x4e8   : > { %9849 = vst [vmem:[#allocation72_spill] sm:$0xff] %v8374_v56  ;;  %v3932_v50 = vadd.f32 %v3900_v22, %v3804_v28  ;;  %v8376_v32 = vpop.eup %5652  ;;  %5660 = vrsqrt.f32 %v1934_v58  ;;  %v8382_v55 = vmul.f32 %v8220_v17, %v9850_v63  ;;  %v5086_v13 = vpack.c.bf16 %v2491_v36, %v2491_v36  ;;  %v2396_v58 = vld [vmem:[%s6435_s14 + $0x50] sm:$0xff]   ;;  %v1379_v2 = vpop.f32.mrb[53].mxu0 }
 0x4e9   : > { %v5182_v30 = vpack.c.bf16 %v3931_v53, %v3931_v53  ;;  %5662 = vrsqrt.f32 %v3375_v57  ;;  %v1935_v52 = vadd.f32 1.1920929e-07, %v1903_v18  ;;  %v5087_v35 = vpack.c.bf16 %v2492_v33, %v2492_v33  ;;  %v9852_v22 = vld [vmem:[#allocation116_spill] sm:$0xff]  ;;  %v1381_v36 = vpop.f32.mrb[54].mxu0 }
 0x4ea   : > { %3687 = vrot.lane.b32.xlu0 %v8132_v61, %s6070_s24  ;;  %v5183_v9 = vpack.c.bf16 %v3932_v50, %v3932_v50  ;;  %v8388_v3 = vpop.eup %5654  ;;  %2971 = vst [vmem:[%s8247_s29 + $0x40] sm:$0xf] %v5086_v13  ;;  %v2428_v17 = vunpack.c.l.bf16 %v2396_v58  ;;  %v3869_v49 = vunpack.c.h.bf16 %v2396_v58  ;;  %v2429_v28 = vunpack.c.l.bf16 %v2397_v47  ;;  %v9853_v50 = vld [vmem:[#allocation121_spill] sm:$0xff] }
 0x4eb   : > { %2247 = vrot.lane.b32.xlu1 %v9851_v6, %s6070_s24  ;;  %4411 = vst [vmem:[%s8247_s29 + $0x44] sm:$0xf] %v5182_v30  ;;  %v3870_v57 = vunpack.c.h.bf16 %v2397_v47  ;;  %5664 = vrsqrt.f32 %v3376_v44  ;;  %v1904_v18 = vmul.f32 0.0078125, %v8200_v38  ;;  %v8395_v33 = vmul.f32 %v8231_v1, %v9852_v22  ;;  %2972 = vst [vmem:[%s8247_s29 + $0x48] sm:$0xf] %v5087_v35  ;;  %v1383_v1 = vpop.f32.mrb[55].mxu0 }
 0x4ec   : > { %v8399_v62 = vmul.f32 %v8226_v25, %v9853_v50  ;;  %4412 = vst [vmem:[%s8247_s29 + $0x4c] sm:$0xf] %v5183_v9  ;;  %v2364_v53 = vmul.f32 %v8194_v59, %v1377_v29  ;;  %v2461_v44 = vmul.f32 %v8204_v16, %v2428_v17  ;;  %v3805_v38 = vmul.f32 %v8194_v59, %v1379_v2  ;;  %v9855_v9 = vld [vmem:[#allocation122_spill] sm:$0xff]  ;;  %v9856_v2 = vld [vmem:[#allocation119_spill] sm:$0xff] }
 0x4ed   : > { %v3901_v63 = vmul.f32 %v3869_v49, %v8204_v16  ;;  %v2365_v25 = vmul.f32 %v8194_v59, %v1381_v36  ;;  %v2462_v13 = vmul.f32 %v8204_v16, %v2429_v28  ;;  %v3806_v30 = vmul.f32 %v8194_v59, %v1383_v1 }
 0x4ee   : > { %9854 = vst [vmem:[#allocation165_spill] sm:$0xff] %v8399_v62  ;;  %2249 = vrot.lane.b32.xlu0 %v8140_v46, %s6070_s24  ;;  %v3902_v35 = vmul.f32 %v3870_v57, %v8204_v16  ;;  %5666 = vrsqrt.f32 %v1935_v52  ;;  %v8417_v29 = vmul.f32 %v8239_v4, %v9855_v9  ;;  %v2493_v58 = vadd.f32 %v2461_v44, %v2364_v53  ;;  %v9857_v52 = vld [vmem:[#allocation120_spill] sm:$0xff]  ;;  %v9858_v57 = vld [vmem:[#allocation125_spill] sm:$0xff]  ;;  %v9859_v44 = vld [vmem:[#allocation123_spill] sm:$0xff] }
 0x4ef   : > { %3689 = vrot.lane.b32.xlu1 %v8129_v14, %s6070_s24  ;;  %v3933_v47 = vadd.f32 %v3901_v63, %v3805_v38  ;;  %v1936_v17 = vadd.f32 1.1920929e-07, %v1904_v18  ;;  %v8421_v49 = vmul.f32 %v8242_v24, %v9856_v2  ;;  %v2494_v22 = vadd.f32 %v2462_v13, %v2365_v25  ;;  %v9860_v63 = vld [vmem:[#allocation126_spill] sm:$0xff]  ;;  %v1387_v13 = vpop.f32.mrb[56].mxu0 }
 0x4f0   : > { %v3934_v28 = vadd.f32 %v3902_v35, %v3806_v30  ;;  %v5657_v50 = vpop.eup %5656  ;;  %v8427_v4 = vmul.f32 %v8267_v60, %v9857_v52  ;;  %v8431_v18 = vmul.f32 %v8272_v15, %v9858_v57  ;;  %v5088_v24 = vpack.c.bf16 %v2493_v58, %v2493_v58  ;;  %v2398_v30 = vld [vmem:[%s6435_s14 + $0x60] sm:$0xff]   ;;  %v2399_v15 = vld [vmem:[%s6435_s14 + $0x68] sm:$0xff]   ;;  %v1389_v58 = vpop.f32.mrb[57].mxu0  ;;  %v9862_v57 = vld [vmem:[#allocation124_spill] sm:$0xff] }
 0x4f1   : > { %v5184_v36 = vpack.c.bf16 %v3933_v47, %v3933_v47  ;;  %v5659_v53 = vpop.eup %5658  ;;  %v8437_v38 = vmul.f32 %v8336_v43, %v9859_v44  ;;  %v8441_v1 = vmul.f32 %v8344_v21, %v9860_v63  ;;  %v5089_v60 = vpack.c.bf16 %v2494_v22, %v2494_v22  ;;  %v9864_v63 = vld [vmem:[#allocation150_spill] sm:$0xff] }
 0x4f2   : > { %3691 = vrot.lane.b32.xlu0 %v8154_v19, %s6070_s24  ;;  %v5185_v25 = vpack.c.bf16 %v3934_v28, %v3934_v28  ;;  %v5661_v35 = vpop.eup %5660  ;;  %2973 = vst [vmem:[%s8247_s29 + $0x50] sm:$0xf] %v5088_v24  ;;  %v2430_v9 = vunpack.c.l.bf16 %v2398_v30  ;;  %v3871_v47 = vunpack.c.h.bf16 %v2398_v30  ;;  %v2431_v2 = vunpack.c.l.bf16 %v2399_v15  ;;  %v9863_v28 = vld [vmem:[#allocation147_spill] sm:$0xff] }
 0x4f3   : > { %2251 = vrot.lane.b32.xlu1 %v8135_v0, %s6070_s24  ;;  %9861 = vst [vmem:[#allocation166_spill] sm:$0xff] %v8441_v1  ;;  %4413 = vst [vmem:[%s8247_s29 + $0x54] sm:$0xf] %v5184_v36  ;;  %v3872_v43 = vunpack.c.h.bf16 %v2399_v15  ;;  %v5663_v52 = vpop.eup %5662  ;;  %5668 = vrsqrt.f32 %v1936_v17  ;;  %v8449_v22 = vmul.f32 %v8350_v40, %v9862_v57  ;;  %v8453_v44 = vmul.f32 %v8354_v41, %v9863_v28  ;;  %v1391_v36 = vpop.f32.mrb[58].mxu0 }
 0x4f4   : > { %v8457_v24 = vmul.f32 %v8376_v32, %v9864_v63  ;;  %2974 = vst [vmem:[%s8247_s29 + $0x58] sm:$0xf] %v5089_v60  ;;  %4414 = vst [vmem:[%s8247_s29 + $0x5c] sm:$0xf] %v5185_v25  ;;  %v2366_v17 = vmul.f32 %v8194_v59, %v1387_v13  ;;  %v2463_v40 = vmul.f32 %v8204_v16, %v2430_v9  ;;  %v1393_v57 = vpop.f32.mrb[59].mxu0  ;;  %v8469_v32 = vld [vmem:[%s6428_s15 + $0x40] sm:$0xff] }
 0x4f5   : > { %v3312_v21 = vpop.xlane.xlu0 %3311  ;;  %v3807_v15 = vmul.f32 %v8194_v59, %v1389_v58  ;;  %v5665_v41 = vpop.eup %5664  ;;  %v3903_v60 = vmul.f32 %v3871_v47, %v8204_v16  ;;  %v2367_v25 = vmul.f32 %v8194_v59, %v1391_v36  ;;  %v3808_v28 = vmul.f32 %v8194_v59, %v1393_v57  ;;  %v9866_v63 = vld [vmem:[#allocation149_spill] sm:$0xff]  ;;  %v9868_v47 = vld [vmem:[#allocation155_spill] sm:$0xff] }
 0x4f6   : > { %9865 = vst [vmem:[#allocation167_spill] sm:$0xff] %v8457_v24  ;;  %v3345_v30 = vmul.f32 0.0078125, %v3312_v21  ;;  %2253 = vrot.lane.b32.xlu0 %v8157_v10, %s6070_s24  ;;  %v2464_v21 = vmul.f32 %v8204_v16, %v2431_v2  ;;  %v8477_v9 = vmul.f32 %v8388_v3, %v9866_v63  ;;  %v2495_v58 = vadd.f32 %v2463_v40, %v2366_v17  ;;  %v9867_v10 = vld [vmem:[#allocation206_spill] sm:$0xff]  ;;  %v9870_v40 = vld [vmem:[#allocation208_spill] sm:$0xff] }
 0x4f7   : > { %3693 = vrot.lane.b32.xlu1 %v8143_v12, %s6070_s24  ;;  %v3904_v0 = vmul.f32 %v3872_v43, %v8204_v16  ;;  %v8481_v14 = vmul.f32 %v5659_v53, %v9867_v10  ;;  %v8484_v19 = vmul.f32 %v5657_v50, %v9868_v47  ;;  %v3935_v2 = vadd.f32 %v3903_v60, %v3807_v15  ;;  %v8492_v10 = vld [vmem:[%s6428_s15 + $0xc0] sm:$0xff]  ;;  %v9869_v50 = vld [vmem:[#allocation207_spill] sm:$0xff]  ;;  %v1397_v60 = vpop.f32.mrb[60].mxu0 }
 0x4f8   : > { %v3377_v13 = vadd.f32 1.1920929e-07, %v3345_v30  ;;  %v2496_v36 = vadd.f32 %v2464_v21, %v2367_v25  ;;  %v5667_v30 = vpop.eup %5666  ;;  %v5090_v43 = vpack.c.bf16 %v2495_v58, %v2495_v58  ;;  %v8495_v53 = vmul.f32 %v5663_v52, %v9869_v50  ;;  %v2400_v25 = vld [vmem:[%s6435_s14 + $0x70] sm:$0xff]   ;;  %v2401_v21 = vld [vmem:[%s6435_s14 + $0x78] sm:$0xff]   ;;  %v1399_v58 = vpop.f32.mrb[61].mxu0  ;;  %v9872_v50 = vld [vmem:[#allocation26_spill] sm:$0xff] }
 0x4f9   : > { %v2050_v12 = vpop.permute.xlu0 %2049  ;;  %v3936_v17 = vadd.f32 %v3904_v0, %v3808_v28  ;;  %v8498_v15 = vmul.f32 %v5661_v35, %v9870_v40  ;;  %v5186_v57 = vpack.c.bf16 %v3935_v2, %v3935_v2  ;;  %v2432_v63 = vunpack.c.l.bf16 %v2400_v25  ;;  %v9873_v35 = vld [vmem:[#allocation209_spill] sm:$0xff]  ;;  %v1401_v2 = vpop.f32.mrb[62].mxu0 }
 0x4fa   : > { %5670 = vrsqrt.f32 %v3377_v13  ;;  %v2105_v3 = vmul.f32 %v2050_v12, %v8469_v32  ;;  %3695 = vrot.lane.b32.xlu0 %v8172_v26, %s6070_s24  ;;  %v5091_v12 = vpack.c.bf16 %v2496_v36, %v2496_v36  ;;  %v9871_v13 = vld [vmem:[#allocation35_spill] sm:$0xff]  ;;  %2975 = vst [vmem:[%s8247_s29 + $0x60] sm:$0xf] %v5090_v43  ;;  %v3873_v47 = vunpack.c.h.bf16 %v2400_v25 }
 0x4fb   : > { %2255 = vrot.lane.b32.xlu1 %v8149_v54, %s6070_s24  ;;  %v5187_v28 = vpack.c.bf16 %v3936_v17, %v3936_v17  ;;  %v8505_v54 = vmul.f32 %v5667_v30, %v9872_v50  ;;  %v8508_v40 = vmul.f32 %v5665_v41, %v9873_v35  ;;  %4415 = vst [vmem:[%s8247_s29 + $0x64] sm:$0xf] %v5186_v57  ;;  %v2433_v36 = vunpack.c.l.bf16 %v2401_v21  ;;  %v1403_v17 = vpop.f32.mrb[63].mxu0  ;;  %v9874_v57 = vld [vmem:[#allocation158_spill] sm:$0xff] }
 0x4fc   : > { %v2137_v0 = vadd.f32 %v2105_v3, %v9871_v13  ;;  %2976 = vst [vmem:[%s8247_s29 + $0x68] sm:$0xf] %v5091_v12  ;;  %v3874_v26 = vunpack.c.h.bf16 %v2401_v21  ;;  %v2368_v43 = vmul.f32 %v8194_v59, %v1397_v60  ;;  %v2465_v30 = vmul.f32 %v8204_v16, %v2432_v63 }
 0x4fd   : > { %v2082_v52 = vpop.permute.xlu0 %2081  ;;  %4416 = vst [vmem:[%s8247_s29 + $0x6c] sm:$0xf] %v5187_v28  ;;  %v5669_v41 = vpop.eup %5668  ;;  %v3809_v25 = vmul.f32 %v8194_v59, %v1399_v58  ;;  %v3905_v21 = vmul.f32 %v3873_v47, %v8204_v16  ;;  %v2369_v13 = vmul.f32 %v8194_v59, %v1401_v2  ;;  %v3810_v61 = vmul.f32 %v8194_v59, %v1403_v17 }
 0x4fe   : > { %v2169_v6 = vmul.f32 0.12, %v2137_v0  ;;  %v2121_v3 = vmul.f32 %v2082_v52, %v8492_v10  ;;  %2257 = vrot.lane.b32.xlu0 %v8175_v31, %s6070_s24  ;;  %v2466_v0 = vmul.f32 %v8204_v16, %v2433_v36  ;;  %v9875_v52 = vld [vmem:[#allocation39_spill] sm:$0xff]  ;;  %v2497_v63 = vadd.f32 %v2465_v30, %v2368_v43  ;;  %v9877_v30 = vld [vmem:[#allocation28_spill] sm:$0xff] }
 0x4ff   : > { %3697 = vrot.lane.b32.xlu1 %v9874_v57, %s6070_s24  ;;  %v3314_v12 = vpop.xlane.xlu1 %3313  ;;  %v8526_v31 = vld [vmem:[%s6428_s15 + $0x48] sm:$0xff]  ;;  %v3937_v46 = vadd.f32 %v3905_v21, %v3809_v25  ;;  %v3906_v58 = vmul.f32 %v3874_v26, %v8204_v16  ;;  %v1407_v21 = vpop.f32.mrb[64].mxu0 }
 0x500   : > { %v5022_v28 = vpack.c.bf16 %v2169_v6, %v2169_v6  ;;  %v2153_v60 = vadd.f32 %v2121_v3, %v9875_v52  ;;  %v3346_v50 = vmul.f32 0.0078125, %v3314_v12  ;;  %v2498_v57 = vadd.f32 %v2466_v0, %v2369_v13  ;;  %v9876_v3 = vld [vmem:[#allocation61_spill] sm:$0xff] }
 0x501   : > { %v3492_v35 = vpop.permute.xlu0 %3491  ;;  %v5092_v6 = vpack.c.bf16 %v2497_v63, %v2497_v63  ;;  %v8537_v12 = vmul.f32 %v5669_v41, %v9877_v30  ;;  %v5188_v26 = vpack.c.bf16 %v3937_v46, %v3937_v46  ;;  %v3938_v25 = vadd.f32 %v3906_v58, %v3810_v61  ;;  %v8544_v63 = vld [vmem:[%s6428_s15 + $0xc8] sm:$0xff] }
 0x502   : > { %2651 = vst [vmem:[%s7263_s0 + $0x40] sm:$0xf] %v5022_v28  ;;  %v2185_v47 = vmul.f32 0.12, %v2153_v60  ;;  %v3378_v2 = vadd.f32 1.1920929e-07, %v3346_v50  ;;  %v3547_v36 = vmul.f32 %v3492_v35, %v8469_v32  ;;  %3699 = vrot.lane.b32.xlu0 %v8224_v8, %s6070_s24  ;;  %v5093_v17 = vpack.c.bf16 %v2498_v57, %v2498_v57  ;;  %v2402_v32 = vld [vmem:[%s6435_s14 + $0x80] sm:$0xff]  }
 0x503   : > { %2259 = vrot.lane.b32.xlu1 %v9876_v3, %s6070_s24  ;;  %v2052_v43 = vpop.permute.xlu1 %2051  ;;  %9878 = vst [vmem:[#allocation67_spill] sm:$0xff] %v8537_v12  ;;  %v9879_v28 = vld [vmem:[#allocation38_spill] sm:$0xff]  ;;  %2977 = vst [vmem:[%s8247_s29 + $0x70] sm:$0xf] %v5092_v6  ;;  %v1409_v50 = vpop.f32.mrb[65].mxu0  ;;  %v9880_v46 = vld [vmem:[#allocation27_spill] sm:$0xff]  ;;  %v5189_v61 = vpack.c.bf16 %v3938_v25, %v3938_v25  ;;  %v2434_v57 = vunpack.c.l.bf16 %v2402_v32  ;;  %v3875_v58 = vunpack.c.h.bf16 %v2402_v32  ;;  %v2370_v30 = vmul.f32 %v8194_v59, %v1407_v21 }
 0x504   : > { %v5671_v13 = vpop.eup %5670  ;;  %v5038_v0 = vpack.c.bf16 %v2185_v47, %v2185_v47  ;;  %5672 = vrsqrt.f32 %v3378_v2  ;;  %v3579_v52 = vadd.f32 %v3547_v36, %v9879_v28  ;;  %v2106_v60 = vmul.f32 %v2052_v43, %v8526_v31  ;;  %4417 = vst [vmem:[%s8247_s29 + $0x74] sm:$0xf] %v5188_v26  ;;  %2978 = vst [vmem:[%s8247_s29 + $0x78] sm:$0xf] %v5093_v17  ;;  %v1411_v47 = vpop.f32.mrb[66].mxu0  ;;  %v9881_v36 = vld [vmem:[#allocation34_spill] sm:$0xff] }
 0x505   : > { %v3524_v41 = vpop.permute.xlu0 %3523  ;;  %v8547_v35 = vmul.f32 %v5671_v13, %v9880_v46  ;;  %v2403_v13 = vld [vmem:[%s6435_s14 + $0x88] sm:$0xff]   ;;  %v1413_v26 = vpop.f32.mrb[67].mxu0  ;;  %v8561_v32 = vld [vmem:[%s6428_s15 + $0x50] sm:$0xff]  ;;  %4418 = vst [vmem:[%s8247_s29 + $0x7c] sm:$0xf] %v5189_v61  ;;  %v3811_v28 = vmul.f32 %v8194_v59, %v1409_v50 }
 0x506   : > { %2667 = vst [vmem:[%s7263_s0 + $0xc0] sm:$0xf] %v5038_v0  ;;  %v3611_v2 = vmul.f32 0.12, %v3579_v52  ;;  %v2138_v6 = vadd.f32 %v2106_v60, %v9881_v36  ;;  %v3563_v43 = vmul.f32 %v3524_v41, %v8492_v10  ;;  %2261 = vrot.lane.b32.xlu0 %v8306_v37, %s6070_s24  ;;  %v9882_v17 = vld [vmem:[#allocation71_spill] sm:$0xff]  ;;  %v2467_v0 = vmul.f32 %v8204_v16, %v2434_v57  ;;  %v9883_v41 = vld [vmem:[#allocation42_spill] sm:$0xff] }
 0x507   : > { %3701 = vrot.lane.b32.xlu1 %v9882_v17, %s6070_s24  ;;  %v2084_v25 = vpop.permute.xlu1 %2083  ;;  %v3907_v10 = vmul.f32 %v3875_v58, %v8204_v16  ;;  %v2371_v52 = vmul.f32 %v8194_v59, %v1411_v47  ;;  %v2435_v8 = vunpack.c.l.bf16 %v2403_v13  ;;  %v3812_v61 = vmul.f32 %v8194_v59, %v1413_v26  ;;  %v9884_v58 = vld [vmem:[#allocation36_spill] sm:$0xff] }
 0x508   : > { %v5118_v60 = vpack.c.bf16 %v3611_v2, %v3611_v2  ;;  %v2170_v21 = vmul.f32 0.12, %v2138_v6  ;;  %v3595_v46 = vadd.f32 %v3563_v43, %v9883_v41  ;;  %v2122_v36 = vmul.f32 %v2084_v25, %v8544_v63  ;;  %v9885_v6 = vld [vmem:[#allocation161_spill] sm:$0xff] }
 0x509   : > { %v2054_v17 = vpop.permute.xlu0 %2053  ;;  %v2499_v3 = vadd.f32 %v2467_v0, %v2370_v30  ;;  %v3939_v37 = vadd.f32 %v3907_v10, %v3811_v28  ;;  %v8579_v30 = vld [vmem:[%s6428_s15 + $0xd0] sm:$0xff]  ;;  %v2468_v0 = vmul.f32 %v8204_v16, %v2435_v8  ;;  %v3876_v28 = vunpack.c.h.bf16 %v2403_v13  ;;  %v1417_v10 = vpop.f32.mrb[68].mxu0  ;;  %v9886_v41 = vld [vmem:[#allocation129_spill] sm:$0xff] }
 0x50a   : > { %4091 = vst [vmem:[%s7263_s0 + $0x44] sm:$0xf] %v5118_v60  ;;  %v5023_v50 = vpack.c.bf16 %v2170_v21, %v2170_v21  ;;  %v3627_v57 = vmul.f32 0.12, %v3595_v46  ;;  %v2154_v47 = vadd.f32 %v2122_v36, %v9884_v58  ;;  %v2107_v2 = vmul.f32 %v2054_v17, %v8561_v32  ;;  %3703 = vrot.lane.b32.xlu0 %v8342_v51, %s6070_s24  ;;  %v2404_v60 = vld [vmem:[%s6435_s14 + $0x90] sm:$0xff]   ;;  %v1419_v58 = vpop.f32.mrb[69].mxu0 }
 0x50b   : > { %2263 = vrot.lane.b32.xlu1 %v9885_v6, %s6070_s24  ;;  %v3494_v43 = vpop.permute.xlu1 %3493  ;;  %v5094_v26 = vpack.c.bf16 %v2499_v3, %v2499_v3  ;;  %v5190_v25 = vpack.c.bf16 %v3939_v37, %v3939_v37  ;;  %v2500_v51 = vadd.f32 %v2468_v0, %v2371_v52  ;;  %v3908_v37 = vmul.f32 %v3876_v28, %v8204_v16  ;;  %v1421_v13 = vpop.f32.mrb[70].mxu0 }
 0x50c   : > { %2652 = vst [vmem:[%s7263_s0 + $0x48] sm:$0xf] %v5023_v50  ;;  %v5134_v17 = vpack.c.bf16 %v3627_v57, %v3627_v57  ;;  %v2186_v21 = vmul.f32 0.12, %v2154_v47  ;;  %v2139_v46 = vadd.f32 %v2107_v2, %v9886_v41  ;;  %v3548_v36 = vmul.f32 %v3494_v43, %v8526_v31  ;;  %v9887_v47 = vld [vmem:[#allocation40_spill] sm:$0xff]  ;;  %v1423_v52 = vpop.f32.mrb[71].mxu0 }
 0x50d   : > { %v2086_v6 = vpop.permute.xlu0 %2085  ;;  %2979 = vst [vmem:[%s8247_s29 + $0x80] sm:$0xf] %v5094_v26  ;;  %4419 = vst [vmem:[%s8247_s29 + $0x84] sm:$0xf] %v5190_v25  ;;  %v2436_v3 = vunpack.c.l.bf16 %v2404_v60  ;;  %v3877_v8 = vunpack.c.h.bf16 %v2404_v60  ;;  %v9888_v26 = vld [vmem:[#allocation31_spill] sm:$0xff]  ;;  %v5095_v0 = vpack.c.bf16 %v2500_v51, %v2500_v51  ;;  %v3940_v28 = vadd.f32 %v3908_v37, %v3812_v61 }
 0x50e   : > { %v5673_v42 = vpop.eup %5672  ;;  %4107 = vst [vmem:[%s7263_s0 + $0xc4] sm:$0xf] %v5134_v17  ;;  %v5039_v50 = vpack.c.bf16 %v2186_v21, %v2186_v21  ;;  %v2171_v57 = vmul.f32 0.12, %v2139_v46  ;;  %v3580_v2 = vadd.f32 %v3548_v36, %v9887_v47  ;;  %v2123_v31 = vmul.f32 %v2086_v6, %v8579_v30  ;;  %2265 = vrot.lane.b32.xlu0 %v8382_v55, %s6070_s24  ;;  %v9890_v21 = vld [vmem:[#allocation131_spill] sm:$0xff]  ;;  %v2405_v36 = vld [vmem:[%s6435_s14 + $0x98] sm:$0xff]  }
 0x50f   : > { %3705 = vrot.lane.b32.xlu1 %v8298_v39, %s6070_s24  ;;  %v3526_v43 = vpop.permute.xlu1 %3525  ;;  %v8597_v25 = vmul.f32 %v5673_v42, %v9888_v26  ;;  %v2372_v60 = vmul.f32 %v8194_v59, %v1417_v10  ;;  %v8605_v39 = vld [vmem:[%s6428_s15 + $0x58] sm:$0xff]  ;;  %2980 = vst [vmem:[%s8247_s29 + $0x88] sm:$0xf] %v5095_v0  ;;  %v5191_v42 = vpack.c.bf16 %v3940_v28, %v3940_v28  ;;  %v1427_v26 = vpop.f32.mrb[72].mxu0 }
 0x510   : > { %2668 = vst [vmem:[%s7263_s0 + $0xc8] sm:$0xf] %v5039_v50  ;;  %v5024_v6 = vpack.c.bf16 %v2171_v57, %v2171_v57  ;;  %v3612_v17 = vmul.f32 0.12, %v3580_v2  ;;  %v2155_v41 = vadd.f32 %v2123_v31, %v9890_v21  ;;  %v3564_v46 = vmul.f32 %v3526_v43, %v8544_v63  ;;  %v9891_v57 = vld [vmem:[#allocation37_spill] sm:$0xff]  ;;  %v2406_v21 = vld [vmem:[%s6435_s14 + $0xa0] sm:$0xff]  }
 0x511   : > { %9889 = vst [vmem:[#allocation168_spill] sm:$0xff] %v8597_v25  ;;  %v3496_v47 = vpop.permute.xlu0 %3495  ;;  %v2469_v51 = vmul.f32 %v8204_v16, %v2436_v3  ;;  %v3813_v61 = vmul.f32 %v8194_v59, %v1419_v58  ;;  %v3909_v10 = vmul.f32 %v3877_v8, %v8204_v16  ;;  %4420 = vst [vmem:[%s8247_s29 + $0x8c] sm:$0xf] %v5191_v42  ;;  %v2437_v43 = vunpack.c.l.bf16 %v2405_v36 }
 0x512   : > { %2653 = vst [vmem:[%s7263_s0 + $0x50] sm:$0xf] %v5024_v6  ;;  %v5119_v37 = vpack.c.bf16 %v3612_v17, %v3612_v17  ;;  %v2187_v50 = vmul.f32 0.12, %v2155_v41  ;;  %v3596_v2 = vadd.f32 %v3564_v46, %v9891_v57  ;;  %v3549_v63 = vmul.f32 %v3496_v47, %v8561_v32  ;;  %3707 = vrot.lane.b32.xlu0 %v8395_v33, %s6070_s24  ;;  %v9892_v32 = vld [vmem:[#allocation132_spill] sm:$0xff]  ;;  %v1429_v41 = vpop.f32.mrb[73].mxu0 }
 0x513   : > { %2267 = vrot.lane.b32.xlu1 %v8332_v34, %s6070_s24  ;;  %v2056_v3 = vpop.permute.xlu1 %2055  ;;  %v2501_v58 = vadd.f32 %v2469_v51, %v2372_v60  ;;  %v3941_v31 = vadd.f32 %v3909_v10, %v3813_v61  ;;  %v2373_v8 = vmul.f32 %v8194_v59, %v1421_v13  ;;  %v8625_v47 = vld [vmem:[%s6428_s15 + $0xd8] sm:$0xff]  ;;  %v2470_v42 = vmul.f32 %v8204_v16, %v2437_v43  ;;  %v1431_v61 = vpop.f32.mrb[74].mxu0 }
 0x514   : > { %4092 = vst [vmem:[%s7263_s0 + $0x4c] sm:$0xf] %v5119_v37  ;;  %v5040_v0 = vpack.c.bf16 %v2187_v50, %v2187_v50  ;;  %v3628_v28 = vmul.f32 0.12, %v3596_v2  ;;  %v3581_v6 = vadd.f32 %v3549_v63, %v9892_v32  ;;  %v2108_v17 = vmul.f32 %v2056_v3, %v8605_v39  ;;  %v9893_v50 = vld [vmem:[#allocation41_spill] sm:$0xff]  ;;  %v1433_v63 = vpop.f32.mrb[75].mxu0 }
 0x515   : > { %v3528_v46 = vpop.permute.xlu0 %3527  ;;  %v5096_v60 = vpack.c.bf16 %v2501_v58, %v2501_v58  ;;  %v5192_v13 = vpack.c.bf16 %v3941_v31, %v3941_v31  ;;  %v3814_v51 = vmul.f32 %v8194_v59, %v1423_v52  ;;  %v8637_v58 = vld [vmem:[%s6428_s15 + $0x60] sm:$0xff]  ;;  %v2502_v52 = vadd.f32 %v2470_v42, %v2373_v8  ;;  %v9895_v42 = vld [vmem:[#allocation127_spill] sm:$0xff] }
 0x516   : > { %2669 = vst [vmem:[%s7263_s0 + $0xd0] sm:$0xf] %v5040_v0  ;;  %v5135_v10 = vpack.c.bf16 %v3628_v28, %v3628_v28  ;;  %v3613_v37 = vmul.f32 0.12, %v3581_v6  ;;  %v2140_v57 = vadd.f32 %v2108_v17, %v9893_v50  ;;  %v3565_v2 = vmul.f32 %v3528_v46, %v8579_v30  ;;  %2269 = vrot.lane.b32.xlu0 %v8421_v49, %s6070_s24  ;;  %v9894_v32 = vld [vmem:[#allocation134_spill] sm:$0xff] }
 0x517   : > { %3709 = vrot.lane.b32.xlu1 %v8374_v56, %s6070_s24  ;;  %v2088_v3 = vpop.permute.xlu1 %2087  ;;  %2981 = vst [vmem:[%s8247_s29 + $0x90] sm:$0xf] %v5096_v60  ;;  %4421 = vst [vmem:[%s8247_s29 + $0x94] sm:$0xf] %v5192_v13  ;;  %v3878_v31 = vunpack.c.h.bf16 %v2405_v36  ;;  %v2374_v43 = vmul.f32 %v8194_v59, %v1427_v26  ;;  %v2438_v0 = vunpack.c.l.bf16 %v2406_v21  ;;  %v5097_v50 = vpack.c.bf16 %v2502_v52, %v2502_v52 }
 0x518   : > { %4108 = vst [vmem:[%s7263_s0 + $0xcc] sm:$0xf] %v5135_v10  ;;  %v5120_v30 = vpack.c.bf16 %v3613_v37, %v3613_v37  ;;  %v2172_v28 = vmul.f32 0.12, %v2140_v57  ;;  %v3597_v6 = vadd.f32 %v3565_v2, %v9894_v32  ;;  %v2124_v17 = vmul.f32 %v2088_v3, %v8625_v47  ;;  %v2407_v57 = vld [vmem:[%s6435_s14 + $0xa8] sm:$0xff]   ;;  %v8657_v3 = vld [vmem:[%s6428_s15 + $0xe0] sm:$0xff] }
 0x519   : > { %v2058_v46 = vpop.permute.xlu0 %2057  ;;  %v3910_v60 = vmul.f32 %v3878_v31, %v8204_v16  ;;  %v2471_v8 = vmul.f32 %v8204_v16, %v2438_v0  ;;  %v3815_v36 = vmul.f32 %v8194_v59, %v1429_v41  ;;  %2982 = vst [vmem:[%s8247_s29 + $0x98] sm:$0xf] %v5097_v50  ;;  %v3879_v31 = vunpack.c.h.bf16 %v2406_v21 }
 0x51a   : > { %4093 = vst [vmem:[%s7263_s0 + $0x54] sm:$0xf] %v5120_v30  ;;  %v5025_v26 = vpack.c.bf16 %v2172_v28, %v2172_v28  ;;  %v3629_v13 = vmul.f32 0.12, %v3597_v6  ;;  %v2156_v10 = vadd.f32 %v2124_v17, %v9895_v42  ;;  %v2109_v37 = vmul.f32 %v2058_v46, %v8637_v58  ;;  %3711 = vrot.lane.b32.xlu0 %v8427_v4, %s6070_s24  ;;  %v1437_v30 = vpop.f32.mrb[76].mxu0  ;;  %v9896_v6 = vld [vmem:[#allocation137_spill] sm:$0xff] }
 0x51b   : > { %2271 = vrot.lane.b32.xlu1 %v8399_v62, %s6070_s24  ;;  %v3498_v2 = vpop.permute.xlu1 %3497  ;;  %v3942_v41 = vadd.f32 %v3910_v60, %v3814_v51  ;;  %v2503_v52 = vadd.f32 %v2471_v8, %v2374_v43  ;;  %v2375_v0 = vmul.f32 %v8194_v59, %v1431_v61  ;;  %v1439_v42 = vpop.f32.mrb[77].mxu0  ;;  %v3911_v51 = vmul.f32 %v3879_v31, %v8204_v16  ;;  %v9897_v8 = vld [vmem:[#allocation130_spill] sm:$0xff] }
 0x51c   : > { %2654 = vst [vmem:[%s7263_s0 + $0x58] sm:$0xf] %v5025_v26  ;;  %v5136_v28 = vpack.c.bf16 %v3629_v13, %v3629_v13  ;;  %v2188_v32 = vmul.f32 0.12, %v2156_v10  ;;  %v2141_v17 = vadd.f32 %v2109_v37, %v9896_v6  ;;  %v3550_v46 = vmul.f32 %v3498_v2, %v8605_v39  ;;  %v1441_v21 = vpop.f32.mrb[78].mxu0 }
 0x51d   : > { %v2090_v62 = vpop.permute.xlu0 %2089  ;;  %v5193_v56 = vpack.c.bf16 %v3942_v41, %v3942_v41  ;;  %v5098_v50 = vpack.c.bf16 %v2503_v52, %v2503_v52  ;;  %v2439_v43 = vunpack.c.l.bf16 %v2407_v57  ;;  %v8670_v39 = vpop.f32.mrb[79].mxu0  ;;  %v3943_v37 = vadd.f32 %v3911_v51, %v3815_v36 }
 0x51e   : > { %4109 = vst [vmem:[%s7263_s0 + $0xd4] sm:$0xf] %v5136_v28  ;;  %v5041_v61 = vpack.c.bf16 %v2188_v32, %v2188_v32  ;;  %v2173_v60 = vmul.f32 0.12, %v2141_v17  ;;  %v3582_v26 = vadd.f32 %v3550_v46, %v9897_v8  ;;  %v2125_v13 = vmul.f32 %v2090_v62, %v8657_v3  ;;  %2273 = vrot.lane.b32.xlu0 %v8437_v38, %s6070_s24  ;;  %v9898_v28 = vld [vmem:[#allocation139_spill] sm:$0xff]  ;;  %v2408_v17 = vld [vmem:[%s6435_s14 + $0xb0] sm:$0xff]  }
 0x51f   : > { %3713 = vrot.lane.b32.xlu1 %v8417_v29, %s6070_s24  ;;  %v3530_v10 = vpop.permute.xlu1 %3529  ;;  %4422 = vst [vmem:[%s8247_s29 + $0x9c] sm:$0xf] %v5193_v56  ;;  %2983 = vst [vmem:[%s8247_s29 + $0xa0] sm:$0xf] %v5098_v50  ;;  %v2472_v2 = vmul.f32 %v8204_v16, %v2439_v43  ;;  %v3816_v41 = vmul.f32 %v8194_v59, %v1433_v63  ;;  %v3880_v62 = vunpack.c.h.bf16 %v2407_v57  ;;  %v8683_v8 = vld [vmem:[%s6428_s15 + $0x68] sm:$0xff]  ;;  %v9899_v43 = vld [vmem:[#allocation133_spill] sm:$0xff] }
 0x520   : > { %2670 = vst [vmem:[%s7263_s0 + $0xd8] sm:$0xf] %v5041_v61  ;;  %v5026_v52 = vpack.c.bf16 %v2173_v60, %v2173_v60  ;;  %v3614_v31 = vmul.f32 0.12, %v3582_v26  ;;  %v2157_v32 = vadd.f32 %v2125_v13, %v9898_v28  ;;  %v3566_v6 = vmul.f32 %v3530_v10, %v8625_v47  ;;  %v1447_v10 = vpop.f32.mrb[80].mxu0  ;;  %v2409_v28 = vld [vmem:[%s6435_s14 + $0xb8] sm:$0xff]  }
 0x521   : > { %v3500_v46 = vpop.permute.xlu0 %3499  ;;  %v5194_v56 = vpack.c.bf16 %v3943_v37, %v3943_v37  ;;  %v2504_v36 = vadd.f32 %v2472_v2, %v2375_v0  ;;  %v3912_v50 = vmul.f32 %v3880_v62, %v8204_v16  ;;  %v2376_v63 = vmul.f32 %v8194_v59, %v1437_v30  ;;  %v9900_v62 = vld [vmem:[#allocation142_spill] sm:$0xff] }
 0x522   : > { %2655 = vst [vmem:[%s7263_s0 + $0x60] sm:$0xf] %v5026_v52  ;;  %v5121_v57 = vpack.c.bf16 %v3614_v31, %v3614_v31  ;;  %v2189_v51 = vmul.f32 0.12, %v2157_v32  ;;  %v3598_v61 = vadd.f32 %v3566_v6, %v9899_v43  ;;  %v3551_v47 = vmul.f32 %v3500_v46, %v8637_v58  ;;  %3715 = vrot.lane.b32.xlu0 %v8449_v22, %s6070_s24  ;;  %v1449_v32 = vpop.f32.mrb[81].mxu0  ;;  %v8701_v46 = vld [vmem:[%s6428_s15 + $0xe8] sm:$0xff] }
 0x523   : > { %2275 = vrot.lane.b32.xlu1 %v8431_v18, %s6070_s24  ;;  %v2060_v0 = vpop.permute.xlu1 %2059  ;;  %4423 = vst [vmem:[%s8247_s29 + $0xa4] sm:$0xf] %v5194_v56  ;;  %v5099_v60 = vpack.c.bf16 %v2504_v36, %v2504_v36  ;;  %v3944_v30 = vadd.f32 %v3912_v50, %v3816_v41  ;;  %v2440_v26 = vunpack.c.l.bf16 %v2408_v17  ;;  %v3817_v13 = vmul.f32 %v8194_v59, %v1439_v42  ;;  %v8706_v50 = vpop.f32.mrb[82].mxu0  ;;  %v9901_v43 = vld [vmem:[#allocation135_spill] sm:$0xff] }
 0x524   : > { %4094 = vst [vmem:[%s7263_s0 + $0x5c] sm:$0xf] %v5121_v57  ;;  %v5042_v37 = vpack.c.bf16 %v2189_v51, %v2189_v51  ;;  %v3630_v2 = vmul.f32 0.12, %v3598_v61  ;;  %v3583_v52 = vadd.f32 %v3551_v47, %v9900_v62  ;;  %v2110_v31 = vmul.f32 %v2060_v0, %v8683_v8  ;;  %v8713_v0 = vpop.f32.mrb[83].mxu0  ;;  %v9902_v62 = vld [vmem:[#allocation144_spill] sm:$0xff] }
 0x525   : > { %v3532_v6 = vpop.permute.xlu0 %3531  ;;  %2984 = vst [vmem:[%s8247_s29 + $0xa8] sm:$0xf] %v5099_v60  ;;  %v5195_v41 = vpack.c.bf16 %v3944_v30, %v3944_v30  ;;  %v2473_v42 = vmul.f32 %v8204_v16, %v2440_v26  ;;  %v3881_v56 = vunpack.c.h.bf16 %v2408_v17  ;;  %v2377_v36 = vmul.f32 %v8194_v59, %v1441_v21  ;;  %v8718_v21 = vld [vmem:[%s6428_s15 + $0x70] sm:$0xff] }
 0x526   : > { %2671 = vst [vmem:[%s7263_s0 + $0xe0] sm:$0xf] %v5042_v37  ;;  %v5137_v57 = vpack.c.bf16 %v3630_v2, %v3630_v2  ;;  %v3615_v51 = vmul.f32 0.12, %v3583_v52  ;;  %v2142_v61 = vadd.f32 %v2110_v31, %v9901_v43  ;;  %v3567_v47 = vmul.f32 %v3532_v6, %v8657_v3  ;;  %2277 = vrot.lane.b32.xlu0 %v8453_v44, %s6070_s24 }
 0x527   : > { %3717 = vrot.lane.b32.xlu1 %v8441_v1, %s6070_s24  ;;  %v2092_v17 = vpop.permute.xlu1 %2091  ;;  %4424 = vst [vmem:[%s8247_s29 + $0xac] sm:$0xf] %v5195_v41  ;;  %v2505_v60 = vadd.f32 %v2473_v42, %v2376_v63  ;;  %v3913_v30 = vmul.f32 %v3881_v56, %v8204_v16  ;;  %v2441_v26 = vunpack.c.l.bf16 %v2409_v28  ;;  %v3818_v3 = vmul.f32 %v8194_v59, %v8670_v39 }
 0x528   : > { %4110 = vst [vmem:[%s7263_s0 + $0xdc] sm:$0xf] %v5137_v57  ;;  %v5122_v37 = vpack.c.bf16 %v3615_v51, %v3615_v51  ;;  %v2174_v2 = vmul.f32 0.12, %v2142_v61  ;;  %v3599_v52 = vadd.f32 %v3567_v47, %v9902_v62  ;;  %v2126_v31 = vmul.f32 %v2092_v17, %v8701_v46  ;;  %v9903_v57 = vld [vmem:[#allocation136_spill] sm:$0xff]  ;;  %v2410_v61 = vld [vmem:[%s6435_s14 + $0xc0] sm:$0xff]  }
 0x529   : > { %v2062_v6 = vpop.permute.xlu0 %2061  ;;  %v5100_v43 = vpack.c.bf16 %v2505_v60, %v2505_v60  ;;  %v3945_v41 = vadd.f32 %v3913_v30, %v3817_v13  ;;  %v2474_v63 = vmul.f32 %v8204_v16, %v2441_v26  ;;  %v3882_v42 = vunpack.c.h.bf16 %v2409_v28  ;;  %v8737_v47 = vld [vmem:[%s6428_s15 + $0xf0] sm:$0xff]  ;;  %v8742_v26 = vpop.f32.mrb[84].mxu0  ;;  %v9904_v62 = vld [vmem:[#allocation47_spill] sm:$0xff] }
 0x52a   : > { %4095 = vst [vmem:[%s7263_s0 + $0x64] sm:$0xf] %v5122_v37  ;;  %v5027_v56 = vpack.c.bf16 %v2174_v2, %v2174_v2  ;;  %v3631_v39 = vmul.f32 0.12, %v3599_v52  ;;  %v2158_v1 = vadd.f32 %v2126_v31, %v9903_v57  ;;  %v2111_v51 = vmul.f32 %v2062_v6, %v8718_v21  ;;  %3719 = vrot.lane.b32.xlu0 %v8477_v9, %s6070_s24  ;;  %v8747_v6 = vpop.f32.mrb[85].mxu0 }
 0x52b   : > { %2279 = vrot.lane.b32.xlu1 %v8457_v24, %s6070_s24  ;;  %v3502_v13 = vpop.permute.xlu1 %3501  ;;  %2985 = vst [vmem:[%s8247_s29 + $0xb0] sm:$0xf] %v5100_v43  ;;  %v5196_v28 = vpack.c.bf16 %v3945_v41, %v3945_v41  ;;  %v2506_v17 = vadd.f32 %v2474_v63, %v2377_v36  ;;  %v3914_v60 = vmul.f32 %v3882_v42, %v8204_v16  ;;  %v2442_v63 = vunpack.c.l.bf16 %v2410_v61  ;;  %v8751_v42 = vpop.f32.mrb[86].mxu0  ;;  %v8771_v24 = vld [vmem:[%s6428_s15 + $0x78] sm:$0xff] }
 0x52c   : > { %v2378_v30 = vmul.f32 %v8194_v59, %v1447_v10  ;;  %2656 = vst [vmem:[%s7263_s0 + $0x68] sm:$0xf] %v5027_v56  ;;  %v5138_v37 = vpack.c.bf16 %v3631_v39, %v3631_v39  ;;  %v2190_v2 = vmul.f32 0.12, %v2158_v1  ;;  %v2143_v52 = vadd.f32 %v2111_v51, %v9904_v62  ;;  %v9905_v39 = vld [vmem:[#allocation138_spill] sm:$0xff] }
 0x52d   : > { %v3552_v31 = vmul.f32 %v3502_v13, %v8683_v8  ;;  %v2094_v43 = vpop.permute.xlu0 %2093  ;;  %4425 = vst [vmem:[%s8247_s29 + $0xb4] sm:$0xf] %v5196_v28  ;;  %v5101_v36 = vpack.c.bf16 %v2506_v17, %v2506_v17  ;;  %v3946_v41 = vadd.f32 %v3914_v60, %v3818_v3  ;;  %v3819_v10 = vmul.f32 %v8194_v59, %v1449_v32  ;;  %v2411_v13 = vld [vmem:[%s6435_s14 + $0xc8] sm:$0xff]   ;;  %v8759_v3 = vpop.f32.mrb[87].mxu0 }
 0x52e   : > { %4111 = vst [vmem:[%s7263_s0 + $0xe4] sm:$0xf] %v5138_v37  ;;  %v5043_v1 = vpack.c.bf16 %v2190_v2, %v2190_v2  ;;  %v2175_v56 = vmul.f32 0.12, %v2143_v52  ;;  %v2127_v51 = vmul.f32 %v2094_v43, %v8737_v47  ;;  %2281 = vrot.lane.b32.xlu0 %v8481_v14, %s6070_s24  ;;  %v2475_v17 = vmul.f32 %v8204_v16, %v2442_v63  ;;  %v9906_v52 = vld [vmem:[#allocation48_spill] sm:$0xff] }
 0x52f   : > { %v3584_v57 = vadd.f32 %v3552_v31, %v9905_v39  ;;  %3721 = vrot.lane.b32.xlu1 %v8484_v19, %s6070_s24  ;;  %v3534_v32 = vpop.permute.xlu1 %3533  ;;  %2986 = vst [vmem:[%s8247_s29 + $0xb8] sm:$0xf] %v5101_v36  ;;  %v5197_v28 = vpack.c.bf16 %v3946_v41, %v3946_v41  ;;  %v3883_v60 = vunpack.c.h.bf16 %v2410_v61  ;;  %v2379_v37 = vmul.f32 %v8194_v59, %v8706_v50 }
 0x530   : > { %2672 = vst [vmem:[%s7263_s0 + $0xe8] sm:$0xf] %v5043_v1  ;;  %v5028_v2 = vpack.c.bf16 %v2175_v56, %v2175_v56  ;;  %v2159_v31 = vadd.f32 %v2127_v51, %v9906_v52  ;;  %v3568_v43 = vmul.f32 %v3534_v32, %v8701_v46  ;;  %v2507_v36 = vadd.f32 %v2475_v17, %v2378_v30  ;;  %v9907_v56 = vld [vmem:[#allocation140_spill] sm:$0xff] }
 0x531   : > { %v3616_v62 = vmul.f32 0.12, %v3584_v57  ;;  %v3504_v39 = vpop.permute.xlu0 %3503  ;;  %4426 = vst [vmem:[%s8247_s29 + $0xbc] sm:$0xf] %v5197_v28  ;;  %v3915_v41 = vmul.f32 %v3883_v60, %v8204_v16  ;;  %v2443_v63 = vunpack.c.l.bf16 %v2411_v13  ;;  %v3820_v61 = vmul.f32 %v8194_v59, %v8713_v0 }
 0x532   : > { %2657 = vst [vmem:[%s7263_s0 + $0x70] sm:$0xf] %v5028_v2  ;;  %v2191_v1 = vmul.f32 0.12, %v2159_v31  ;;  %v3600_v57 = vadd.f32 %v3568_v43, %v9907_v56  ;;  %v3553_v46 = vmul.f32 %v3504_v39, %v8718_v21  ;;  %3723 = vrot.lane.b32.xlu0 %v8495_v53, %s6070_s24  ;;  %v5102_v51 = vpack.c.bf16 %v2507_v36, %v2507_v36  ;;  %v9908_v2 = vld [vmem:[#allocation146_spill] sm:$0xff]  ;;  %v2412_v31 = vld [vmem:[%s6435_s14 + $0xd0] sm:$0xff]  }
 0x533   : > { %v5123_v50 = vpack.c.bf16 %v3616_v62, %v3616_v62  ;;  %2283 = vrot.lane.b32.xlu1 %v8498_v15, %s6070_s24  ;;  %v2064_v30 = vpop.permute.xlu1 %2063  ;;  %v3947_v32 = vadd.f32 %v3915_v41, %v3819_v10  ;;  %v2476_v0 = vmul.f32 %v8204_v16, %v2443_v63  ;;  %v3884_v28 = vunpack.c.h.bf16 %v2411_v13  ;;  %v8789_v43 = vpop.f32.mrb[88].mxu0  ;;  %v8792_v56 = vld [vmem:[%s6428_s15 + $0xf8] sm:$0xff] }
 0x534   : > { %v5044_v17 = vpack.c.bf16 %v2191_v1, %v2191_v1  ;;  %v3632_v60 = vmul.f32 0.12, %v3600_v57  ;;  %v3585_v62 = vadd.f32 %v3553_v46, %v9908_v2  ;;  %v2112_v52 = vmul.f32 %v2064_v30, %v8771_v24  ;;  %9909 = vst [vmem:[#allocation169_spill] sm:$0xff] %v8792_v56  ;;  %2987 = vst [vmem:[%s8247_s29 + $0xc0] sm:$0xf] %v5102_v51  ;;  %v8798_v63 = vpop.f32.mrb[89].mxu0 }
 0x535   : > { %4096 = vst [vmem:[%s7263_s0 + $0x6c] sm:$0xf] %v5123_v50  ;;  %v3536_v39 = vpop.permute.xlu0 %3535  ;;  %v5198_v10 = vpack.c.bf16 %v3947_v32, %v3947_v32  ;;  %v2508_v36 = vadd.f32 %v2476_v0, %v2379_v37  ;;  %v3916_v13 = vmul.f32 %v3884_v28, %v8204_v16  ;;  %v2380_v41 = vmul.f32 %v8194_v59, %v8742_v26  ;;  %v9910_v57 = vld [vmem:[#allocation143_spill] sm:$0xff]  ;;  %v8805_v37 = vpop.f32.mrb[90].mxu0 }
 0x536   : > { %2673 = vst [vmem:[%s7263_s0 + $0xf0] sm:$0xf] %v5044_v17  ;;  %v5139_v50 = vpack.c.bf16 %v3632_v60, %v3632_v60  ;;  %v3617_v1 = vmul.f32 0.12, %v3585_v62  ;;  %v2144_v46 = vadd.f32 %v2112_v52, %v9910_v57  ;;  %v3569_v30 = vmul.f32 %v3536_v39, %v8737_v47  ;;  %2285 = vrot.lane.b32.xlu0 %v8505_v54, %s6070_s24  ;;  %v9911_v60 = vld [vmem:[#allocation50_spill] sm:$0xff]  ;;  %v2413_v52 = vld [vmem:[%s6435_s14 + $0xd8] sm:$0xff]  }
 0x537   : > { %3725 = vrot.lane.b32.xlu1 %v8508_v40, %s6070_s24  ;;  %v2096_v26 = vpop.permute.xlu1 %2095  ;;  %4427 = vst [vmem:[%s8247_s29 + $0xc4] sm:$0xf] %v5198_v10  ;;  %v5103_v51 = vpack.c.bf16 %v2508_v36, %v2508_v36  ;;  %v3948_v32 = vadd.f32 %v3916_v13, %v3820_v61  ;;  %v2444_v0 = vunpack.c.l.bf16 %v2412_v31  ;;  %v3821_v28 = vmul.f32 %v8194_v59, %v8747_v6 }
 0x538   : > { %4112 = vst [vmem:[%s7263_s0 + $0xec] sm:$0xf] %v5139_v50  ;;  %v5124_v47 = vpack.c.bf16 %v3617_v1, %v3617_v1  ;;  %v2176_v17 = vmul.f32 0.12, %v2144_v46  ;;  %v3601_v2 = vadd.f32 %v3569_v30, %v9911_v60  ;;  %v2128_v62 = vmul.f32 %v2096_v26, %v8792_v56  ;;  %v9912_v1 = vld [vmem:[#allocation145_spill] sm:$0xff]  ;;  %v5694_v46 = vld [vmem:[%s6428_s15] sm:$0xff] }
 0x539   : > { %v2226_v39 = vpop.permute.xlu0 %2225  ;;  %2988 = vst [vmem:[%s8247_s29 + $0xc8] sm:$0xf] %v5103_v51  ;;  %v5199_v10 = vpack.c.bf16 %v3948_v32, %v3948_v32  ;;  %v2477_v36 = vmul.f32 %v8204_v16, %v2444_v0  ;;  %v3885_v61 = vunpack.c.h.bf16 %v2412_v31  ;;  %v2381_v6 = vmul.f32 %v8194_v59, %v8751_v42 }
 0x53a   : > { %4097 = vst [vmem:[%s7263_s0 + $0x74] sm:$0xf] %v5124_v47  ;;  %v5029_v13 = vpack.c.bf16 %v2176_v17, %v2176_v17  ;;  %v3633_v50 = vmul.f32 0.12, %v3601_v2  ;;  %v2160_v57 = vadd.f32 %v2128_v62, %v9912_v1  ;;  %v2289_v30 = vmul.f32 %v5694_v46, %v2226_v39  ;;  %3727 = vrot.lane.b32.xlu0 %v8547_v35, %s6070_s24  ;;  %v9913_v17 = vld [vmem:[#allocation45_spill] sm:$0xff]  ;;  %v1473_v62 = vpop.f32.mrb[91].mxu0 }
 0x53b   : > { %2287 = vrot.lane.b32.xlu1 %v8537_v12, %s6070_s24  ;;  %v3506_v26 = vpop.permute.xlu1 %3505  ;;  %4428 = vst [vmem:[%s8247_s29 + $0xcc] sm:$0xf] %v5199_v10  ;;  %v2509_v31 = vadd.f32 %v2477_v36, %v2380_v41  ;;  %v3917_v42 = vmul.f32 %v3885_v61, %v8204_v16  ;;  %v2445_v51 = vunpack.c.l.bf16 %v2413_v52  ;;  %v3822_v32 = vmul.f32 %v8194_v59, %v8759_v3  ;;  %v2414_v61 = vld [vmem:[%s6435_s14 + $0xe0] sm:$0xff]  }
 0x53c   : > { %2658 = vst [vmem:[%s7263_s0 + $0x78] sm:$0xf] %v5029_v13  ;;  %v5140_v0 = vpack.c.bf16 %v3633_v50, %v3633_v50  ;;  %v2192_v47 = vmul.f32 0.12, %v2160_v57  ;;  %v2321_v60 = vadd.f32 %v2289_v30, %v9913_v17  ;;  %v3554_v2 = vmul.f32 %v3506_v26, %v8771_v24  ;;  %v9914_v50 = vld [vmem:[#allocation43_spill] sm:$0xff]  ;;  %v8838_v30 = vpop.f32.mrb[92].mxu0 }
 0x53d   : > { %v3668_v39 = vpop.permute.xlu0 %3667  ;;  %v5104_v10 = vpack.c.bf16 %v2509_v31, %v2509_v31  ;;  %v3949_v1 = vadd.f32 %v3917_v42, %v3821_v28  ;;  %v2478_v41 = vmul.f32 %v8204_v16, %v2445_v51  ;;  %v3886_v36 = vunpack.c.h.bf16 %v2413_v52  ;;  %v9915_v51 = vld [vmem:[#allocation46_spill] sm:$0xff] }
 0x53e   : > { %4113 = vst [vmem:[%s7263_s0 + $0xf4] sm:$0xf] %v5140_v0  ;;  %v5045_v3 = vpack.c.bf16 %v2192_v47, %v2192_v47  ;;  %v5046_v13 = vpack.c.bf16 %v2321_v60, %v2321_v60  ;;  %v3586_v57 = vadd.f32 %v3554_v2, %v9914_v50  ;;  %v3731_v12 = vmul.f32 %v5694_v46, %v3668_v39  ;;  %v1479_v50 = vpop.f32.mrb[93].mxu0 }
 0x53f   : > { %3729 = vrot.lane.b32.xlu1 %v8597_v25, %s6070_s24  ;;  %v3538_v26 = vpop.permute.xlu1 %3537  ;;  %2989 = vst [vmem:[%s8247_s29 + $0xd0] sm:$0xf] %v5104_v10  ;;  %v5200_v28 = vpack.c.bf16 %v3949_v1, %v3949_v1  ;;  %v2510_v31 = vadd.f32 %v2478_v41, %v2381_v6  ;;  %v3918_v52 = vmul.f32 %v3886_v36, %v8204_v16  ;;  %v2446_v17 = vunpack.c.l.bf16 %v2414_v61  ;;  %v2415_v10 = vld [vmem:[%s6435_s14 + $0xe8] sm:$0xff]   ;;  %v9916_v36 = vld [vmem:[#allocation49_spill] sm:$0xff] }
 0x540   : > { %v2382_v42 = vmul.f32 %v8194_v59, %v8789_v43  ;;  %2674 = vst [vmem:[%s7263_s0 + $0xf8] sm:$0xf] %v5045_v3  ;;  %2803 = vst [vmem:[%s8848_s19] sm:$0xf] %v5046_v13  ;;  %v3618_v46 = vmul.f32 0.12, %v3586_v57  ;;  %v3763_v0 = vadd.f32 %v3731_v12, %v9915_v51  ;;  %v3570_v47 = vmul.f32 %v3538_v26, %v8792_v56  ;;  %v5695_v3 = vld [vmem:[%s6428_s15 + $0x10] sm:$0xff] }
 0x541   : > { %v2230_v6 = vpop.permute.xlu0 %2229  ;;  %4429 = vst [vmem:[%s8247_s29 + $0xd4] sm:$0xf] %v5200_v28  ;;  %v5105_v60 = vpack.c.bf16 %v2510_v31, %v2510_v31  ;;  %v3950_v2 = vadd.f32 %v3918_v52, %v3822_v32  ;;  %v3823_v43 = vmul.f32 %v8194_v59, %v8798_v63  ;;  %v3887_v39 = vunpack.c.h.bf16 %v2414_v61  ;;  %v5696_v26 = vld [vmem:[%s6421_s23 + $0x20] sm:$0xff]  ;;  %v8864_v31 = vpop.f32.mrb[94].mxu0 }
 0x542   : > { %v5125_v1 = vpack.c.bf16 %v3618_v46, %v3618_v46  ;;  %v5142_v41 = vpack.c.bf16 %v3763_v0, %v3763_v0  ;;  %v3602_v12 = vadd.f32 %v3570_v47, %v9916_v36  ;;  %v2291_v13 = vmul.f32 %v5695_v3, %v2230_v6  ;;  %v9917_v46 = vld [vmem:[#allocation151_spill] sm:$0xff]  ;;  %v8870_v36 = vpop.f32.mrb[95].mxu0 }
 0x543   : > { %v2228_v57 = vpop.permute.xlu1 %2227  ;;  %v2197_v32 = vmul.f32 %v5696_v26, %v8070_v7  ;;  %2990 = vst [vmem:[%s8247_s29 + $0xd8] sm:$0xf] %v5105_v60  ;;  %v5201_v28 = vpack.c.bf16 %v3950_v2, %v3950_v2  ;;  %v2479_v63 = vmul.f32 %v8204_v16, %v2446_v17  ;;  %v3919_v61 = vmul.f32 %v3887_v39, %v8204_v16  ;;  %v5697_v0 = vld [vmem:[%s6428_s15 + $0x8] sm:$0xff] }
 0x544   : > { %4098 = vst [vmem:[%s7263_s0 + $0x7c] sm:$0xf] %v5125_v1  ;;  %4243 = vst [vmem:[%s8848_s19 + $0x4] sm:$0xf] %v5142_v41  ;;  %v3634_v52 = vmul.f32 0.12, %v3602_v12  ;;  %v2323_v51 = vadd.f32 %v2291_v13, %v9917_v46  ;;  %v2290_v47 = vmul.f32 %v5697_v0, %v2228_v57  ;;  %v2447_v6 = vunpack.c.l.bf16 %v2415_v10 }
 0x545   : > { %v3672_v7 = vpop.permute.xlu0 %3671  ;;  %4430 = vst [vmem:[%s8247_s29 + $0xdc] sm:$0xf] %v5201_v28  ;;  %v2511_v17 = vadd.f32 %v2479_v63, %v2382_v42  ;;  %v3951_v60 = vadd.f32 %v3919_v61, %v3823_v43  ;;  %v2383_v2 = vmul.f32 %v8194_v59, %v8805_v37  ;;  %v3824_v39 = vmul.f32 %v8194_v59, %v1473_v62  ;;  %v9918_v12 = vld [vmem:[#allocation44_spill] sm:$0xff]  ;;  %v9919_v62 = vld [vmem:[#allocation57_spill] sm:$0xff] }
 0x546   : > { %v5141_v1 = vpack.c.bf16 %v3634_v52, %v3634_v52  ;;  %v5048_v41 = vpack.c.bf16 %v2323_v51, %v2323_v51  ;;  %v2322_v13 = vadd.f32 %v2290_v47, %v9918_v12  ;;  %v3733_v57 = vmul.f32 %v5695_v3, %v3672_v7  ;;  %v2416_v46 = vld [vmem:[%s6435_s14 + $0xf0] sm:$0xff]  }
 0x547   : > { %v3670_v25 = vpop.permute.xlu1 %3669  ;;  %v5106_v56 = vpack.c.bf16 %v2511_v17, %v2511_v17  ;;  %v5202_v28 = vpack.c.bf16 %v3951_v60, %v3951_v60  ;;  %v2480_v42 = vmul.f32 %v8204_v16, %v2447_v6  ;;  %v3888_v43 = vunpack.c.h.bf16 %v2415_v10  ;;  %v9920_v17 = vld [vmem:[#allocation148_spill] sm:$0xff] }
 0x548   : > { %4114 = vst [vmem:[%s7263_s0 + $0xfc] sm:$0xf] %v5141_v1  ;;  %2805 = vst [vmem:[%s8848_s19 + $0x10] sm:$0xf] %v5048_v41  ;;  %v5047_v37 = vpack.c.bf16 %v2322_v13, %v2322_v13  ;;  %v3765_v63 = vadd.f32 %v3733_v57, %v9919_v62  ;;  %v3732_v61 = vmul.f32 %v5697_v0, %v3670_v25  ;;  %v2448_v47 = vunpack.c.l.bf16 %v2416_v46  ;;  %v5698_v0 = vld [vmem:[%s6428_s15 + $0x20] sm:$0xff] }
 0x549   : > { %v2384_v3 = vmul.f32 %v8194_v59, %v8838_v30  ;;  %v2234_v52 = vpop.permute.xlu0 %2233  ;;  %2991 = vst [vmem:[%s8247_s29 + $0xe0] sm:$0xf] %v5106_v56  ;;  %4431 = vst [vmem:[%s8247_s29 + $0xe4] sm:$0xf] %v5202_v28  ;;  %v2512_v51 = vadd.f32 %v2480_v42, %v2383_v2  ;;  %v3920_v10 = vmul.f32 %v3888_v43, %v8204_v16  ;;  %v3889_v1 = vunpack.c.h.bf16 %v2416_v46  ;;  %v8895_v30 = vld [vmem:[%s6435_s14 + $0xf8] sm:$0xff]   ;;  %s5919_s14 = scalar_lea.vmem %s5918_s12, 8192 }
 0x54a   : > { %v3825_v6 = vmul.f32 %v8194_v59, %v1479_v50  ;;  %2804 = vst [vmem:[%s8848_s19 + $0x8] sm:$0xf] %v5047_v37  ;;  %v5144_v7 = vpack.c.bf16 %v3765_v63, %v3765_v63  ;;  %v3764_v25 = vadd.f32 %v3732_v61, %v9920_v17  ;;  %v2293_v60 = vmul.f32 %v5698_v0, %v2234_v52  ;;  %v5699_v46 = vld [vmem:[%s6428_s15 + $0x18] sm:$0xff]  ;;  %p5921_p12 = scmp.lt.s32.totalorder %s5919_s14, %s5913_s22 }
 0x54b   : > { %v2232_v56 = vpop.permute.xlu1 %2231  ;;  %v3639_v2 = vmul.f32 %v5696_v26, %v8079_v45  ;;  %v5107_v50 = vpack.c.bf16 %v2512_v51, %v2512_v51  ;;  %v3952_v41 = vadd.f32 %v3920_v10, %v3824_v39  ;;  %v2481_v12 = vmul.f32 %v8204_v16, %v2448_v47 }
 0x54c   : > { %4245 = vst [vmem:[%s8848_s19 + $0x14] sm:$0xf] %v5144_v7  ;;  %v5143_v13 = vpack.c.bf16 %v3764_v25, %v3764_v25  ;;  %v2325_v57 = vadd.f32 %v2293_v60, %v2197_v32  ;;  %v2292_v28 = vmul.f32 %v5699_v46, %v2232_v56  ;;  %v3921_v42 = vmul.f32 %v3889_v1, %v8204_v16  ;;  %p5922_p3 = por %p5921_p12, %p5920_p7 }
 0x54d   : > { %v3676_v45 = vpop.permute.xlu0 %3675  ;;  %2992 = vst [vmem:[%s8247_s29 + $0xe8] sm:$0xf] %v5107_v50  ;;  %v5203_v26 = vpack.c.bf16 %v3952_v41, %v3952_v41  ;;  %v2513_v39 = vadd.f32 %v2481_v12, %v2384_v3  ;;  %v2385_v43 = vmul.f32 %v8194_v59, %v8864_v31  ;;  %v2449_v37 = vunpack.c.l.bf16 %v8895_v30 }
 0x54e   : > { %p5923_p9 = pnand %p5922_p3, %p5916_p2 }
 0x550   : > { %5926 = shalt.err (!%p5923_p9)
}
 0x551   : > { %s5927_s24 = scalar_lea.hbm %s8901_s10, 4096  ;;  %s5931_s3 = scalar_lea.hbm %s9224_s6, 8192 }
 0x552   : > { %p5928_p8 = scmp.ne.s32.totalorder %s8901_s10, %s5927_s24  ;;  %p5932_p0 = scmp.lt.u32.totalorder %s8901_s10, %s9224_s6 }
 0x553   : > { %p5933_p1 = scmp.lt.u32.totalorder %s5931_s3, %s5927_s24  ;;  %p5935_p5 = scmp.lt.u32.totalorder %s5927_s24, %s8901_s10 }
 0x554   : > { %p5929_p11 = pnand %p5928_p8, %p9921_p4 }
 0x555   : > { %p5934_p10 = por %p5933_p1, %p5932_p0 }
 0x556   : > { %p5930_p6 = pneg %p5929_p11 }
 0x557   : > { %p5936_p13 = por %p5935_p5, %p5934_p10 }
 0x559   : > { %p5937_p2 = pnand %p5936_p13, %p5930_p6 }
 0x55b   : > { %5940 = shalt.err (!%p5937_p2)
}
 0x55c   : > { %s6072_s22 = smov 128   ;;  %s6073_s20 = smov 8   ;;  %4244 = vst [vmem:[%s8848_s19 + $0xc] sm:$0xf] %v5143_v13  ;;  %v5050_v32 = vpack.c.bf16 %v2325_v57, %v2325_v57  ;;  %v9922_v31 = vld [vmem:[#allocation55_spill] sm:$0xff]  ;;  %v3735_v63 = vmul.f32 %v5698_v0, %v3676_v45  ;;  %v3953_v61 = vadd.f32 %v3921_v42, %v3825_v6  ;;  %v3674_v3 = vpop.permute.xlu1 %3673  ;;  %v5108_v52 = vpack.c.bf16 %v2513_v39, %v2513_v39  ;;  %v2238_v6 = vpop.permute.xlu0 %2237  ;;  %v5700_v50 = vld [vmem:[%s6421_s23 + $0x30] sm:$0xff] }
 0x55d   : > { %5244 = dma.vmem_to_hbm [thread:$0]  (%p9921_p4), %s8909_s11, 4096, %s8901_s10, %s4436_s13, %s6072_s22, %s6072_s22, %s6073_s20   ;;  %v2324_v62 = vadd.f32 %v2292_v28, %v9922_v31  ;;  %v2482_v51 = vmul.f32 %v8204_v16, %v2449_v37  ;;  %v3826_v10 = vmul.f32 %v8194_v59, %v8870_v36  ;;  %v3890_v47 = vunpack.c.h.bf16 %v8895_v30  ;;  %v9923_v59 = vld [vmem:[#allocation56_spill] sm:$0xff] }
 0x55e   : > { %4432 = vst [vmem:[%s8247_s29 + $0xec] sm:$0xf] %v5203_v26  ;;  %2807 = vst [vmem:[%s8848_s19 + $0x20] sm:$0xf] %v5050_v32  ;;  %v3767_v17 = vadd.f32 %v3735_v63, %v3639_v2  ;;  %v3734_v25 = vmul.f32 %v5699_v46, %v3674_v3  ;;  %v5204_v0 = vpack.c.bf16 %v3953_v61, %v3953_v61  ;;  %v5701_v41 = vld [vmem:[%s6428_s15 + $0x30] sm:$0xff]  ;;  %v5702_v28 = vld [vmem:[%s6421_s23 + $0x28] sm:$0xff]  ;;  %s9131_s13 = scalar_lea.hbm %s9225_s7, %s8880_s21 }
 0x55f   : > { %v5049_v7 = vpack.c.bf16 %v2324_v62, %v2324_v62  ;;  %2993 = vst [vmem:[%s8247_s29 + $0xf0] sm:$0xf] %v5108_v52  ;;  %v2514_v60 = vadd.f32 %v2482_v51, %v2385_v43  ;;  %v3922_v1 = vmul.f32 %v3890_v47, %v8204_v16  ;;  %v2199_v30 = vmul.f32 %v5700_v50, %v8093_v23  ;;  %v5703_v45 = vld [vmem:[%s6428_s15 + $0x28] sm:$0xff]  ;;  %v5704_v47 = vld [vmem:[%s6421_s23 + $0x40] sm:$0xff]  ;;  %s4477_s18 = sshll.u32 %s8848_s19, 4  ;;  %s6074_s0 = smov [#allocation13]   ;;  %s9133_s18 = int_to_ptr.vmem [resolvable:$true] %s4477_s18 }
 0x560   : > { %v5146_v56 = vpack.c.bf16 %v3767_v17, %v3767_v17  ;;  %v3766_v36 = vadd.f32 %v3734_v25, %v9923_v59  ;;  %v2295_v2 = vmul.f32 %v5701_v41, %v2238_v6  ;;  %4433 = vst [vmem:[%s8247_s29 + $0xf4] sm:$0xf] %v5204_v0  ;;  %v2236_v12 = vpop.permute.xlu1 %2235  ;;  %v2198_v42 = vmul.f32 %v5702_v28, %v8048_v20  ;;  %v3680_v39 = vpop.permute.xlu0 %3679  ;;  %s5941_s24 = scalar_lea.vmem %s9133_s18, 4096  ;;  %s5945_s2 = sshll.u32 %s6074_s0, 4  ;;  %s5946_s2 = int_to_ptr.vmem [resolvable:$false] %s5945_s2 }
 0x561   : > { %2806 = vst [vmem:[%s8848_s19 + $0x18] sm:$0xf] %v5049_v7  ;;  %v5109_v13 = vpack.c.bf16 %v2514_v60, %v2514_v60  ;;  %v3954_v57 = vadd.f32 %v3922_v1, %v3826_v10  ;;  %v2294_v26 = vmul.f32 %v5703_v45, %v2236_v12  ;;  %v3641_v32 = vmul.f32 %v5700_v50, %v8102_v5  ;;  %v5705_v7 = vld [vmem:[%s6428_s15 + $0x40] sm:$0xff]  ;;  %v5706_v60 = vld [vmem:[%s6421_s23 + $0x38] sm:$0xff]  ;;  %p5942_p7 = scmp.ne.s32.totalorder %s9133_s18, %s5941_s24  ;;  %s5947_s3 = scalar_lea.vmem %s5946_s2, 8192 }
 0x562   : > { %4247 = vst [vmem:[%s8848_s19 + $0x24] sm:$0xf] %v5146_v56  ;;  %v5145_v46 = vpack.c.bf16 %v3766_v36, %v3766_v36  ;;  %v2327_v16 = vadd.f32 %v2295_v2, %v2199_v30  ;;  %v3737_v31 = vmul.f32 %v5701_v41, %v3680_v39  ;;  %v3640_v61 = vmul.f32 %v5702_v28, %v9832_v11  ;;  %v5707_v1 = vld [vmem:[%s6428_s15 + $0x38] sm:$0xff]  ;;  %p5948_p9 = scmp.lt.s32.totalorder %s9133_s18, %s5946_s2  ;;  %p5949_p8 = scmp.lt.s32.totalorder %s5947_s3, %s5941_s24 }
 0x563   : > { %2994 = vst [vmem:[%s8247_s29 + $0xf8] sm:$0xf] %v5109_v13  ;;  %v5205_v23 = vpack.c.bf16 %v3954_v57, %v3954_v57  ;;  %v2326_v37 = vadd.f32 %v2294_v26, %v2198_v42  ;;  %v2201_v5 = vmul.f32 %v5704_v47, %v8109_v48  ;;  %v2200_v11 = vmul.f32 %v5706_v60, %v9838_v27  ;;  %v9924_v48 = vld [vmem:[#allocation63_spill] sm:$0xff]  ;;  %v9925_v57 = vld [vmem:[#allocation53_spill] sm:$0xff]  ;;  %v9926_v26 = vld [vmem:[#allocation64_spill] sm:$0xff]  ;;  %p5943_p12 = pnand %p5942_p7, %p9921_p4 }
 0x564   : > { %4246 = vst [vmem:[%s8848_s19 + $0x1c] sm:$0xf] %v5145_v46  ;;  %v5052_v43 = vpack.c.bf16 %v2327_v16, %v2327_v16  ;;  %v3678_v62 = vpop.permute.xlu1 %3677  ;;  %v3769_v20 = vadd.f32 %v3737_v31, %v3641_v32  ;;  %v2242_v52 = vpop.permute.xlu0 %2241  ;;  %v3643_v30 = vmul.f32 %v5704_v47, %v9924_v48  ;;  %v3642_v27 = vmul.f32 %v5706_v60, %v9925_v57  ;;  %v9928_v47 = vld [vmem:[#allocation65_spill] sm:$0xff]  ;;  %v9931_v57 = vld [vmem:[#allocation54_spill] sm:$0xff]  ;;  %p5950_p11 = por %p5949_p8, %p5948_p9 }
 0x565   : > { %4434 = vst [vmem:[%s8247_s29 + $0xfc] sm:$0xf] %v5205_v23  ;;  %v5051_v63 = vpack.c.bf16 %v2326_v37, %v2326_v37  ;;  %v3736_v3 = vmul.f32 %v5703_v45, %v3678_v62  ;;  %v2297_v17 = vmul.f32 %v5705_v7, %v2242_v52  ;;  %v5708_v45 = vld [vmem:[%s6421_s23 + $0x50] sm:$0xff]  ;;  %v5710_v62 = vld [vmem:[%s6421_s23 + $0x48] sm:$0xff]  ;;  %p5944_p3 = pneg %p5943_p12 }
 0x566   : > { %2809 = vst [vmem:[%s8848_s19 + $0x30] sm:$0xf] %v5052_v43  ;;  %v5148_v51 = vpack.c.bf16 %v3769_v20, %v3769_v20  ;;  %v2203_v39 = vmul.f32 %v5708_v45, %v9926_v26  ;;  %v5709_v23 = vld [vmem:[%s6428_s15 + $0x50] sm:$0xff]  ;;  %v9932_v26 = vld [vmem:[#allocation66_spill] sm:$0xff] }
 0x567   : > { %2808 = vst [vmem:[%s8848_s19 + $0x28] sm:$0xf] %v5051_v63  ;;  %v3768_v10 = vadd.f32 %v3736_v3, %v3640_v61  ;;  %v2329_v6 = vadd.f32 %v2297_v17, %v2201_v5  ;;  %v9927_v63 = vld [vmem:[#allocation58_spill] sm:$0xff]  ;;  %v5711_v61 = vld [vmem:[%s6428_s15 + $0x48] sm:$0xff]  ;;  %v3645_v5 = vmul.f32 %v5708_v45, %v9928_v47  ;;  %p5951_p6 = pnand %p5950_p11, %p5944_p3 }
 0x568   : > { %v2240_v25 = vpop.permute.xlu1 %2239  ;;  %4249 = vst [vmem:[%s8848_s19 + $0x34] sm:$0xf] %v5148_v51  ;;  %v3684_v59 = vpop.permute.xlu0 %3683  ;;  %v2202_v20 = vmul.f32 %v5710_v62, %v9927_v63 }
 0x569   : > { %v5147_v0 = vpack.c.bf16 %v3768_v10, %v3768_v10  ;;  %v2296_v56 = vmul.f32 %v5707_v1, %v2240_v25  ;;  %v5054_v36 = vpack.c.bf16 %v2329_v6, %v2329_v6  ;;  %v3739_v41 = vmul.f32 %v5705_v7, %v3684_v59  ;;  %v9929_v6 = vld [vmem:[#allocation152_spill] sm:$0xff] }
 0x56a   : > { %v3644_v60 = vmul.f32 %v5710_v62, %v9929_v6 }
 0x56b   : > { %4248 = vst [vmem:[%s8848_s19 + $0x2c] sm:$0xf] %v5147_v0  ;;  %v2328_v50 = vadd.f32 %v2296_v56, %v2200_v11  ;;  %2811 = vst [vmem:[%s8848_s19 + $0x40] sm:$0xf] %v5054_v36  ;;  %v3771_v13 = vadd.f32 %v3739_v41, %v3643_v30  ;;  %v5712_v36 = vld [vmem:[%s6421_s23 + $0x60] sm:$0xff] }
 0x56c   : > { %v3682_v2 = vpop.permute.xlu1 %3681  ;;  %v2246_v16 = vpop.permute.xlu0 %2245 }
 0x56d   : > { %v5053_v12 = vpack.c.bf16 %v2328_v50, %v2328_v50  ;;  %v3738_v46 = vmul.f32 %v5707_v1, %v3682_v2  ;;  %v5150_v28 = vpack.c.bf16 %v3771_v13, %v3771_v13  ;;  %v2299_v43 = vmul.f32 %v5709_v23, %v2246_v16  ;;  %v9930_v50 = vld [vmem:[#allocation60_spill] sm:$0xff]  ;;  %v5713_v13 = vld [vmem:[%s6421_s23 + $0x58] sm:$0xff] }
 0x56e   : > { %v2205_v48 = vmul.f32 %v5712_v36, %v9930_v50 }
 0x56f   : > { %2810 = vst [vmem:[%s8848_s19 + $0x38] sm:$0xf] %v5053_v12  ;;  %v3770_v42 = vadd.f32 %v3738_v46, %v3642_v27  ;;  %4251 = vst [vmem:[%s8848_s19 + $0x44] sm:$0xf] %v5150_v28  ;;  %v2331_v31 = vadd.f32 %v2299_v43, %v2203_v39  ;;  %v2204_v27 = vmul.f32 %v5713_v13, %v9931_v57  ;;  %v5714_v46 = vld [vmem:[%s6428_s15 + $0x58] sm:$0xff] }
 0x570   : > { %v2244_v37 = vpop.permute.xlu1 %2243  ;;  %v3688_v52 = vpop.permute.xlu0 %3687  ;;  %v3647_v39 = vmul.f32 %v5712_v36, %v9932_v26 }
 0x571   : > { %v5149_v32 = vpack.c.bf16 %v3770_v42, %v3770_v42  ;;  %v2298_v3 = vmul.f32 %v5711_v61, %v2244_v37  ;;  %v5056_v51 = vpack.c.bf16 %v2331_v31, %v2331_v31  ;;  %v3741_v7 = vmul.f32 %v5709_v23, %v3688_v52  ;;  %v9933_v31 = vld [vmem:[#allocation59_spill] sm:$0xff]  ;;  %v5715_v52 = vld [vmem:[%s6421_s23 + $0x70] sm:$0xff] }
 0x572   : > { %v3646_v62 = vmul.f32 %v5713_v13, %v9933_v31 }
 0x573   : > { %4250 = vst [vmem:[%s8848_s19 + $0x3c] sm:$0xf] %v5149_v32  ;;  %v2330_v10 = vadd.f32 %v2298_v3, %v2202_v20  ;;  %2813 = vst [vmem:[%s8848_s19 + $0x50] sm:$0xf] %v5056_v51  ;;  %v3773_v0 = vadd.f32 %v3741_v7, %v3645_v5  ;;  %v9934_v51 = vld [vmem:[#allocation157_spill] sm:$0xff] }
 0x574   : > { %v3686_v17 = vpop.permute.xlu1 %3685  ;;  %v2250_v1 = vpop.permute.xlu0 %2249 }
 0x575   : > { %v5055_v25 = vpack.c.bf16 %v2330_v10, %v2330_v10  ;;  %v3740_v11 = vmul.f32 %v5711_v61, %v3686_v17  ;;  %v5152_v56 = vpack.c.bf16 %v3773_v0, %v3773_v0  ;;  %v2301_v30 = vmul.f32 %v2250_v1, %v8637_v58  ;;  %v5716_v17 = vld [vmem:[%s6421_s23 + $0x68] sm:$0xff] }
 0x576   : > { %v2207_v10 = vmul.f32 %v5715_v52, %v9934_v51 }
 0x577   : > { %2812 = vst [vmem:[%s8848_s19 + $0x48] sm:$0xf] %v5055_v25  ;;  %v3772_v59 = vadd.f32 %v3740_v11, %v3644_v60  ;;  %4253 = vst [vmem:[%s8848_s19 + $0x54] sm:$0xf] %v5152_v56  ;;  %v2333_v12 = vadd.f32 %v2301_v30, %v2205_v48  ;;  %v9935_v25 = vld [vmem:[#allocation153_spill] sm:$0xff]  ;;  %v9936_v56 = vld [vmem:[#allocation159_spill] sm:$0xff] }
 0x578   : > { %v2248_v41 = vpop.permute.xlu1 %2247  ;;  %v3692_v28 = vpop.permute.xlu0 %3691  ;;  %v2206_v0 = vmul.f32 %v5716_v17, %v9935_v25  ;;  %v5720_v25 = vld [vmem:[%s6421_s23 + $0x90] sm:$0xff] }
 0x579   : > { %v5151_v2 = vpack.c.bf16 %v3772_v59, %v3772_v59  ;;  %v2300_v16 = vmul.f32 %v5714_v46, %v2248_v41  ;;  %v5058_v42 = vpack.c.bf16 %v2333_v12, %v2333_v12  ;;  %v3743_v23 = vmul.f32 %v3692_v28, %v8637_v58  ;;  %v9937_v41 = vld [vmem:[#allocation154_spill] sm:$0xff] }
 0x57a   : > { %v3649_v59 = vmul.f32 %v5715_v52, %v9936_v56 }
 0x57b   : > { %4252 = vst [vmem:[%s8848_s19 + $0x4c] sm:$0xf] %v5151_v2  ;;  %v2332_v45 = vadd.f32 %v2300_v16, %v2204_v27  ;;  %2815 = vst [vmem:[%s8848_s19 + $0x60] sm:$0xf] %v5058_v42  ;;  %v3775_v32 = vadd.f32 %v3743_v23, %v3647_v39  ;;  %v3648_v2 = vmul.f32 %v5716_v17, %v9937_v41  ;;  %v9938_v16 = vld [vmem:[#allocation160_spill] sm:$0xff]  ;;  %v5718_v42 = vld [vmem:[%s6428_s15 + $0x80] sm:$0xff] }
 0x57c   : > { %v3690_v43 = vpop.permute.xlu1 %3689  ;;  %v2254_v20 = vpop.permute.xlu0 %2253  ;;  %v5719_v23 = vld [vmem:[%s6421_s23 + $0x78] sm:$0xff] }
 0x57d   : > { %v5057_v37 = vpack.c.bf16 %v2332_v45, %v2332_v45  ;;  %v3742_v63 = vmul.f32 %v5714_v46, %v3690_v43  ;;  %v5154_v61 = vpack.c.bf16 %v3775_v32, %v3775_v32  ;;  %v2303_v47 = vmul.f32 %v2254_v20, %v8718_v21  ;;  %v5717_v46 = vld [vmem:[%s6421_s23 + $0x80] sm:$0xff]  ;;  %v9939_v43 = vld [vmem:[#allocation156_spill] sm:$0xff] }
 0x57e   : > { %v2209_v28 = vmul.f32 %v5717_v46, %v9938_v16 }
 0x57f   : > { %2814 = vst [vmem:[%s8848_s19 + $0x58] sm:$0xf] %v5057_v37  ;;  %v3774_v3 = vadd.f32 %v3742_v63, %v3646_v62  ;;  %4255 = vst [vmem:[%s8848_s19 + $0x64] sm:$0xf] %v5154_v61  ;;  %v2335_v7 = vadd.f32 %v2303_v47, %v2207_v10  ;;  %v2208_v37 = vmul.f32 %v5719_v23, %v9939_v43  ;;  %v9940_v63 = vld [vmem:[#allocation162_spill] sm:$0xff] }
 0x580   : > { %v2252_v58 = vpop.permute.xlu1 %2251  ;;  %v3696_v60 = vpop.permute.xlu0 %3695  ;;  %v3651_v20 = vmul.f32 %v5717_v46, %v9940_v63  ;;  %v9941_v10 = vld [vmem:[#allocation158_spill] sm:$0xff] }
 0x581   : > { %v5153_v5 = vpack.c.bf16 %v3774_v3, %v3774_v3  ;;  %v2302_v6 = vmul.f32 %v2252_v58, %v8683_v8  ;;  %v5060_v11 = vpack.c.bf16 %v2335_v7, %v2335_v7  ;;  %v3745_v36 = vmul.f32 %v3696_v60, %v8718_v21  ;;  %v5721_v60 = vld [vmem:[%s6428_s15 + $0x90] sm:$0xff]  ;;  %v5724_v43 = vld [vmem:[%s6421_s23 + $0xa0] sm:$0xff] }
 0x582   : > { %v3650_v47 = vmul.f32 %v5719_v23, %v9941_v10 }
 0x583   : > { %4254 = vst [vmem:[%s8848_s19 + $0x5c] sm:$0xf] %v5153_v5  ;;  %v2334_v1 = vadd.f32 %v2302_v6, %v2206_v0  ;;  %2817 = vst [vmem:[%s8848_s19 + $0x70] sm:$0xf] %v5060_v11  ;;  %v3777_v30 = vadd.f32 %v3745_v36, %v3649_v59  ;;  %v9942_v0 = vld [vmem:[#allocation62_spill] sm:$0xff]  ;;  %v5722_v36 = vld [vmem:[%s6421_s23 + $0x88] sm:$0xff] }
 0x584   : > { %v3694_v50 = vpop.permute.xlu1 %3693  ;;  %v2258_v13 = vpop.permute.xlu0 %2257  ;;  %v2211_v6 = vmul.f32 %v5720_v25, %v9942_v0  ;;  %v9947_v0 = vld [vmem:[#allocation163_spill] sm:$0xff] }
 0x585   : > { %v5059_v48 = vpack.c.bf16 %v2334_v1, %v2334_v1  ;;  %v3744_v12 = vmul.f32 %v3694_v50, %v8683_v8  ;;  %v5156_v57 = vpack.c.bf16 %v3777_v30, %v3777_v30  ;;  %v2305_v21 = vmul.f32 %v5718_v42, %v2258_v13  ;;  %v9943_v50 = vld [vmem:[#allocation61_spill] sm:$0xff]  ;;  %v9944_v13 = vld [vmem:[#allocation164_spill] sm:$0xff] }
 0x587   : > { %2816 = vst [vmem:[%s8848_s19 + $0x68] sm:$0xf] %v5059_v48  ;;  %v3776_v27 = vadd.f32 %v3744_v12, %v3648_v2  ;;  %4257 = vst [vmem:[%s8848_s19 + $0x74] sm:$0xf] %v5156_v57  ;;  %v2337_v39 = vadd.f32 %v2305_v21, %v2209_v28  ;;  %v2210_v48 = vmul.f32 %v5722_v36, %v9943_v50 }
 0x588   : > { %v2256_v45 = vpop.permute.xlu1 %2255  ;;  %v3700_v32 = vpop.permute.xlu0 %3699  ;;  %v3653_v57 = vmul.f32 %v5720_v25, %v9944_v13 }
 0x589   : > { %v5155_v26 = vpack.c.bf16 %v3776_v27, %v3776_v27  ;;  %v2304_v8 = vmul.f32 %v2256_v45, %v8771_v24  ;;  %v5062_v31 = vpack.c.bf16 %v2337_v39, %v2337_v39  ;;  %v3747_v61 = vmul.f32 %v5718_v42, %v3700_v32  ;;  %v9945_v42 = vld [vmem:[#allocation71_spill] sm:$0xff] }
 0x58a   : > { %v3652_v21 = vmul.f32 %v5722_v36, %v9945_v42 }
 0x58b   : > { %4256 = vst [vmem:[%s8848_s19 + $0x6c] sm:$0xf] %v5155_v26  ;;  %v2336_v62 = vadd.f32 %v2304_v8, %v2208_v37  ;;  %2819 = vst [vmem:[%s8848_s19 + $0x80] sm:$0xf] %v5062_v31  ;;  %v3779_v51 = vadd.f32 %v3747_v61, %v3651_v20  ;;  %v2213_v37 = vmul.f32 %v5724_v43, %v8382_v55  ;;  %v5725_v8 = vld [vmem:[%s6428_s15 + $0xa0] sm:$0xff]  ;;  %v5726_v20 = vld [vmem:[%s6421_s23 + $0x98] sm:$0xff] }
 0x58c   : > { %v3698_v3 = vpop.permute.xlu1 %3697  ;;  %v2262_v5 = vpop.permute.xlu0 %2261  ;;  %v9946_v61 = vld [vmem:[#allocation161_spill] sm:$0xff]  ;;  %v3655_v55 = vmul.f32 %v5724_v43, %v8395_v33  ;;  %v5729_v33 = vld [vmem:[%s6428_s15 + $0xb0] sm:$0xff] }
 0x58d   : > { %v5061_v52 = vpack.c.bf16 %v2336_v62, %v2336_v62  ;;  %v3746_v58 = vmul.f32 %v3698_v3, %v8771_v24  ;;  %v5158_v7 = vpack.c.bf16 %v3779_v51, %v3779_v51  ;;  %v2307_v11 = vmul.f32 %v5721_v60, %v2262_v5  ;;  %v5723_v24 = vld [vmem:[%s6428_s15 + $0x88] sm:$0xff] }
 0x58e   : > { %v2212_v3 = vmul.f32 %v5726_v20, %v9946_v61  ;;  %v9949_v61 = vld [vmem:[#allocation165_spill] sm:$0xff] }
 0x58f   : > { %2818 = vst [vmem:[%s8848_s19 + $0x78] sm:$0xf] %v5061_v52  ;;  %v3778_v17 = vadd.f32 %v3746_v58, %v3650_v47  ;;  %4259 = vst [vmem:[%s8848_s19 + $0x84] sm:$0xf] %v5158_v7  ;;  %v2339_v59 = vadd.f32 %v2307_v11, %v2211_v6  ;;  %v5727_v52 = vld [vmem:[%s6428_s15 + $0x98] sm:$0xff]  ;;  %v3654_v6 = vmul.f32 %v5726_v20, %v9947_v0 }
 0x590   : > { %v2260_v1 = vpop.permute.xlu1 %2259  ;;  %v3704_v41 = vpop.permute.xlu0 %3703  ;;  %v5734_v20 = vld [vmem:[%s6421_s23 + $0xb8] sm:$0xff] }
 0x591   : > { %v5157_v56 = vpack.c.bf16 %v3778_v17, %v3778_v17  ;;  %v2306_v30 = vmul.f32 %v5723_v24, %v2260_v1  ;;  %v5064_v2 = vpack.c.bf16 %v2339_v59, %v2339_v59  ;;  %v3749_v27 = vmul.f32 %v5721_v60, %v3704_v41  ;;  %v5728_v59 = vld [vmem:[%s6421_s23 + $0xb0] sm:$0xff]  ;;  %v5730_v41 = vld [vmem:[%s6421_s23 + $0xa8] sm:$0xff] }
 0x592   : > { %v2215_v36 = vmul.f32 %v5728_v59, %v8421_v49  ;;  %v3657_v49 = vmul.f32 %v5728_v59, %v8427_v4  ;;  %v5733_v4 = vld [vmem:[%s6428_s15 + $0xc0] sm:$0xff] }
 0x593   : > { %4258 = vst [vmem:[%s8848_s19 + $0x7c] sm:$0xf] %v5157_v56  ;;  %v2338_v12 = vadd.f32 %v2306_v30, %v2210_v48  ;;  %2821 = vst [vmem:[%s8848_s19 + $0x90] sm:$0xf] %v5064_v2  ;;  %v3781_v28 = vadd.f32 %v3749_v27, %v3653_v57  ;;  %v2214_v2 = vmul.f32 %v5730_v41, %v8332_v34 }
 0x594   : > { %v3702_v46 = vpop.permute.xlu1 %3701  ;;  %v2266_v26 = vpop.permute.xlu0 %2265 }
 0x595   : > { %v5063_v16 = vpack.c.bf16 %v2338_v12, %v2338_v12  ;;  %v3748_v45 = vmul.f32 %v5723_v24, %v3702_v46  ;;  %v5160_v39 = vpack.c.bf16 %v3781_v28, %v3781_v28  ;;  %v2309_v32 = vmul.f32 %v5725_v8, %v2266_v26  ;;  %v5731_v12 = vld [vmem:[%s6428_s15 + $0xa8] sm:$0xff] }
 0x597   : > { %2820 = vst [vmem:[%s8848_s19 + $0x88] sm:$0xf] %v5063_v16  ;;  %v3780_v23 = vadd.f32 %v3748_v45, %v3652_v21  ;;  %4261 = vst [vmem:[%s8848_s19 + $0x94] sm:$0xf] %v5160_v39  ;;  %v2341_v63 = vadd.f32 %v2309_v32, %v2213_v37  ;;  %v9948_v45 = vld [vmem:[#allocation72_spill] sm:$0xff]  ;;  %v5732_v37 = vld [vmem:[%s6421_s23 + $0xc0] sm:$0xff] }
 0x598   : > { %v2264_v31 = vpop.permute.xlu1 %2263  ;;  %v3708_v10 = vpop.permute.xlu0 %3707  ;;  %v3656_v34 = vmul.f32 %v5730_v41, %v9948_v45  ;;  %v5740_v45 = vld [vmem:[%s6421_s23 + $0xe0] sm:$0xff] }
 0x599   : > { %v5159_v62 = vpack.c.bf16 %v3780_v23, %v3780_v23  ;;  %v2308_v51 = vmul.f32 %v5727_v52, %v2264_v31  ;;  %v5066_v47 = vpack.c.bf16 %v2341_v63, %v2341_v63  ;;  %v3751_v5 = vmul.f32 %v5725_v8, %v3708_v10 }
 0x59a   : > { %v2217_v8 = vmul.f32 %v5732_v37, %v8437_v38  ;;  %v3659_v38 = vmul.f32 %v5732_v37, %v8449_v22  ;;  %v5737_v22 = vld [vmem:[%s6428_s15 + $0xd0] sm:$0xff]  ;;  %v5742_v37 = vld [vmem:[%s6421_s23 + $0xd8] sm:$0xff] }
 0x59b   : > { %4260 = vst [vmem:[%s8848_s19 + $0x8c] sm:$0xf] %v5159_v62  ;;  %v2340_v58 = vadd.f32 %v2308_v51, %v2212_v3  ;;  %2823 = vst [vmem:[%s8848_s19 + $0xa0] sm:$0xf] %v5066_v47  ;;  %v3783_v25 = vadd.f32 %v3751_v5, %v3655_v55  ;;  %v2216_v3 = vmul.f32 %v5734_v20, %v9949_v61 }
 0x59c   : > { %v3706_v7 = vpop.permute.xlu1 %3705  ;;  %v2270_v11 = vpop.permute.xlu0 %2269 }
 0x59d   : > { %v5065_v17 = vpack.c.bf16 %v2340_v58, %v2340_v58  ;;  %v3750_v60 = vmul.f32 %v5727_v52, %v3706_v7  ;;  %v5162_v1 = vpack.c.bf16 %v3783_v25, %v3783_v25  ;;  %v2311_v50 = vmul.f32 %v5729_v33, %v2270_v11  ;;  %v5735_v52 = vld [vmem:[%s6428_s15 + $0xb8] sm:$0xff] }
 0x59e   : > { %v3658_v25 = vmul.f32 %v5734_v20, %v8417_v29 }
 0x59f   : > { %2822 = vst [vmem:[%s8848_s19 + $0x98] sm:$0xf] %v5065_v17  ;;  %v3782_v56 = vadd.f32 %v3750_v60, %v3654_v6  ;;  %4263 = vst [vmem:[%s8848_s19 + $0xa4] sm:$0xf] %v5162_v1  ;;  %v2343_v30 = vadd.f32 %v2311_v50, %v2215_v36  ;;  %v5736_v1 = vld [vmem:[%s6421_s23 + $0xd0] sm:$0xff] }
 0x5a0   : > { %v2268_v48 = vpop.permute.xlu1 %2267  ;;  %v3712_v57 = vpop.permute.xlu0 %3711 }
 0x5a1   : > { %v5161_v24 = vpack.c.bf16 %v3782_v56, %v3782_v56  ;;  %v2310_v13 = vmul.f32 %v5731_v12, %v2268_v48  ;;  %v5068_v27 = vpack.c.bf16 %v2343_v30, %v2343_v30  ;;  %v3753_v16 = vmul.f32 %v5729_v33, %v3712_v57  ;;  %v5738_v48 = vld [vmem:[%s6421_s23 + $0xc8] sm:$0xff] }
 0x5a2   : > { %v2219_v56 = vmul.f32 %v5736_v1, %v8453_v44  ;;  %v2218_v29 = vmul.f32 %v5738_v48, %v8431_v18  ;;  %v3661_v44 = vmul.f32 %v5736_v1, %v8477_v9  ;;  %v5741_v9 = vld [vmem:[%s6428_s15 + $0xe0] sm:$0xff] }
 0x5a3   : > { %4262 = vst [vmem:[%s8848_s19 + $0x9c] sm:$0xf] %v5161_v24  ;;  %v2342_v46 = vadd.f32 %v2310_v13, %v2214_v2  ;;  %2825 = vst [vmem:[%s8848_s19 + $0xb0] sm:$0xf] %v5068_v27  ;;  %v3785_v21 = vadd.f32 %v3753_v16, %v3657_v49  ;;  %v5739_v24 = vld [vmem:[%s6428_s15 + $0xc8] sm:$0xff]  ;;  %v9950_v49 = vld [vmem:[#allocation166_spill] sm:$0xff] }
 0x5a4   : > { %v3710_v28 = vpop.permute.xlu1 %3709  ;;  %v2274_v39 = vpop.permute.xlu0 %2273  ;;  %v3660_v18 = vmul.f32 %v5738_v48, %v9950_v49  ;;  %v9954_v49 = vld [vmem:[#allocation168_spill] sm:$0xff] }
 0x5a5   : > { %v5067_v42 = vpack.c.bf16 %v2342_v46, %v2342_v46  ;;  %v3752_v26 = vmul.f32 %v5731_v12, %v3710_v28  ;;  %v5164_v23 = vpack.c.bf16 %v3785_v21, %v3785_v21  ;;  %v2313_v32 = vmul.f32 %v5733_v4, %v2274_v39 }
 0x5a7   : > { %2824 = vst [vmem:[%s8848_s19 + $0xa8] sm:$0xf] %v5067_v42  ;;  %v3784_v43 = vadd.f32 %v3752_v26, %v3656_v34  ;;  %4265 = vst [vmem:[%s8848_s19 + $0xb4] sm:$0xf] %v5164_v23  ;;  %v2345_v63 = vadd.f32 %v2313_v32, %v2217_v8  ;;  %v2221_v34 = vmul.f32 %v5740_v45, %v8481_v14  ;;  %v9951_v8 = vld [vmem:[#allocation167_spill] sm:$0xff]  ;;  %v5743_v32 = vld [vmem:[%s6428_s15 + $0xd8] sm:$0xff] }
 0x5a8   : > { %v2272_v31 = vpop.permute.xlu1 %2271  ;;  %v3716_v10 = vpop.permute.xlu0 %3715  ;;  %v3663_v14 = vmul.f32 %v5740_v45, %v8495_v53  ;;  %v5745_v53 = vld [vmem:[%s6428_s15 + $0xf0] sm:$0xff] }
 0x5a9   : > { %v5163_v62 = vpack.c.bf16 %v3784_v43, %v3784_v43  ;;  %v2312_v51 = vmul.f32 %v5735_v52, %v2272_v31  ;;  %v5070_v47 = vpack.c.bf16 %v2345_v63, %v2345_v63  ;;  %v3755_v55 = vmul.f32 %v5733_v4, %v3716_v10 }
 0x5aa   : > { %v2220_v4 = vmul.f32 %v5742_v37, %v9951_v8  ;;  %v3662_v10 = vmul.f32 %v5742_v37, %v8484_v19 }
 0x5ab   : > { %4264 = vst [vmem:[%s8848_s19 + $0xac] sm:$0xf] %v5163_v62  ;;  %v2344_v58 = vadd.f32 %v2312_v51, %v2216_v3  ;;  %2827 = vst [vmem:[%s8848_s19 + $0xc0] sm:$0xf] %v5070_v47  ;;  %v3787_v17 = vadd.f32 %v3755_v55, %v3659_v38 }
 0x5ac   : > { %v3714_v5 = vpop.permute.xlu1 %3713  ;;  %v2278_v6 = vpop.permute.xlu0 %2277 }
 0x5ad   : > { %v5069_v7 = vpack.c.bf16 %v2344_v58, %v2344_v58  ;;  %v3754_v0 = vmul.f32 %v5735_v52, %v3714_v5  ;;  %v5166_v60 = vpack.c.bf16 %v3787_v17, %v3787_v17  ;;  %v2315_v59 = vmul.f32 %v5737_v22, %v2278_v6  ;;  %v5744_v5 = vld [vmem:[%s6421_s23 + $0xf0] sm:$0xff] }
 0x5af   : > { %2826 = vst [vmem:[%s8848_s19 + $0xb8] sm:$0xf] %v5069_v7  ;;  %v3786_v11 = vadd.f32 %v3754_v0, %v3658_v25  ;;  %4267 = vst [vmem:[%s8848_s19 + $0xc4] sm:$0xf] %v5166_v60  ;;  %v2347_v50 = vadd.f32 %v2315_v59, %v2219_v56  ;;  %v2223_v7 = vmul.f32 %v5744_v5, %v8505_v54  ;;  %v5746_v60 = vld [vmem:[%s6421_s23 + $0xe8] sm:$0xff] }
 0x5b0   : > { %v2276_v36 = vpop.permute.xlu1 %2275  ;;  %v3720_v41 = vpop.permute.xlu0 %3719  ;;  %v2222_v19 = vmul.f32 %v5746_v60, %v8498_v15  ;;  %v3665_v54 = vmul.f32 %v5744_v5, %v8547_v35  ;;  %v5748_v35 = vld [vmem:[%s6421_s23 + $0xf8] sm:$0xff]  ;;  %s4494_s23 = sshll.u32 %s8247_s29, 4  ;;  %s9146_s29 = scalar_lea.sflag [#allocation14], %s385_s25  ;;  %s9141_s23 = int_to_ptr.vmem [resolvable:$true] %s4494_s23 }
 0x5b1   : > { %v5165_v33 = vpack.c.bf16 %v3786_v11, %v3786_v11  ;;  %v2314_v30 = vmul.f32 %v5739_v24, %v2276_v36  ;;  %v5072_v2 = vpack.c.bf16 %v2347_v50, %v2347_v50  ;;  %v3757_v13 = vmul.f32 %v5737_v22, %v3720_v41  ;;  %v5747_v11 = vld [vmem:[%s6428_s15 + $0xe8] sm:$0xff] }
 0x5b3   : > { %4266 = vst [vmem:[%s8848_s19 + $0xbc] sm:$0xf] %v5165_v33  ;;  %v2346_v12 = vadd.f32 %v2314_v30, %v2218_v29  ;;  %2829 = vst [vmem:[%s8848_s19 + $0xd0] sm:$0xf] %v5072_v2  ;;  %v3789_v46 = vadd.f32 %v3757_v13, %v3661_v44  ;;  %v3664_v29 = vmul.f32 %v5746_v60, %v8508_v40  ;;  %v9953_v13 = vld [vmem:[#allocation169_spill] sm:$0xff] }
 0x5b4   : > { %v3718_v57 = vpop.permute.xlu1 %3717  ;;  %v2282_v28 = vpop.permute.xlu0 %2281 }
 0x5b5   : > { %v5071_v27 = vpack.c.bf16 %v2346_v12, %v2346_v12  ;;  %v3756_v16 = vmul.f32 %v5739_v24, %v3718_v57  ;;  %v5168_v42 = vpack.c.bf16 %v3789_v46, %v3789_v46  ;;  %v2317_v26 = vmul.f32 %v5741_v9, %v2282_v28  ;;  %v9952_v12 = vld [vmem:[#allocation67_spill] sm:$0xff] }
 0x5b6   : > { %v2224_v44 = vmul.f32 %v5748_v35, %v9952_v12 }
 0x5b7   : > { %2828 = vst [vmem:[%s8848_s19 + $0xc8] sm:$0xf] %v5071_v27  ;;  %v3788_v21 = vadd.f32 %v3756_v16, %v3660_v18  ;;  %4269 = vst [vmem:[%s8848_s19 + $0xd4] sm:$0xf] %v5168_v42  ;;  %v2349_v43 = vadd.f32 %v2317_v26, %v2221_v34  ;;  %v3666_v18 = vmul.f32 %v5748_v35, %v9954_v49  ;;  %v5749_v16 = vld [vmem:[%s6428_s15 + $0xf8] sm:$0xff]  ;;  %s9139_s15 = scalar_lea.hbm %s9226_s8, %s8880_s21 }
 0x5b8   : > { %v2280_v39 = vpop.permute.xlu1 %2279  ;;  %v3724_v62 = vpop.permute.xlu0 %3723 }
 0x5b9   : > { %v5167_v23 = vpack.c.bf16 %v3788_v21, %v3788_v21  ;;  %v2316_v31 = vmul.f32 %v5743_v32, %v2280_v39  ;;  %v5074_v63 = vpack.c.bf16 %v2349_v43, %v2349_v43  ;;  %v3759_v61 = vmul.f32 %v5741_v9, %v3724_v62 }
 0x5bb   : > { %4268 = vst [vmem:[%s8848_s19 + $0xcc] sm:$0xf] %v5167_v23  ;;  %v2348_v20 = vadd.f32 %v2316_v31, %v2220_v4  ;;  %2831 = vst [vmem:[%s8848_s19 + $0xe0] sm:$0xf] %v5074_v63  ;;  %v3791_v51 = vadd.f32 %v3759_v61, %v3663_v14 }
 0x5bc   : > { %v3722_v3 = vpop.permute.xlu1 %3721  ;;  %v2286_v58 = vpop.permute.xlu0 %2285 }
 0x5bd   : > { %v5073_v52 = vpack.c.bf16 %v2348_v20, %v2348_v20  ;;  %v3758_v47 = vmul.f32 %v5743_v32, %v3722_v3  ;;  %v5170_v38 = vpack.c.bf16 %v3791_v51, %v3791_v51  ;;  %v2319_v17 = vmul.f32 %v5745_v53, %v2286_v58 }
 0x5bf   : > { %2830 = vst [vmem:[%s8848_s19 + $0xd8] sm:$0xf] %v5073_v52  ;;  %v3790_v55 = vadd.f32 %v3758_v47, %v3662_v10  ;;  %4271 = vst [vmem:[%s8848_s19 + $0xe4] sm:$0xf] %v5170_v38  ;;  %v2351_v6 = vadd.f32 %v2319_v17, %v2223_v7 }
 0x5c0   : > { %v2284_v25 = vpop.permute.xlu1 %2283  ;;  %v3728_v56 = vpop.permute.xlu0 %3727 }
 0x5c1   : > { %v5169_v0 = vpack.c.bf16 %v3790_v55, %v3790_v55  ;;  %v2318_v1 = vmul.f32 %v5747_v11, %v2284_v25  ;;  %v5076_v22 = vpack.c.bf16 %v2351_v6, %v2351_v6  ;;  %v3761_v36 = vmul.f32 %v5745_v53, %v3728_v56 }
 0x5c3   : > { %4270 = vst [vmem:[%s8848_s19 + $0xdc] sm:$0xf] %v5169_v0  ;;  %v2350_v59 = vadd.f32 %v2318_v1, %v2222_v19  ;;  %2833 = vst [vmem:[%s8848_s19 + $0xf0] sm:$0xf] %v5076_v22  ;;  %v3793_v48 = vadd.f32 %v3761_v36, %v3665_v54 }
 0x5c4   : > { %v3726_v33 = vpop.permute.xlu1 %3725 }
 0x5c5   : > { %v5075_v50 = vpack.c.bf16 %v2350_v59, %v2350_v59  ;;  %v3760_v15 = vmul.f32 %v5747_v11, %v3726_v33  ;;  %v5172_v24 = vpack.c.bf16 %v3793_v48, %v3793_v48 }
 0x5c7   : > { %2832 = vst [vmem:[%s8848_s19 + $0xe8] sm:$0xf] %v5075_v50  ;;  %v3792_v30 = vadd.f32 %v3760_v15, %v3664_v29  ;;  %4273 = vst [vmem:[%s8848_s19 + $0xf4] sm:$0xf] %v5172_v24 }
 0x5c8   : > { %v2288_v41 = vpop.permute.xlu1 %2287 }
 0x5c9   : > { %v5171_v2 = vpack.c.bf16 %v3792_v30, %v3792_v30  ;;  %v2320_v57 = vmul.f32 %v2288_v41, %v9953_v13 }
 0x5cb   : > { %4272 = vst [vmem:[%s8848_s19 + $0xec] sm:$0xf] %v5171_v2  ;;  %v2352_v40 = vadd.f32 %v2320_v57, %v2224_v44 }
 0x5cc   : > { %v3730_v27 = vpop.permute.xlu1 %3729 }
 0x5cd   : > { %v5077_v46 = vpack.c.bf16 %v2352_v40, %v2352_v40  ;;  %v3762_v28 = vmul.f32 %v5749_v16, %v3730_v27 }
 0x5cf   : > { %2834 = vst [vmem:[%s8848_s19 + $0xf8] sm:$0xf] %v5077_v46  ;;  %v3794_v42 = vadd.f32 %v3762_v28, %v3666_v18 }
 0x5d1   : > { %v5173_v21 = vpack.c.bf16 %v3794_v42, %v3794_v42 }
 0x5d3   : > { %4274 = vst [vmem:[%s8848_s19 + $0xfc] sm:$0xf] %v5173_v21 }
 0x5d4   : > { %5954 = shalt.err (!%p5951_p6)
}
 0x5d5   : > { %s5955_s17 = scalar_lea.hbm %s9131_s13, 4096  ;;  %s5959_s21 = scalar_lea.hbm %s9225_s7, 8192 }
 0x5d6   : > { %p5956_p0 = scmp.ne.s32.totalorder %s9131_s13, %s5955_s17  ;;  %p5960_p5 = scmp.lt.u32.totalorder %s9131_s13, %s9225_s7 }
 0x5d7   : > { %p5961_p13 = scmp.lt.u32.totalorder %s5959_s21, %s5955_s17  ;;  %p5963_p7 = scmp.lt.u32.totalorder %s5955_s17, %s9131_s13 }
 0x5d8   : > { %p5957_p1 = pnand %p5956_p0, %p9921_p4 }
 0x5d9   : > { %p5962_p2 = por %p5961_p13, %p5960_p5 }
 0x5da   : > { %p5958_p10 = pneg %p5957_p1 }
 0x5db   : > { %p5964_p12 = por %p5963_p7, %p5962_p2 }
 0x5dd   : > { %p5965_p3 = pnand %p5964_p12, %p5958_p10 }
 0x5df   : > { %5968 = shalt.err (!%p5965_p3)
}
 0x5e0   : > { %5245 = dma.vmem_to_hbm [thread:$0]  (%p9921_p4), %s9133_s18, 4096, %s9131_s13, %s9146_s29, %s6072_s22, %s6072_s22, %s6073_s20  }
 0x5e1   : > { %s5969_s10 = scalar_lea.vmem %s9141_s23, 4096  ;;  %s6075_s11 = smov [#allocation15]  }
 0x5e2   : > { %p5970_p9 = scmp.ne.s32.totalorder %s9141_s23, %s5969_s10  ;;  %s5973_s12 = sshll.u32 %s6075_s11, 4  ;;  %s5974_s12 = int_to_ptr.vmem [resolvable:$false] %s5973_s12 }
 0x5e3   : > { %s5975_s14 = scalar_lea.vmem %s5974_s12, 8192  ;;  %p5976_p6 = scmp.lt.s32.totalorder %s9141_s23, %s5974_s12 }
 0x5e4   : > { %p5971_p8 = pnand %p5970_p9, %p9921_p4  ;;  %p5977_p0 = scmp.lt.s32.totalorder %s5975_s14, %s5969_s10 }
 0x5e6   : > { %p5972_p11 = pneg %p5971_p8  ;;  %p5978_p1 = por %p5977_p0, %p5976_p6 }
 0x5e8   : > { %p5979_p10 = pnand %p5978_p1, %p5972_p11 }
 0x5ea   : > { %5982 = shalt.err (!%p5979_p10)
}
 0x5eb   : > { %s5983_s18 = scalar_lea.hbm %s9139_s15, 4096  ;;  %s5987_s0 = scalar_lea.hbm %s9226_s8, 8192 }
 0x5ec   : > { %p5984_p5 = scmp.ne.s32.totalorder %s9139_s15, %s5983_s18  ;;  %p5988_p7 = scmp.lt.u32.totalorder %s9139_s15, %s9226_s8 }
 0x5ed   : > { %p5989_p12 = scmp.lt.u32.totalorder %s5987_s0, %s5983_s18  ;;  %p5991_p9 = scmp.lt.u32.totalorder %s5983_s18, %s9139_s15 }
 0x5ee   : > { %p5985_p13 = pnand %p5984_p5, %p9921_p4 }
 0x5ef   : > { %p5990_p3 = por %p5989_p12, %p5988_p7 }
 0x5f0   : > { %p5986_p2 = pneg %p5985_p13 }
 0x5f1   : > { %p5992_p8 = por %p5991_p9, %p5990_p3 }
 0x5f3   : > { %p5993_p11 = pnand %p5992_p8, %p5986_p2 }
 0x5f5   : > { %5996 = shalt.err (!%p5993_p11)
}
 0x5f6   : > { %5246 = dma.vmem_to_hbm [thread:$0]  (%p9921_p4), %s9141_s23, 4096, %s9139_s15, %s9146_s29, %s6072_s22, %s6072_s22, %s6073_s20  }
 0x5f7 PF: > { %s4509_s17 = sand.u32 1, %s6043_s27   ;;  %p9955_p6 = scmp.ne.s32.totalorder %s9401_s16, 0 }
 0x5f8   : > { %p9956_p0 = scmp.ge.s32.totalorder %s6055_s30, 2  ;;  %s4510_s25 = scalar_lea.sflag [#allocation4], %s4509_s17 }
 0x5fa   : > { %p5271_p1 = pnand %p9956_p0, %p9955_p6 }
 0x5fc   : > { %6034 = dma.done.wait (!%p5271_p1), %s4510_s25, 4096  }
 0x5fd   : > { %6036 = vsyncadd (!%p5271_p1), %s4510_s25, 4294963200  ;;  %s9957_s26 = sadd.s32 4294967294, %s6055_s30  }
 0x5fe   : > { %s4518_s19 = sand.u32 1, %s9957_s26  }
 0x5ff   : > { %s4519_s21 = scalar_lea.sflag [#allocation14], %s4518_s19 }
 0x600   : > { %6038 = dma.done.wait (!%p5271_p1), %s4519_s21, 8192  }
 0x601   : > { %6040 = vsyncadd (!%p5271_p1), %s4519_s21, 4294959104  ;;  %s9958_s30 = sld [smem:[#allocation24_spill]]  ;;  %s9959_s22 = sld [smem:[#allocation23_spill]] }
 0x602   : > { %s9960_s29 = sld [smem:[#allocation25_spill]]  ;;  %s9961_s27 = smov %s6047_s28 }
 0x607   : > { %p27_p4 = scmp.ge.s32.totalorder %s9958_s30, 4   ;;  %s9962_s28 = smov %s9959_s22 }
 0x609   :  { %29 = sbr.rel (!%p27_p4) target bundleno = 14 (0xe), region = 163 }
 0x610   :  { %4533 = vsyncpa [#allocation3], 1 }
 0x611   :  { %4535 = vsyncpa [#allocation3 + $0x1], 1 }
 0x612   :  { %4536 = vsyncpa [#allocation7], 1 }
 0x613   :  { %4537 = vsyncpa [#allocation4], 1 }
 0x614   :  { %4539 = vsyncpa [#allocation4 + $0x1], 1 }
 0x615   :  { %4540 = vsyncpa [#allocation14], 1 }
 0x616   :  { %4542 = vsyncpa [#allocation14 + $0x1], 1 }
 0x617   :  { %4543 = vsyncpa [#allocation5], 1 }
 0x618   :  { %4545 = vsyncpa [#allocation5 + $0x1], 1 }

</bundles_post_ra>
